<compile_context>
chip_gen: v7x
topology: tpu7x:2x2x1
jax: 0.10.0
libtpu: 0.0.40
codegen_flags: <defaults>
</compile_context>

<pallas_src>
import jax
import jax.numpy as jnp
from jax.experimental import pallas as pl
from jax.experimental.pallas import tpu as pltpu


# ----------------------------- helpers -----------------------------
def _fold_bn(gamma, beta, mean, var, eps=1e-5):
    gamma = gamma.astype(jnp.float32)
    beta = beta.astype(jnp.float32)
    mean = mean.astype(jnp.float32)
    var = var.astype(jnp.float32)
    scale = gamma / jnp.sqrt(var + eps)
    shift = beta - mean * scale
    return scale, shift


def _round_up(v, m):
    return ((v + m - 1) // m) * m


# ----------------------------- fused kernel -----------------------------
def _make_fused_kernel(H, W, K, has_expand, use_res):
    HW = H * W
    P = K // 2
    PW = P * W
    inv_hw = 1.0 / float(HW)

    def body(x_ref, dxm_ref, wexp_ref, bn0_ref, wdw_ref, b1_ref,
             wse1_ref, bse1_ref, wse2_ref, bse2_ref, wproj_ref, b2_ref,
             o_ref, hpad_ref):
        C = wdw_ref.shape[1]                       # hidden channel count

        # ---- 1x1 expand conv (bf16 MXU, f32 acc); BN0 scale pre-folded into w_exp
        if has_expand:
            h = jnp.dot(x_ref[0], wexp_ref[...],
                        preferred_element_type=jnp.float32) + bn0_ref[...]
        else:
            # nn.Identity expand: BN0 applied directly to x (scale not foldable)
            h = x_ref[0].astype(jnp.float32) * bn0_ref[0:1, :] + bn0_ref[1:2, :]
        h = jnp.clip(h, 0.0, 6.0)                  # ReLU6

        # ---- depthwise KxK conv (stride 1); BN1 scale pre-folded into the taps
        # hpad holds h with P*W zero halo rows above and below (flattened pixels).
        if PW > 0:
            @pl.when(pl.program_id(0) == 0)        # halo rows never change
            def _init_halo():
                z = jnp.zeros((PW, C), jnp.float32)
                hpad_ref[0:PW, :] = z
                hpad_ref[PW + HW:PW + HW + PW, :] = z
        hpad_ref[PW:PW + HW, :] = h

        wdw = wdw_ref[...]                         # (K*K, C) loaded once (hoisted)
        acc = None
        for dx in range(K):
            # combine the K row taps for this dx using aligned slices (offset dy*W)
            a = None
            for dy in range(K):
                tap_w = wdw[dy * K + dx:dy * K + dx + 1, :]
                t = hpad_ref[dy * W:dy * W + HW, :] * tap_w
                a = t if a is None else a + t
            if dx == P:
                contrib = a                        # center column: no shift
            else:
                # column shift by (dx - P) on the XLU + precomputed edge mask
                sh = pltpu.roll(a, shift=(P - dx) % HW, axis=0)
                contrib = sh * dxm_ref[dx]
            acc = contrib if acc is None else acc + contrib
        d = jnp.clip(acc + b1_ref[...], 0.0, 6.0)  # BN1 shift + ReLU6

        # ---- Squeeze-Excitation: global avg pool -> FC -> ReLU -> FC -> sigmoid
        pooled = jnp.sum(d, axis=0, keepdims=True) * inv_hw          # (1, C)
        se = jnp.dot(pooled, wse1_ref[...],
                     preferred_element_type=jnp.float32) + bse1_ref[...]
        se = jnp.maximum(se, 0.0)
        se = jnp.dot(se, wse2_ref[...],
                     preferred_element_type=jnp.float32) + bse2_ref[...]
        se = jax.nn.sigmoid(se)
        d = d * se

        # ---- 1x1 project conv (bf16 MXU); BN2 scale pre-folded into w_proj
        y = jnp.dot(d.astype(jnp.bfloat16), wproj_ref[...],
                    preferred_element_type=jnp.float32) + b2_ref[...]
        if use_res:
            y = y + x_ref[0].astype(jnp.float32)   # residual kept in f32
        o_ref[0] = y

    if has_expand:
        def kernel(x_ref, dxm_ref, wexp_ref, b0_ref, wdw_ref, b1_ref,
                   wse1_ref, bse1_ref, wse2_ref, bse2_ref, wproj_ref, b2_ref,
                   o_ref, hpad_ref):
            body(x_ref, dxm_ref, wexp_ref, b0_ref, wdw_ref, b1_ref,
                 wse1_ref, bse1_ref, wse2_ref, bse2_ref, wproj_ref, b2_ref,
                 o_ref, hpad_ref)
    else:
        def kernel(x_ref, dxm_ref, bn0_ref, wdw_ref, b1_ref,
                   wse1_ref, bse1_ref, wse2_ref, bse2_ref, wproj_ref, b2_ref,
                   o_ref, hpad_ref):
            body(x_ref, dxm_ref, None, bn0_ref, wdw_ref, b1_ref,
                 wse1_ref, bse1_ref, wse2_ref, bse2_ref, wproj_ref, b2_ref,
                 o_ref, hpad_ref)
    return kernel


# ----------------------------- wrapper -----------------------------
def mbconv_forward(x_nchw, params, *, kernel_size, stride, expansion_factor):
    """Fused MBConv forward.  x: (N, Cin, H, W) f32 -> (N, Cout, H, W) f32."""
    assert stride == 1          # TODO(synk): strided depthwise not implemented
    assert kernel_size % 2 == 1
    N, cin, H, W = x_nchw.shape
    K = kernel_size
    P = K // 2
    HW = H * W

    hidden = params["bn0"][0].shape[0]
    cout = params["bn2"][0].shape[0]
    cr = params["b_se1"].shape[0]
    has_expand = (expansion_factor != 1)
    use_res = (stride == 1 and cin == cout)

    # ---- fold BN (inference mode); scales go INTO the conv weights (f32 fold,
    #      then bf16 cast for MXU operands), shifts stay in-kernel.
    s0, b0 = _fold_bn(*params["bn0"])
    s1, b1 = _fold_bn(*params["bn1"])
    s2, b2 = _fold_bn(*params["bn2"])

    CRp = _round_up(cr, 128)                       # lane-dense SE reduction dim
    w_dw = params["w_dw"].astype(jnp.float32) * s1[None, :]          # (K*K, hidden)
    b1r = b1.reshape(1, hidden)
    w_se1 = jnp.pad(params["w_se1"].astype(jnp.float32), ((0, 0), (0, CRp - cr)))
    b_se1 = jnp.pad(params["b_se1"].astype(jnp.float32), (0, CRp - cr)).reshape(1, CRp)
    w_se2 = jnp.pad(params["w_se2"].astype(jnp.float32), ((0, CRp - cr), (0, 0)))
    b_se2 = params["b_se2"].astype(jnp.float32).reshape(1, hidden)
    w_proj = (params["w_proj"].astype(jnp.float32) * s2[None, :]).astype(jnp.bfloat16)
    b2r = b2.reshape(1, cout)

    # ---- NCHW f32 -> (N, HW, cin) bf16, channels UNPADDED in HBM
    x = jnp.transpose(x_nchw, (0, 2, 3, 1)).reshape(N, HW, cin).astype(jnp.bfloat16)

    # ---- precomputed per-dx edge-validity masks (1.0 valid / 0.0 halo column)
    col = (jnp.arange(HW, dtype=jnp.int32) % W).reshape(HW, 1)
    masks = []
    for dx in range(K):
        if dx < P:
            m = col >= (P - dx)
        elif dx > P:
            m = col < (W + P - dx)
        else:
            m = jnp.ones_like(col, dtype=jnp.bool_)
        masks.append(m.astype(jnp.float32))
    dxmask = jnp.stack(masks, axis=0)              # (K, HW, 1)

    rep2 = lambda n: (0, 0)
    rep3 = lambda n: (0, 0, 0)
    in_specs = [
        pl.BlockSpec((1, HW, cin), lambda n: (n, 0, 0)),   # input pixels (bf16)
        pl.BlockSpec((K, HW, 1), rep3),                    # dx column masks
    ]
    operands = [x, dxmask]
    if has_expand:
        w_exp = (params["w_exp"].astype(jnp.float32) * s0[None, :]).astype(jnp.bfloat16)
        in_specs += [pl.BlockSpec((cin, hidden), rep2),    # expand weights (scale folded)
                     pl.BlockSpec((1, hidden), rep2)]      # bn0 shift
        operands += [w_exp, b0.reshape(1, hidden)]
    else:
        in_specs += [pl.BlockSpec((2, hidden), rep2)]      # bn0 scale/shift
        operands += [jnp.stack([s0, b0], axis=0)]
    in_specs += [
        pl.BlockSpec((K * K, hidden), rep2),   # depthwise taps (scale folded)
        pl.BlockSpec((1, hidden), rep2),       # bn1 shift
        pl.BlockSpec((hidden, CRp), rep2),     # SE fc1
        pl.BlockSpec((1, CRp), rep2),          # SE bias1
        pl.BlockSpec((CRp, hidden), rep2),     # SE fc2
        pl.BlockSpec((1, hidden), rep2),       # SE bias2
        pl.BlockSpec((hidden, cout), rep2),    # project weights (scale folded)
        pl.BlockSpec((1, cout), rep2),         # bn2 shift
    ]
    operands += [w_dw, b1r, w_se1, b_se1, w_se2, b_se2, w_proj, b2r]

    hpad_rows = _round_up((H + 2 * P) * W, 8)
    kernel = _make_fused_kernel(H, W, K, has_expand, use_res)
    out2d = pl.pallas_call(
        kernel,
        out_shape=jax.ShapeDtypeStruct((N, HW, cout), jnp.float32),
        grid=(N,),
        in_specs=in_specs,
        out_specs=pl.BlockSpec((1, HW, cout), lambda n: (n, 0, 0)),
        scratch_shapes=[
            pltpu.VMEM((hpad_rows, hidden), jnp.float32),  # H-padded hidden activation
        ],
        compiler_params=pltpu.CompilerParams(
            # batch axis is "arbitrary": the hpad halo init only runs on step 0,
            # so this axis must execute sequentially on one core.
            dimension_semantics=("arbitrary",),
            vmem_limit_bytes=64 * 1024 * 1024,
        ),
    )(*operands)

    out = out2d.reshape(N, H, W, cout)
    return jnp.transpose(out, (0, 3, 1, 2))                # NHWC -> NCHW


# ---------------- pure-JAX reference (same math, no Pallas, full f32) ----------------
def mbconv_reference(x_nchw, params, *, kernel_size, stride):
    x = jnp.transpose(x_nchw.astype(jnp.float32), (0, 2, 3, 1))
    N, H, W, cin = x.shape
    K = kernel_size
    P = K // 2
    w_exp = params["w_exp"]
    w_proj = params["w_proj"]
    cout = w_proj.shape[1]
    use_res = (stride == 1 and cin == cout)
    s0, b0 = _fold_bn(*params["bn0"])
    s1, b1 = _fold_bn(*params["bn1"])
    s2, b2 = _fold_bn(*params["bn2"])

    h = jnp.clip(jnp.einsum("nhwc,cd->nhwd", x, w_exp) * s0 + b0, 0.0, 6.0)
    hp = jnp.pad(h, ((0, 0), (P, P), (P, P), (0, 0)))
    acc = jnp.zeros(h.shape, jnp.float32)
    for dy in range(K):
        for dx in range(K):
            acc = acc + hp[:, dy:dy + H, dx:dx + W, :] * params["w_dw"][dy * K + dx]
    d = jnp.clip(acc * s1 + b1, 0.0, 6.0)
    pooled = d.mean(axis=(1, 2))
    se = jnp.maximum(pooled @ params["w_se1"] + params["b_se1"], 0.0)
    se = jax.nn.sigmoid(se @ params["w_se2"] + params["b_se2"])
    d = d * se[:, None, None, :]
    y = jnp.einsum("nhwc,cd->nhwd", d, w_proj) * s2 + b2
    if use_res:
        y = y + x
    return jnp.transpose(y, (0, 3, 1, 2))


# ---------------- deterministic parameter init (matches MBConv.__init__ shapes) ----------------
def init_params(key, in_channels, out_channels, kernel_size, expansion_factor, reduction=4):
    hidden = in_channels * expansion_factor
    cr = hidden // reduction
    ks = jax.random.split(key, 10)

    def bn_params(k, c):
        k1, k2, k3, k4 = jax.random.split(k, 4)
        gamma = 1.0 + 0.1 * jax.random.normal(k1, (c,), dtype=jnp.float32)
        beta = 0.1 * jax.random.normal(k2, (c,), dtype=jnp.float32)
        mean = 0.1 * jax.random.normal(k3, (c,), dtype=jnp.float32)
        var = 1.0 + 0.1 * jax.random.uniform(k4, (c,), dtype=jnp.float32)
        return (gamma, beta, mean, var)

    p = {}
    if expansion_factor != 1:
        p["w_exp"] = 0.3 * jax.random.normal(ks[0], (in_channels, hidden), dtype=jnp.float32)
    else:
        p["w_exp"] = jnp.eye(in_channels, dtype=jnp.float32)   # nn.Identity expand
    p["bn0"] = bn_params(ks[1], hidden)
    p["w_dw"] = 0.3 * jax.random.normal(ks[2], (kernel_size * kernel_size, hidden), dtype=jnp.float32)
    p["bn1"] = bn_params(ks[3], hidden)
    p["w_se1"] = 0.3 * jax.random.normal(ks[4], (hidden, cr), dtype=jnp.float32)
    p["b_se1"] = 0.1 * jax.random.normal(ks[5], (cr,), dtype=jnp.float32)
    p["w_se2"] = 0.3 * jax.random.normal(ks[6], (cr, hidden), dtype=jnp.float32)
    p["b_se2"] = 0.1 * jax.random.normal(ks[7], (hidden,), dtype=jnp.float32)
    p["w_proj"] = 0.3 * jax.random.normal(ks[8], (hidden, out_channels), dtype=jnp.float32)
    p["bn2"] = bn_params(ks[9], out_channels)
    return p


if __name__ == "__main__":
    key = jax.random.PRNGKey(0)
    fwd = jax.jit(mbconv_forward,
                  static_argnames=("kernel_size", "stride", "expansion_factor"))

    configs = [
        # (N, Cin, Cout, H, W, K, stride, expansion)
        (2, 8, 8, 16, 16, 3, 1, 4),    # residual + expand-matmul path
        (2, 8, 16, 16, 16, 3, 1, 1),   # identity expand (ef == 1), no residual
    ]
    for (N, Cin, Cout, H, W, K, stride, ef) in configs:
        key, kx, kp = jax.random.split(key, 3)
        x = jax.random.normal(kx, (N, Cin, H, W), dtype=jnp.float32)   # NCHW like PyTorch
        params = init_params(kp, Cin, Cout, K, ef)

        out = fwd(x, params, kernel_size=K, stride=stride, expansion_factor=ef)
        out = jax.block_until_ready(out)

        ref = mbconv_reference(x, params, kernel_size=K, stride=stride)
        assert out.shape == (N, Cout, H, W), out.shape
        err = float(jnp.max(jnp.abs(out - ref)))
        # expand/project matmuls use bf16 operands with the BN scale folded in,
        # and x is carried in bf16 (incl. the skip path), so the tolerance
        # reflects bf16 rounding of MXU/skip inputs, not f32-exact math.
        assert err < 1.5e-1, f"max abs err {err}"
    print("KERNEL_OK")
</pallas_src>

<mosaic_0001>
module attributes {stable_mosaic.version = 11 : i64} {
  func.func @kernel(%arg0: i32, %arg1: memref<1x256x8xbf16, #tpu.memory_space<vmem>>, %arg2: memref<3x256x1xf32, #tpu.memory_space<vmem>>, %arg3: memref<8x32xbf16, #tpu.memory_space<vmem>>, %arg4: memref<1x32xf32, #tpu.memory_space<vmem>>, %arg5: memref<9x32xf32, #tpu.memory_space<vmem>>, %arg6: memref<1x32xf32, #tpu.memory_space<vmem>>, %arg7: memref<32x128xf32, #tpu.memory_space<vmem>>, %arg8: memref<1x128xf32, #tpu.memory_space<vmem>>, %arg9: memref<128x32xf32, #tpu.memory_space<vmem>>, %arg10: memref<1x32xf32, #tpu.memory_space<vmem>>, %arg11: memref<32x8xbf16, #tpu.memory_space<vmem>>, %arg12: memref<1x8xf32, #tpu.memory_space<vmem>>, %arg13: memref<1x256x8xf32, #tpu.memory_space<vmem>>, %arg14: memref<288x32xf32, #tpu.memory_space<vmem>>) attributes {dimension_semantics = [#tpu.dimension_semantics<arbitrary>], iteration_bounds = array<i64: 2>, scalar_prefetch = 0 : i64, scratch_operands = 1 : i64, tpu.core_type = #tpu.core_type<tc>, window_params = [{transform_indices = @transform_0, window_bounds = array<i64: 1, 256, 8>}, {pipeline_mode = #tpu.pipeline_mode<synchronous>, transform_indices = @transform_1, window_bounds = array<i64: 3, 256, 1>}, {pipeline_mode = #tpu.pipeline_mode<synchronous>, transform_indices = @transform_2, window_bounds = array<i64: 8, 32>}, {pipeline_mode = #tpu.pipeline_mode<synchronous>, transform_indices = @transform_3, window_bounds = array<i64: 1, 32>}, {pipeline_mode = #tpu.pipeline_mode<synchronous>, transform_indices = @transform_4, window_bounds = array<i64: 9, 32>}, {pipeline_mode = #tpu.pipeline_mode<synchronous>, transform_indices = @transform_5, window_bounds = array<i64: 1, 32>}, {pipeline_mode = #tpu.pipeline_mode<synchronous>, transform_indices = @transform_6, window_bounds = array<i64: 32, 128>}, {pipeline_mode = #tpu.pipeline_mode<synchronous>, transform_indices = @transform_7, window_bounds = array<i64: 1, 128>}, {pipeline_mode = #tpu.pipeline_mode<synchronous>, transform_indices = @transform_8, window_bounds = array<i64: 128, 32>}, {pipeline_mode = #tpu.pipeline_mode<synchronous>, transform_indices = @transform_9, window_bounds = array<i64: 1, 32>}, {pipeline_mode = #tpu.pipeline_mode<synchronous>, transform_indices = @transform_10, window_bounds = array<i64: 32, 8>}, {pipeline_mode = #tpu.pipeline_mode<synchronous>, transform_indices = @transform_11, window_bounds = array<i64: 1, 8>}, {transform_indices = @transform_12, window_bounds = array<i64: 1, 256, 8>}]} {
    %c0 = arith.constant 0 : index
    %c0_0 = arith.constant 0 : index
    %c0_1 = arith.constant 0 : index
    %0 = vector.load %arg1[%c0, %c0_0, %c0_1] : memref<1x256x8xbf16, #tpu.memory_space<vmem>>, vector<1x256x8xbf16>
    %1 = vector.shape_cast %0 : vector<1x256x8xbf16> to vector<256x8xbf16>
    %c0_2 = arith.constant 0 : index
    %c0_3 = arith.constant 0 : index
    %2 = vector.load %arg3[%c0_2, %c0_3] : memref<8x32xbf16, #tpu.memory_space<vmem>>, vector<8x32xbf16>
    %cst = arith.constant dense<0.000000e+00> : vector<256x32xf32>
    %3 = tpu.matmul %1, %2, %cst {dimension_numbers = #tpu.dot_dimension_numbers<[1], [0], [0], [1], [0, 0, 1, 1], [], []>} : vector<256x8xbf16>, vector<8x32xbf16>, vector<256x32xf32> -> vector<256x32xf32>
    %c0_4 = arith.constant 0 : index
    %c0_5 = arith.constant 0 : index
    %4 = vector.load %arg4[%c0_4, %c0_5] : memref<1x32xf32, #tpu.memory_space<vmem>>, vector<1x32xf32>
    %5 = vector.broadcast %4 : vector<1x32xf32> to vector<256x32xf32>
    %6 = arith.addf %3, %5 : vector<256x32xf32>
    %cst_6 = arith.constant 0.000000e+00 : f32
    %cst_7 = arith.constant 6.000000e+00 : f32
    %7 = vector.broadcast %cst_6 : f32 to vector<256x32xf32>
    %8 = arith.maximumf %7, %6 : vector<256x32xf32>
    %9 = vector.broadcast %cst_7 : f32 to vector<256x32xf32>
    %10 = arith.minimumf %9, %8 : vector<256x32xf32>
    %c0_i32 = arith.constant 0 : i32
    %11 = arith.cmpi eq, %arg0, %c0_i32 : i32
    %12 = arith.extui %11 : i1 to i32
    %c0_i32_8 = arith.constant 0 : i32
    %13 = arith.cmpi ne, %12, %c0_i32_8 : i32
    scf.if %13 {
      %cst_63 = arith.constant 0.000000e+00 : f32
      %111 = vector.broadcast %cst_63 : f32 to vector<16x32xf32>
      %c0_64 = arith.constant 0 : index
      %c0_65 = arith.constant 0 : index
      %112 = vector.load %arg14[%c0_64, %c0_65] : memref<288x32xf32, #tpu.memory_space<vmem>>, vector<16x32xf32>
      tpu.vector_store %arg14[%c0_64, %c0_65], %111 {strides = array<i32>} : memref<288x32xf32, #tpu.memory_space<vmem>>, vector<16x32xf32>,
      %c272 = arith.constant 272 : index
      %c0_66 = arith.constant 0 : index
      %113 = vector.load %arg14[%c272, %c0_66] : memref<288x32xf32, #tpu.memory_space<vmem>>, vector<16x32xf32>
      tpu.vector_store %arg14[%c272, %c0_66], %111 {strides = array<i32>} : memref<288x32xf32, #tpu.memory_space<vmem>>, vector<16x32xf32>,
    } else {
    }
    %c16 = arith.constant 16 : index
    %c0_9 = arith.constant 0 : index
    %14 = vector.load %arg14[%c16, %c0_9] : memref<288x32xf32, #tpu.memory_space<vmem>>, vector<256x32xf32>
    tpu.vector_store %arg14[%c16, %c0_9], %10 {strides = array<i32>} : memref<288x32xf32, #tpu.memory_space<vmem>>, vector<256x32xf32>,
    %c0_10 = arith.constant 0 : index
    %c0_11 = arith.constant 0 : index
    %15 = vector.load %arg5[%c0_10, %c0_11] : memref<9x32xf32, #tpu.memory_space<vmem>>, vector<9x32xf32>
    %16 = vector.extract_strided_slice %15 {offsets = [0, 0], sizes = [1, 32], strides = [1, 1]} : vector<9x32xf32> to vector<1x32xf32>
    %c0_12 = arith.constant 0 : index
    %c0_13 = arith.constant 0 : index
    %17 = vector.load %arg14[%c0_12, %c0_13] : memref<288x32xf32, #tpu.memory_space<vmem>>, vector<256x32xf32>
    %18 = vector.broadcast %16 : vector<1x32xf32> to vector<256x32xf32>
    %19 = arith.mulf %17, %18 : vector<256x32xf32>
    %20 = vector.extract_strided_slice %15 {offsets = [3, 0], sizes = [1, 32], strides = [1, 1]} : vector<9x32xf32> to vector<1x32xf32>
    %c16_14 = arith.constant 16 : index
    %c0_15 = arith.constant 0 : index
    %21 = vector.load %arg14[%c16_14, %c0_15] : memref<288x32xf32, #tpu.memory_space<vmem>>, vector<256x32xf32>
    %22 = vector.broadcast %20 : vector<1x32xf32> to vector<256x32xf32>
    %23 = arith.mulf %21, %22 : vector<256x32xf32>
    %24 = arith.addf %19, %23 : vector<256x32xf32>
    %25 = vector.extract_strided_slice %15 {offsets = [6, 0], sizes = [1, 32], strides = [1, 1]} : vector<9x32xf32> to vector<1x32xf32>
    %c32 = arith.constant 32 : index
    %c0_16 = arith.constant 0 : index
    %26 = vector.load %arg14[%c32, %c0_16] : memref<288x32xf32, #tpu.memory_space<vmem>>, vector<256x32xf32>
    %27 = vector.broadcast %25 : vector<1x32xf32> to vector<256x32xf32>
    %28 = arith.mulf %26, %27 : vector<256x32xf32>
    %29 = arith.addf %24, %28 : vector<256x32xf32>
    %c1_i32 = arith.constant 1 : i32
    %30 = tpu.dynamic_rotate %29 by %c1_i32 dim 0 : vector<256x32xf32>, i32 -> vector<256x32xf32>
    %c0_17 = arith.constant 0 : index
    %c0_18 = arith.constant 0 : index
    %c0_19 = arith.constant 0 : index
    %31 = vector.load %arg2[%c0_17, %c0_18, %c0_19] : memref<3x256x1xf32, #tpu.memory_space<vmem>>, vector<1x256x1xf32>
    %32 = vector.shape_cast %31 : vector<1x256x1xf32> to vector<256x1xf32>
    %33 = vector.broadcast %32 : vector<256x1xf32> to vector<256x32xf32>
    %34 = arith.mulf %30, %33 : vector<256x32xf32>
    %35 = vector.extract_strided_slice %15 {offsets = [1, 0], sizes = [1, 32], strides = [1, 1]} : vector<9x32xf32> to vector<1x32xf32>
    %c0_20 = arith.constant 0 : index
    %c0_21 = arith.constant 0 : index
    %36 = vector.load %arg14[%c0_20, %c0_21] : memref<288x32xf32, #tpu.memory_space<vmem>>, vector<256x32xf32>
    %37 = vector.broadcast %35 : vector<1x32xf32> to vector<256x32xf32>
    %38 = arith.mulf %36, %37 : vector<256x32xf32>
    %39 = vector.extract_strided_slice %15 {offsets = [4, 0], sizes = [1, 32], strides = [1, 1]} : vector<9x32xf32> to vector<1x32xf32>
    %c16_22 = arith.constant 16 : index
    %c0_23 = arith.constant 0 : index
    %40 = vector.load %arg14[%c16_22, %c0_23] : memref<288x32xf32, #tpu.memory_space<vmem>>, vector<256x32xf32>
    %41 = vector.broadcast %39 : vector<1x32xf32> to vector<256x32xf32>
    %42 = arith.mulf %40, %41 : vector<256x32xf32>
    %43 = arith.addf %38, %42 : vector<256x32xf32>
    %44 = vector.extract_strided_slice %15 {offsets = [7, 0], sizes = [1, 32], strides = [1, 1]} : vector<9x32xf32> to vector<1x32xf32>
    %c32_24 = arith.constant 32 : index
    %c0_25 = arith.constant 0 : index
    %45 = vector.load %arg14[%c32_24, %c0_25] : memref<288x32xf32, #tpu.memory_space<vmem>>, vector<256x32xf32>
    %46 = vector.broadcast %44 : vector<1x32xf32> to vector<256x32xf32>
    %47 = arith.mulf %45, %46 : vector<256x32xf32>
    %48 = arith.addf %43, %47 : vector<256x32xf32>
    %49 = arith.addf %34, %48 : vector<256x32xf32>
    %50 = vector.extract_strided_slice %15 {offsets = [2, 0], sizes = [1, 32], strides = [1, 1]} : vector<9x32xf32> to vector<1x32xf32>
    %c0_26 = arith.constant 0 : index
    %c0_27 = arith.constant 0 : index
    %51 = vector.load %arg14[%c0_26, %c0_27] : memref<288x32xf32, #tpu.memory_space<vmem>>, vector<256x32xf32>
    %52 = vector.broadcast %50 : vector<1x32xf32> to vector<256x32xf32>
    %53 = arith.mulf %51, %52 : vector<256x32xf32>
    %54 = vector.extract_strided_slice %15 {offsets = [5, 0], sizes = [1, 32], strides = [1, 1]} : vector<9x32xf32> to vector<1x32xf32>
    %c16_28 = arith.constant 16 : index
    %c0_29 = arith.constant 0 : index
    %55 = vector.load %arg14[%c16_28, %c0_29] : memref<288x32xf32, #tpu.memory_space<vmem>>, vector<256x32xf32>
    %56 = vector.broadcast %54 : vector<1x32xf32> to vector<256x32xf32>
    %57 = arith.mulf %55, %56 : vector<256x32xf32>
    %58 = arith.addf %53, %57 : vector<256x32xf32>
    %59 = vector.extract_strided_slice %15 {offsets = [8, 0], sizes = [1, 32], strides = [1, 1]} : vector<9x32xf32> to vector<1x32xf32>
    %c32_30 = arith.constant 32 : index
    %c0_31 = arith.constant 0 : index
    %60 = vector.load %arg14[%c32_30, %c0_31] : memref<288x32xf32, #tpu.memory_space<vmem>>, vector<256x32xf32>
    %61 = vector.broadcast %59 : vector<1x32xf32> to vector<256x32xf32>
    %62 = arith.mulf %60, %61 : vector<256x32xf32>
    %63 = arith.addf %58, %62 : vector<256x32xf32>
    %c255_i32 = arith.constant 255 : i32
    %64 = tpu.dynamic_rotate %63 by %c255_i32 dim 0 : vector<256x32xf32>, i32 -> vector<256x32xf32>
    %c2 = arith.constant 2 : index
    %c0_32 = arith.constant 0 : index
    %c0_33 = arith.constant 0 : index
    %65 = vector.load %arg2[%c2, %c0_32, %c0_33] : memref<3x256x1xf32, #tpu.memory_space<vmem>>, vector<1x256x1xf32>
    %66 = vector.shape_cast %65 : vector<1x256x1xf32> to vector<256x1xf32>
    %67 = vector.broadcast %66 : vector<256x1xf32> to vector<256x32xf32>
    %68 = arith.mulf %64, %67 : vector<256x32xf32>
    %69 = arith.addf %49, %68 : vector<256x32xf32>
    %c0_34 = arith.constant 0 : index
    %c0_35 = arith.constant 0 : index
    %70 = vector.load %arg6[%c0_34, %c0_35] : memref<1x32xf32, #tpu.memory_space<vmem>>, vector<1x32xf32>
    %71 = vector.broadcast %70 : vector<1x32xf32> to vector<256x32xf32>
    %72 = arith.addf %69, %71 : vector<256x32xf32>
    %cst_36 = arith.constant 0.000000e+00 : f32
    %cst_37 = arith.constant 6.000000e+00 : f32
    %73 = vector.broadcast %cst_36 : f32 to vector<256x32xf32>
    %74 = arith.maximumf %73, %72 : vector<256x32xf32>
    %75 = vector.broadcast %cst_37 : f32 to vector<256x32xf32>
    %76 = arith.minimumf %75, %74 : vector<256x32xf32>
    %cst_38 = arith.constant dense<0.000000e+00> : vector<32xf32>
    %77 = vector.multi_reduction <add>, %76, %cst_38 [0] : vector<256x32xf32> to vector<32xf32>
    %78 = vector.shape_cast %77 : vector<32xf32> to vector<1x32xf32>
    %cst_39 = arith.constant 3.906250e-03 : f32
    %79 = vector.broadcast %cst_39 : f32 to vector<1x32xf32>
    %80 = arith.mulf %78, %79 : vector<1x32xf32>
    %c0_40 = arith.constant 0 : index
    %c0_41 = arith.constant 0 : index
    %81 = vector.load %arg7[%c0_40, %c0_41] : memref<32x128xf32, #tpu.memory_space<vmem>>, vector<32x128xf32>
    %cst_42 = arith.constant dense<0.000000e+00> : vector<1x128xf32>
    %82 = tpu.matmul %80, %81, %cst_42 {dimension_numbers = #tpu.dot_dimension_numbers<[1], [0], [0], [1], [0, 0, 1, 1], [], []>} : vector<1x32xf32>, vector<32x128xf32>, vector<1x128xf32> -> vector<1x128xf32>
    %c0_43 = arith.constant 0 : index
    %c0_44 = arith.constant 0 : index
    %83 = vector.load %arg8[%c0_43, %c0_44] : memref<1x128xf32, #tpu.memory_space<vmem>>, vector<1x128xf32>
    %84 = arith.addf %82, %83 : vector<1x128xf32>
    %cst_45 = arith.constant 0.000000e+00 : f32
    %85 = vector.broadcast %cst_45 : f32 to vector<1x128xf32>
    %86 = arith.maximumf %84, %85 : vector<1x128xf32>
    %c0_46 = arith.constant 0 : index
    %c0_47 = arith.constant 0 : index
    %87 = vector.load %arg9[%c0_46, %c0_47] : memref<128x32xf32, #tpu.memory_space<vmem>>, vector<128x32xf32>
    %cst_48 = arith.constant dense<0.000000e+00> : vector<1x32xf32>
    %88 = tpu.matmul %86, %87, %cst_48 {dimension_numbers = #tpu.dot_dimension_numbers<[1], [0], [0], [1], [0, 0, 1, 1], [], []>} : vector<1x128xf32>, vector<128x32xf32>, vector<1x32xf32> -> vector<1x32xf32>
    %c0_49 = arith.constant 0 : index
    %c0_50 = arith.constant 0 : index
    %89 = vector.load %arg10[%c0_49, %c0_50] : memref<1x32xf32, #tpu.memory_space<vmem>>, vector<1x32xf32>
    %90 = arith.addf %88, %89 : vector<1x32xf32>
    %91 = arith.negf %90 : vector<1x32xf32>
    %92 = math.exp %91 : vector<1x32xf32>
    %cst_51 = arith.constant 1.000000e+00 : f32
    %93 = vector.broadcast %cst_51 : f32 to vector<1x32xf32>
    %94 = arith.addf %93, %92 : vector<1x32xf32>
    %95 = arith.divf %93, %94 : vector<1x32xf32>
    %96 = vector.broadcast %95 : vector<1x32xf32> to vector<256x32xf32>
    %97 = arith.mulf %76, %96 : vector<256x32xf32>
    %98 = arith.truncf %97 : vector<256x32xf32> to vector<256x32xbf16>
    %c0_52 = arith.constant 0 : index
    %c0_53 = arith.constant 0 : index
    %99 = vector.load %arg11[%c0_52, %c0_53] : memref<32x8xbf16, #tpu.memory_space<vmem>>, vector<32x8xbf16>
    %cst_54 = arith.constant dense<0.000000e+00> : vector<256x8xf32>
    %100 = tpu.matmul %98, %99, %cst_54 {dimension_numbers = #tpu.dot_dimension_numbers<[1], [0], [0], [1], [0, 0, 1, 1], [], []>} : vector<256x32xbf16>, vector<32x8xbf16>, vector<256x8xf32> -> vector<256x8xf32>
    %c0_55 = arith.constant 0 : index
    %c0_56 = arith.constant 0 : index
    %101 = vector.load %arg12[%c0_55, %c0_56] : memref<1x8xf32, #tpu.memory_space<vmem>>, vector<1x8xf32>
    %102 = vector.broadcast %101 : vector<1x8xf32> to vector<256x8xf32>
    %103 = arith.addf %100, %102 : vector<256x8xf32>
    %c0_57 = arith.constant 0 : index
    %c0_58 = arith.constant 0 : index
    %c0_59 = arith.constant 0 : index
    %104 = vector.load %arg1[%c0_57, %c0_58, %c0_59] : memref<1x256x8xbf16, #tpu.memory_space<vmem>>, vector<1x256x8xbf16>
    %105 = vector.shape_cast %104 : vector<1x256x8xbf16> to vector<256x8xbf16>
    %106 = arith.extf %105 : vector<256x8xbf16> to vector<256x8xf32>
    %107 = arith.addf %103, %106 : vector<256x8xf32>
    %c0_60 = arith.constant 0 : index
    %c0_61 = arith.constant 0 : index
    %c0_62 = arith.constant 0 : index
    %108 = vector.load %arg13[%c0_60, %c0_61, %c0_62] : memref<1x256x8xf32, #tpu.memory_space<vmem>>, vector<1x256x8xf32>
    %109 = vector.shape_cast %108 : vector<1x256x8xf32> to vector<256x8xf32>
    %110 = vector.shape_cast %107 : vector<256x8xf32> to vector<1x256x8xf32>
    tpu.vector_store %arg13[%c0_60, %c0_61, %c0_62], %110 {strides = array<i32>} : memref<1x256x8xf32, #tpu.memory_space<vmem>>, vector<1x256x8xf32>,
    return
  }
  func.func @transform_0(%arg0: i32) -> (i32, i32, i32) {
    %c0_i32 = arith.constant 0 : i32
    %c0_i32_0 = arith.constant 0 : i32
    %c0_i32_1 = arith.constant 0 : i32
    return %arg0, %c0_i32, %c0_i32_0 : i32, i32, i32
  }
  func.func @transform_1(%arg0: i32) -> (i32, i32, i32) {
    %c0_i32 = arith.constant 0 : i32
    %c0_i32_0 = arith.constant 0 : i32
    %c0_i32_1 = arith.constant 0 : i32
    %c0_i32_2 = arith.constant 0 : i32
    return %c0_i32, %c0_i32_0, %c0_i32_1 : i32, i32, i32
  }
  func.func @transform_2(%arg0: i32) -> (i32, i32) {
    %c0_i32 = arith.constant 0 : i32
    %c0_i32_0 = arith.constant 0 : i32
    %c0_i32_1 = arith.constant 0 : i32
    return %c0_i32, %c0_i32_0 : i32, i32
  }
  func.func @transform_3(%arg0: i32) -> (i32, i32) {
    %c0_i32 = arith.constant 0 : i32
    %c0_i32_0 = arith.constant 0 : i32
    %c0_i32_1 = arith.constant 0 : i32
    return %c0_i32, %c0_i32_0 : i32, i32
  }
  func.func @transform_4(%arg0: i32) -> (i32, i32) {
    %c0_i32 = arith.constant 0 : i32
    %c0_i32_0 = arith.constant 0 : i32
    %c0_i32_1 = arith.constant 0 : i32
    return %c0_i32, %c0_i32_0 : i32, i32
  }
  func.func @transform_5(%arg0: i32) -> (i32, i32) {
    %c0_i32 = arith.constant 0 : i32
    %c0_i32_0 = arith.constant 0 : i32
    %c0_i32_1 = arith.constant 0 : i32
    return %c0_i32, %c0_i32_0 : i32, i32
  }
  func.func @transform_6(%arg0: i32) -> (i32, i32) {
    %c0_i32 = arith.constant 0 : i32
    %c0_i32_0 = arith.constant 0 : i32
    %c0_i32_1 = arith.constant 0 : i32
    return %c0_i32, %c0_i32_0 : i32, i32
  }
  func.func @transform_7(%arg0: i32) -> (i32, i32) {
    %c0_i32 = arith.constant 0 : i32
    %c0_i32_0 = arith.constant 0 : i32
    %c0_i32_1 = arith.constant 0 : i32
    return %c0_i32, %c0_i32_0 : i32, i32
  }
  func.func @transform_8(%arg0: i32) -> (i32, i32) {
    %c0_i32 = arith.constant 0 : i32
    %c0_i32_0 = arith.constant 0 : i32
    %c0_i32_1 = arith.constant 0 : i32
    return %c0_i32, %c0_i32_0 : i32, i32
  }
  func.func @transform_9(%arg0: i32) -> (i32, i32) {
    %c0_i32 = arith.constant 0 : i32
    %c0_i32_0 = arith.constant 0 : i32
    %c0_i32_1 = arith.constant 0 : i32
    return %c0_i32, %c0_i32_0 : i32, i32
  }
  func.func @transform_10(%arg0: i32) -> (i32, i32) {
    %c0_i32 = arith.constant 0 : i32
    %c0_i32_0 = arith.constant 0 : i32
    %c0_i32_1 = arith.constant 0 : i32
    return %c0_i32, %c0_i32_0 : i32, i32
  }
  func.func @transform_11(%arg0: i32) -> (i32, i32) {
    %c0_i32 = arith.constant 0 : i32
    %c0_i32_0 = arith.constant 0 : i32
    %c0_i32_1 = arith.constant 0 : i32
    return %c0_i32, %c0_i32_0 : i32, i32
  }
  func.func @transform_12(%arg0: i32) -> (i32, i32, i32) {
    %c0_i32 = arith.constant 0 : i32
    %c0_i32_0 = arith.constant 0 : i32
    %c0_i32_1 = arith.constant 0 : i32
    return %arg0, %c0_i32, %c0_i32_0 : i32, i32, i32
  }
}

</mosaic_0001>

<bundles_post_ra>
// kernel: mbconv_forward.1
= control target key start
LH: loop header
LB: loop body
LE: loop exit
PB: predicated region body
PF: predicated region fallthrough
CT: control target
= control target key end

     0   :  { %s6528_s0 = inlined_call_operand.hbm [shape: bf16[2,256,8], index: 0, kind: input, shape index: {}]   ;;  %s6529_s1 = inlined_call_operand.hbm [shape: f32[3,256,1], index: 1, kind: input, shape index: {}]   ;;  %s6530_s2 = inlined_call_operand.hbm [shape: bf16[8,32], index: 2, kind: input, shape index: {}]   ;;  %s6531_s3 = inlined_call_operand.hbm [shape: f32[1,32], index: 3, kind: input, shape index: {}]   ;;  %s6532_s4 = inlined_call_operand.hbm [shape: f32[9,32], index: 4, kind: input, shape index: {}]   ;;  %s6533_s5 = inlined_call_operand.hbm [shape: f32[1,32], index: 5, kind: input, shape index: {}]   ;;  %s6534_s6 = inlined_call_operand.hbm [shape: f32[32,128], index: 6, kind: input, shape index: {}]   ;;  %s6535_s7 = inlined_call_operand.hbm [shape: f32[1,128], index: 7, kind: input, shape index: {}]   ;;  %s6536_s8 = inlined_call_operand.hbm [shape: f32[128,32], index: 8, kind: input, shape index: {}]   ;;  %s6537_s9 = inlined_call_operand.hbm [shape: f32[1,32], index: 9, kind: input, shape index: {}]   ;;  %s6538_s10 = inlined_call_operand.hbm [shape: bf16[32,8], index: 10, kind: input, shape index: {}]   ;;  %s6539_s11 = inlined_call_operand.hbm [shape: f32[1,8], index: 11, kind: input, shape index: {}]   ;;  %s6540_s12 = inlined_call_operand.hbm [shape: f32[2,256,8], index: 12, kind: output, shape index: {}]  }
   0x1   :  { %6578 = sst [smem:[#allocation79_spill]] %s6528_s0 }
   0x2   :  { %6579 = sst [smem:[#allocation80_spill]] %s6529_s1 }
   0x3   :  { %6580 = sst [smem:[#allocation81_spill]] %s6530_s2 }
   0x4   :  { %6581 = sst [smem:[#allocation82_spill]] %s6540_s12 }
   0x5   :  { %17 = vsyncpa [#allocation4], 0 }
   0x6   :  { %19 = vsyncpa [#allocation4 + $0x1], 0 }
   0x7   :  { %20 = vsyncpa [#allocation7], 0 }
   0x8   :  { %21 = vsyncpa [#allocation10], 0 }
   0x9   :  { %22 = vsyncpa [#allocation13], 0 }
   0xa   :  { %23 = vsyncpa [#allocation16], 0 }
   0xb   :  { %24 = vsyncpa [#allocation19], 0 }
   0xc   :  { %25 = vsyncpa [#allocation22], 0 }
   0xd   :  { %26 = vsyncpa [#allocation5], 0 }
   0xe   :  { %28 = vsyncpa [#allocation5 + $0x1], 0  ;;  %s4263_s21 = smov 0   ;;  %s4265_s22 = smov 0  }
   0xf   :  { %s4267_s23 = smov 0   ;;  %s4269_s24 = smov 0  }
  0x10 LB: > { %s4174_s25 = smov [#allocation6]   ;;  %s4284_s27 = sadd.s32 4294967295, %s4172_s24   ;;  %s4172_s24 = sphi %s4269_s24, %s6781_s24   ;;  %s4168_s23 = sphi %s4267_s23, %s6780_s23   ;;  %s4164_s22 = sphi %s4265_s22, %s6779_s22   ;;  %s4160_s21 = sphi %s4263_s21, %s6778_s21  }
  0x11   : > { %s334_s26 = sshll.u32 %s4174_s25, 4  ;;  %6582 = sst [smem:[#allocation32_spill]] %s4284_s27  ;;  %s4290_s26 = int_to_ptr.vmem [resolvable:$true] %s334_s26 }
  0x12   : > { %p3170_p0 = scmp.ge.s32.totalorder %s4172_s24, 1  ;;  %p6549_p1 = scmp.eq.s32.totalorder %s4284_s27, 0 }
  0x13   : > { %p322_p2 = scmp.lt.s32.totalorder %s4172_s24, 3  ;;  %s4175_s29 = smov [#allocation9]  }
  0x14   : > { %s359_s30 = sshll.u32 %s4175_s29, 4  ;;  %s4176_s14 = smov [#allocation12]   ;;  %s4305_s30 = int_to_ptr.vmem [resolvable:$true] %s359_s30 }
  0x15   : > { %p4292_p4 = pnand %p3170_p0, %p322_p2  ;;  %s383_s15 = sshll.u32 %s4176_s14, 4  ;;  %s4307_s15 = int_to_ptr.vmem [resolvable:$true] %s383_s15 }
  0x16   : > { %s6586_s1 = sld [smem:[#allocation80_spill]] }
  0x17   : > { %s6583_s28 = scalar_select %p4292_p4, 1, 0 }
  0x18   : > { %p3595_p6 = pneg %p4292_p4 }
  0x19   : > { %6584 = sst [smem:[#allocation33_spill]] %s6583_s28 }
  0x1a   : > { %p4301_p7 = pnand %p3595_p6, %p6549_p1 }
  0x1c   : > { %s3744_s18 = scalar_lea.hbm %s6586_s1, 12288  ;;  %p4317_p9 = pneg %p4301_p7 }
  0x1d   : > { %p3745_p8 = scmp.ne.s32.totalorder %s6586_s1, %s3744_s18  ;;  %p3751_p12 = scmp.lt.u32.totalorder %s3744_s18, %s6586_s1 }
  0x1f   : > { %p3747_p10 = pnand %p4317_p9, %p3745_p8 }
  0x21   : > { %p3748_p11 = pneg %p3747_p10 }
  0x23   : > { %p3753_p13 = pnand %p3751_p12, %p3748_p11 }
  0x25   : > { %3756 = shalt.err (!%p3753_p13)
}
  0x26   : > { %s3757_s16 = scalar_lea.vmem %s4290_s26, 12288  ;;  %p3765_p5 = scmp.lt.s32.totalorder %s4290_s26, %s4290_s26 }
  0x27   : > { %p3758_p0 = scmp.ne.s32.totalorder %s4290_s26, %s3757_s16  ;;  %p3766_p3 = scmp.lt.s32.totalorder %s3757_s16, %s3757_s16 }
  0x29   : > { %p3760_p2 = pnand %p3758_p0, %p4317_p9  ;;  %p3767_p8 = por %p3766_p3, %p3765_p5 }
  0x2b   : > { %p3761_p6 = pneg %p3760_p2 }
  0x2d   : > { %p3768_p10 = pnand %p3767_p8, %p3761_p6 }
  0x2f   : > { %3771 = shalt.err (!%p3768_p10)
}
  0x30   : > { %s6547_s17 = smov 128   ;;  %s4178_s18 = smov 8  }
  0x31   : > { %3598 = dma.hbm_to_vmem [thread:$0]  (!%p4301_p7), %s6586_s1, 12288, %s4290_s26, [#allocation7], %s6547_s17, %s6547_s17, %s4178_s18  }
  0x32   : > { %s3772_s16 = scalar_lea.hbm %s6531_s3, 16 }
  0x33   : > { %p3773_p3 = scmp.ne.s32.totalorder %s6531_s3, %s3772_s16  ;;  %p3779_p12 = scmp.lt.u32.totalorder %s3772_s16, %s6531_s3 }
  0x35   : > { %p3775_p5 = pnand %p3773_p3, %p4317_p9 }
  0x37   : > { %p3776_p11 = pneg %p3775_p5 }
  0x39   : > { %p3781_p13 = pnand %p3779_p12, %p3776_p11 }
  0x3b   : > { %3784 = shalt.err (!%p3781_p13)
}
  0x3c   : > { %s3785_s26 = scalar_lea.vmem %s4305_s30, 16  ;;  %s3792_s12 = scalar_lea.vmem %s4305_s30, 32 }
  0x3d   : > { %p3786_p0 = scmp.ne.s32.totalorder %s4305_s30, %s3785_s26  ;;  %p3793_p8 = scmp.lt.s32.totalorder %s4305_s30, %s4305_s30 }
  0x3e   : > { %p3794_p10 = scmp.lt.s32.totalorder %s3792_s12, %s3785_s26 }
  0x3f   : > { %p3788_p2 = pnand %p3786_p0, %p4317_p9 }
  0x40   : > { %p3795_p3 = por %p3794_p10, %p3793_p8 }
  0x41   : > { %p3789_p6 = pneg %p3788_p2 }
  0x43   : > { %p3796_p5 = pnand %p3795_p3, %p3789_p6 }
  0x45   : > { %3799 = shalt.err (!%p3796_p5)
}
  0x46   : > { %3604 = dma.hbm_to_vmem [thread:$0]  (!%p4301_p7), %s6531_s3, 16, %s4305_s30, [#allocation10]  }
  0x47   : > { %s3800_s20 = scalar_lea.hbm %s6533_s5, 16 }
  0x48   : > { %p3801_p11 = scmp.ne.s32.totalorder %s6533_s5, %s3800_s20  ;;  %p3807_p0 = scmp.lt.u32.totalorder %s3800_s20, %s6533_s5 }
  0x4a   : > { %p3803_p12 = pnand %p3801_p11, %p4317_p9 }
  0x4c   : > { %p3804_p13 = pneg %p3803_p12 }
  0x4e   : > { %p3809_p2 = pnand %p3807_p0, %p3804_p13 }
  0x50   : > { %3812 = shalt.err (!%p3809_p2)
}
  0x51   : > { %s3813_s30 = scalar_lea.vmem %s4307_s15, 16  ;;  %s3820_s12 = scalar_lea.vmem %s4307_s15, 32 }
  0x52   : > { %p3814_p6 = scmp.ne.s32.totalorder %s4307_s15, %s3813_s30  ;;  %p3821_p3 = scmp.lt.s32.totalorder %s4307_s15, %s4307_s15 }
  0x53   : > { %p3822_p5 = scmp.lt.s32.totalorder %s3820_s12, %s3813_s30 }
  0x54   : > { %p3816_p8 = pnand %p3814_p6, %p4317_p9 }
  0x55   : > { %p3823_p11 = por %p3822_p5, %p3821_p3 }
  0x56   : > { %p3817_p10 = pneg %p3816_p8 }
  0x58   : > { %p3824_p12 = pnand %p3823_p11, %p3817_p10 }
  0x5a   : > { %3827 = shalt.err (!%p3824_p12)
}
  0x5b   : > { %3610 = dma.hbm_to_vmem [thread:$0]  (!%p4301_p7), %s6533_s5, 16, %s4307_s15, [#allocation13]  }
  0x5c   : > { %s4179_s28 = smov [#allocation15]   ;;  %s4180_s20 = smov [#allocation18]  }
  0x5d   : > { %s407_s19 = sshll.u32 %s4179_s28, 4  ;;  %s431_s29 = sshll.u32 %s4180_s20, 4  ;;  %s408_s19 = int_to_ptr.vmem [resolvable:$true] %s407_s19  ;;  %s432_s29 = int_to_ptr.vmem [resolvable:$true] %s431_s29 }
  0x5e   : > { %s3828_s26 = scalar_lea.hbm %s6535_s7, 16 }
  0x5f   : > { %p3829_p13 = scmp.ne.s32.totalorder %s6535_s7, %s3828_s26  ;;  %p3835_p6 = scmp.lt.u32.totalorder %s3828_s26, %s6535_s7 }
  0x61   : > { %p3831_p0 = pnand %p3829_p13, %p4317_p9 }
  0x63   : > { %p3832_p2 = pneg %p3831_p0 }
  0x65   : > { %p3837_p8 = pnand %p3835_p6, %p3832_p2 }
  0x67   : > { %3840 = shalt.err (!%p3837_p8)
}
  0x68   : > { %s3841_s15 = scalar_lea.vmem %s408_s19, 16  ;;  %s3848_s27 = scalar_lea.vmem %s408_s19, 32 }
  0x69   : > { %p3842_p10 = scmp.ne.s32.totalorder %s408_s19, %s3841_s15  ;;  %p3849_p11 = scmp.lt.s32.totalorder %s408_s19, %s408_s19 }
  0x6a   : > { %p3850_p12 = scmp.lt.s32.totalorder %s3848_s27, %s3841_s15 }
  0x6b   : > { %p3844_p3 = pnand %p3842_p10, %p4317_p9 }
  0x6c   : > { %p3851_p1 = por %p3850_p12, %p3849_p11 }
  0x6d   : > { %p3845_p5 = pneg %p3844_p3 }
  0x6f   : > { %p3852_p4 = pnand %p3851_p1, %p3845_p5 }
  0x71   : > { %3855 = shalt.err (!%p3852_p4)
}
  0x72   : > { %3616 = dma.hbm_to_vmem [thread:$0]  (!%p4301_p7), %s6535_s7, 16, %s408_s19, [#allocation16]  }
  0x73   : > { %s3856_s16 = scalar_lea.hbm %s6537_s9, 16 }
  0x74   : > { %p3857_p13 = scmp.ne.s32.totalorder %s6537_s9, %s3856_s16  ;;  %p3863_p4 = scmp.lt.u32.totalorder %s3856_s16, %s6537_s9 }
  0x76   : > { %p3859_p0 = pnand %p3857_p13, %p4317_p9 }
  0x78   : > { %p3860_p1 = pneg %p3859_p0 }
  0x7a   : > { %p3865_p2 = pnand %p3863_p4, %p3860_p1 }
  0x7c   : > { %3868 = shalt.err (!%p3865_p2)
}
  0x7d   : > { %s3869_s15 = scalar_lea.vmem %s432_s29, 16  ;;  %s3876_s19 = scalar_lea.vmem %s432_s29, 32 }
  0x7e   : > { %p3870_p6 = scmp.ne.s32.totalorder %s432_s29, %s3869_s15  ;;  %p3877_p3 = scmp.lt.s32.totalorder %s432_s29, %s432_s29 }
  0x7f   : > { %p3878_p5 = scmp.lt.s32.totalorder %s3876_s19, %s3869_s15 }
  0x80   : > { %p3872_p8 = pnand %p3870_p6, %p4317_p9 }
  0x81   : > { %p3879_p11 = por %p3878_p5, %p3877_p3 }
  0x82   : > { %p3873_p10 = pneg %p3872_p8 }
  0x84   : > { %p3880_p12 = pnand %p3879_p11, %p3873_p10 }
  0x86   : > { %3883 = shalt.err (!%p3880_p12)
}
  0x87   : > { %3622 = dma.hbm_to_vmem [thread:$0]  (!%p4301_p7), %s6537_s9, 16, %s432_s29, [#allocation19]  }
  0x88   : > { %s4181_s20 = smov [#allocation8]   ;;  %s4182_s14 = smov [#allocation11]  }
  0x89   : > { %s348_s17 = sshll.u32 %s4181_s20, 4  ;;  %s369_s16 = sshll.u32 %s4182_s14, 4  ;;  %s349_s17 = int_to_ptr.vmem [resolvable:$true] %s348_s17  ;;  %s370_s16 = int_to_ptr.vmem [resolvable:$true] %s369_s16 }
  0x8a   : > { %s6588_s2 = sld [smem:[#allocation81_spill]] }
  0x90   : > { %s3884_s12 = scalar_lea.hbm %s6588_s2, 64 }
  0x91   : > { %p3885_p13 = scmp.ne.s32.totalorder %s6588_s2, %s3884_s12  ;;  %p3891_p4 = scmp.lt.u32.totalorder %s3884_s12, %s6588_s2 }
  0x93   : > { %p3887_p0 = pnand %p3885_p13, %p4317_p9 }
  0x95   : > { %p3888_p1 = pneg %p3887_p0 }
  0x97   : > { %p3893_p2 = pnand %p3891_p4, %p3888_p1 }
  0x99   : > { %3896 = shalt.err (!%p3893_p2)
}
  0x9a   : > { %s3897_s29 = scalar_lea.vmem %s349_s17, 64  ;;  %p3905_p3 = scmp.lt.s32.totalorder %s349_s17, %s349_s17 }
  0x9b   : > { %p3898_p6 = scmp.ne.s32.totalorder %s349_s17, %s3897_s29  ;;  %p3906_p5 = scmp.lt.s32.totalorder %s3897_s29, %s3897_s29 }
  0x9d   : > { %p3900_p8 = pnand %p3898_p6, %p4317_p9  ;;  %p3907_p11 = por %p3906_p5, %p3905_p3 }
  0x9f   : > { %p3901_p10 = pneg %p3900_p8 }
  0xa1   : > { %p3908_p12 = pnand %p3907_p11, %p3901_p10 }
  0xa3   : > { %3911 = shalt.err (!%p3908_p12)
}
  0xa4   : > { %3601 = dma.hbm_to_vmem [thread:$0]  (!%p4301_p7), %s6588_s2, 64, %s349_s17, [#allocation7]  }
  0xa5   : > { %s3912_s30 = scalar_lea.hbm %s6532_s4, 256 }
  0xa6   : > { %p3913_p13 = scmp.ne.s32.totalorder %s6532_s4, %s3912_s30  ;;  %p3919_p4 = scmp.lt.u32.totalorder %s3912_s30, %s6532_s4 }
  0xa8   : > { %p3915_p0 = pnand %p3913_p13, %p4317_p9 }
  0xaa   : > { %p3916_p1 = pneg %p3915_p0 }
  0xac   : > { %p3921_p2 = pnand %p3919_p4, %p3916_p1 }
  0xae   : > { %3924 = shalt.err (!%p3921_p2)
}
  0xaf   : > { %s3925_s27 = scalar_lea.vmem %s370_s16, 256  ;;  %p3933_p3 = scmp.lt.s32.totalorder %s370_s16, %s370_s16 }
  0xb0   : > { %p3926_p6 = scmp.ne.s32.totalorder %s370_s16, %s3925_s27  ;;  %p3934_p5 = scmp.lt.s32.totalorder %s3925_s27, %s3925_s27 }
  0xb2   : > { %p3928_p8 = pnand %p3926_p6, %p4317_p9  ;;  %p3935_p11 = por %p3934_p5, %p3933_p3 }
  0xb4   : > { %p3929_p10 = pneg %p3928_p8 }
  0xb6   : > { %p3936_p12 = pnand %p3935_p11, %p3929_p10 }
  0xb8   : > { %3939 = shalt.err (!%p3936_p12)
}
  0xb9   : > { %s6589_s17 = smov 128   ;;  %s4183_s20 = smov [#allocation14]  }
  0xba   : > { %3607 = dma.hbm_to_vmem [thread:$0]  (!%p4301_p7), %s6532_s4, 256, %s370_s16, [#allocation10], %s6589_s17, %s6589_s17, %s4178_s18  }
  0xbb   : > { %s393_s14 = sshll.u32 %s4183_s20, 4  ;;  %s4184_s26 = smov [#allocation17]   ;;  %s394_s14 = int_to_ptr.vmem [resolvable:$true] %s393_s14 }
  0xbc   : > { %s417_s30 = sshll.u32 %s4184_s26, 4  ;;  %s3940_s15 = scalar_lea.hbm %s6534_s6, 512  ;;  %s418_s30 = int_to_ptr.vmem [resolvable:$true] %s417_s30 }
  0xbd   : > { %p3941_p13 = scmp.ne.s32.totalorder %s6534_s6, %s3940_s15  ;;  %p3947_p4 = scmp.lt.u32.totalorder %s3940_s15, %s6534_s6 }
  0xbf   : > { %p3943_p0 = pnand %p3941_p13, %p4317_p9 }
  0xc1   : > { %p3944_p1 = pneg %p3943_p0 }
  0xc3   : > { %p3949_p2 = pnand %p3947_p4, %p3944_p1 }
  0xc5   : > { %3952 = shalt.err (!%p3949_p2)
}
  0xc6   : > { %s3953_s16 = scalar_lea.vmem %s394_s14, 512  ;;  %p3961_p3 = scmp.lt.s32.totalorder %s394_s14, %s394_s14 }
  0xc7   : > { %p3954_p6 = scmp.ne.s32.totalorder %s394_s14, %s3953_s16  ;;  %p3962_p5 = scmp.lt.s32.totalorder %s3953_s16, %s3953_s16 }
  0xc9   : > { %p3956_p8 = pnand %p3954_p6, %p4317_p9  ;;  %p3963_p11 = por %p3962_p5, %p3961_p3 }
  0xcb   : > { %p3957_p10 = pneg %p3956_p8 }
  0xcd   : > { %p3964_p12 = pnand %p3963_p11, %p3957_p10 }
  0xcf   : > { %3967 = shalt.err (!%p3964_p12)
}
  0xd0   : > { %3613 = dma.hbm_to_vmem [thread:$0]  (!%p4301_p7), %s6534_s6, 512, %s394_s14, [#allocation13], %s6589_s17, %s6589_s17, %s4178_s18  }
  0xd1   : > { %s3968_s12 = scalar_lea.hbm %s6536_s8, 2048 }
  0xd2   : > { %p3969_p13 = scmp.ne.s32.totalorder %s6536_s8, %s3968_s12  ;;  %p3975_p4 = scmp.lt.u32.totalorder %s3968_s12, %s6536_s8 }
  0xd4   : > { %p3971_p0 = pnand %p3969_p13, %p4317_p9 }
  0xd6   : > { %p3972_p1 = pneg %p3971_p0 }
  0xd8   : > { %p3977_p2 = pnand %p3975_p4, %p3972_p1 }
  0xda   : > { %3980 = shalt.err (!%p3977_p2)
}
  0xdb   : > { %s3981_s29 = scalar_lea.vmem %s418_s30, 2048  ;;  %p3989_p3 = scmp.lt.s32.totalorder %s418_s30, %s418_s30 }
  0xdc   : > { %p3982_p6 = scmp.ne.s32.totalorder %s418_s30, %s3981_s29  ;;  %p3990_p5 = scmp.lt.s32.totalorder %s3981_s29, %s3981_s29 }
  0xde   : > { %p3984_p8 = pnand %p3982_p6, %p4317_p9  ;;  %p3991_p11 = por %p3990_p5, %p3989_p3 }
  0xe0   : > { %p3985_p10 = pneg %p3984_p8 }
  0xe2   : > { %p3992_p12 = pnand %p3991_p11, %p3985_p10 }
  0xe4   : > { %3995 = shalt.err (!%p3992_p12)
}
  0xe5   : > { %3619 = dma.hbm_to_vmem [thread:$0]  (!%p4301_p7), %s6536_s8, 2048, %s418_s30, [#allocation16], %s6589_s17, %s6589_s17, %s4178_s18  }
  0xe6   : > { %s4185_s1 = smov [#allocation20]   ;;  %s3996_s12 = scalar_lea.hbm %s6538_s10, 256 }
  0xe7   : > { %s441_s28 = sshll.u32 %s4185_s1, 4  ;;  %p3997_p13 = scmp.ne.s32.totalorder %s6538_s10, %s3996_s12  ;;  %s442_s28 = int_to_ptr.vmem [resolvable:$true] %s441_s28 }
  0xe8   : > { %p4003_p4 = scmp.lt.u32.totalorder %s3996_s12, %s6538_s10 }
  0xe9   : > { %p3999_p0 = pnand %p3997_p13, %p4317_p9 }
  0xeb   : > { %p4000_p1 = pneg %p3999_p0 }
  0xed   : > { %p4005_p2 = pnand %p4003_p4, %p4000_p1 }
  0xef   : > { %4008 = shalt.err (!%p4005_p2)
}
  0xf0   : > { %s4009_s18 = scalar_lea.vmem %s442_s28, 256  ;;  %p4017_p3 = scmp.lt.s32.totalorder %s442_s28, %s442_s28 }
  0xf1   : > { %p4010_p6 = scmp.ne.s32.totalorder %s442_s28, %s4009_s18  ;;  %p4018_p5 = scmp.lt.s32.totalorder %s4009_s18, %s4009_s18 }
  0xf3   : > { %p4012_p8 = pnand %p4010_p6, %p4317_p9  ;;  %p4019_p11 = por %p4018_p5, %p4017_p3 }
  0xf5   : > { %p4013_p10 = pneg %p4012_p8 }
  0xf7   : > { %p4020_p12 = pnand %p4019_p11, %p4013_p10 }
  0xf9   : > { %4023 = shalt.err (!%p4020_p12)
}
  0xfa   : > { %s6551_s17 = smov 64   ;;  %s6552_s30 = smov 4  }
  0xfb   : > { %3625 = dma.hbm_to_vmem [thread:$0]  (!%p4301_p7), %s6538_s10, 256, %s442_s28, [#allocation19], %s6551_s17, %s6551_s17, %s6552_s30  }
  0xfc   : > { %s4188_s16 = smov [#allocation21]   ;;  %s4024_s12 = scalar_lea.hbm %s6539_s11, 16 }
  0xfd   : > { %s455_s1 = sshll.u32 %s4188_s16, 4  ;;  %p4025_p13 = scmp.ne.s32.totalorder %s6539_s11, %s4024_s12  ;;  %s456_s1 = int_to_ptr.vmem [resolvable:$true] %s455_s1 }
  0xfe   : > { %p4031_p4 = scmp.lt.u32.totalorder %s4024_s12, %s6539_s11 }
  0xff   : > { %p4027_p0 = pnand %p4025_p13, %p4317_p9 }
 0x101   : > { %p4028_p1 = pneg %p4027_p0 }
 0x103   : > { %p4033_p2 = pnand %p4031_p4, %p4028_p1 }
 0x105   : > { %4036 = shalt.err (!%p4033_p2)
}
 0x106   : > { %s4037_s28 = scalar_lea.vmem %s456_s1, 16  ;;  %s4044_s18 = scalar_lea.vmem %s456_s1, 32 }
 0x107   : > { %p4038_p6 = scmp.ne.s32.totalorder %s456_s1, %s4037_s28  ;;  %p4045_p3 = scmp.lt.s32.totalorder %s456_s1, %s456_s1 }
 0x108   : > { %p4046_p5 = scmp.lt.s32.totalorder %s4044_s18, %s4037_s28 }
 0x109   : > { %p4040_p8 = pnand %p4038_p6, %p4317_p9 }
 0x10a   : > { %p4047_p11 = por %p4046_p5, %p4045_p3 }
 0x10b   : > { %p4041_p10 = pneg %p4040_p8 }
 0x10d   : > { %p4048_p12 = pnand %p4047_p11, %p4041_p10 }
 0x10f   : > { %4051 = shalt.err (!%p4048_p12)
}
 0x110   : > { %s6590_s25 = sld [smem:[#allocation32_spill]]  ;;  %s3169_s16 = sadd.s32 4294967294, %s4172_s24  }
 0x111   : > { %3628 = dma.hbm_to_vmem [thread:$0]  (!%p4301_p7), %s6539_s11, 16, %s456_s1, [#allocation22]  }
 0x112   : > { %s4547_s13 = sadd.s32 1, %s4172_s24   ;;  %s41_s20 = sadd.s32 1, %s4168_s23 }
 0x113   : > { %s38_s26 = ssub.s32 %s4172_s24, %s4547_s13  ;;  %p48_p9 = scmp.ne.s32.totalorder %s4168_s23, %s4164_s22 }
 0x114   : > { %p39_p13 = scmp.eq.s32.totalorder %s38_s26, 0  ;;  %p49_p0 = scmp.eq.s32.totalorder %s4172_s24, 0 }
 0x115   : > { %p54_p1 = scmp.ne.s32.totalorder %s4164_s22, %s4160_s21  ;;  %p315_p10 = scmp.eq.s32.totalorder %s3169_s16, 1 }
 0x116   : > { %p309_p4 = scmp.eq.s32.totalorder %s6590_s25, 1  ;;  %p50_p2 = por %p49_p0, %p48_p9 }
 0x117   : > { %s4559_s12 = scalar_select %p39_p13, %s4168_s23, %s41_s20  }
 0x118   : > { %p6591_p6 = scmp.eq.s32.totalorder %s6590_s25, 0  ;;  %p4567_p7 = por %p309_p4, %p48_p9 }
 0x119   : > { %p3648_p3 = scmp.lt.s32.totalorder %s4172_s24, 2  ;;  %s466_s15 = sand.u32 1, %s4168_s23  }
 0x11a   : > { %p4563_p8 = por %p6591_p6, %p54_p1  ;;  %p4573_p5 = por %p315_p10, %p54_p1 }
 0x11b   : > { %s6593_s1 = scalar_select %p4567_p7, 1, 0 }
 0x11c   : > { %s6594_s19 = scalar_select %p4573_p5, 1, 0 }
 0x11d   : > { %s3183_s27 = sshll.u32 %s466_s15, 7  ;;  %s3262_s28 = sshll.u32 %s4172_s24, 11 }
 0x11e   : > { %s6595_s14 = sld [smem:[#allocation79_spill]]  ;;  %s470_s20 = scalar_lea.vmem [#allocation3], %s3183_s27 }
 0x11f   : > { %s477_s26 = sshll.u32 %s470_s20, 4  ;;  %p4583_p11 = pnand %p3648_p3, %p50_p2  ;;  %s4587_s26 = int_to_ptr.vmem [resolvable:$true] %s477_s26 }
 0x120   : > { %s4589_s17 = scalar_lea.sflag [#allocation4], %s466_s15 }
 0x121   : > { %p4054_p9 = pneg %p4583_p11 }
 0x124   : > { %s4581_s25 = scalar_lea.hbm %s6595_s14, %s3262_s28  ;;  %s4057_s18 = scalar_lea.hbm %s6595_s14, 4096 }
 0x125   : > { %s4052_s30 = scalar_lea.hbm %s4581_s25, 2048  ;;  %p4058_p1 = scmp.lt.u32.totalorder %s4581_s25, %s6595_s14 }
 0x126   : > { %p4053_p12 = scmp.ne.s32.totalorder %s4581_s25, %s4052_s30  ;;  %p4059_p4 = scmp.lt.u32.totalorder %s4057_s18, %s4052_s30 }
 0x127   : > { %p4061_p6 = scmp.lt.u32.totalorder %s4052_s30, %s4581_s25 }
 0x128   : > { %p4055_p13 = pnand %p4054_p9, %p4053_p12  ;;  %p4060_p2 = por %p4059_p4, %p4058_p1 }
 0x12a   : > { %p4056_p0 = pneg %p4055_p13  ;;  %p4062_p10 = por %p4061_p6, %p4060_p2 }
 0x12c   : > { %p4063_p3 = pnand %p4062_p10, %p4056_p0 }
 0x12e   : > { %4066 = shalt.err (!%p4063_p3)
}
 0x12f   : > { %s4067_s15 = scalar_lea.vmem %s4587_s26, 2048  ;;  %s4189_s27 = smov [#allocation3]  }
 0x130   : > { %p4068_p12 = scmp.ne.s32.totalorder %s4587_s26, %s4067_s15  ;;  %s4072_s28 = sshll.u32 %s4189_s27, 4  ;;  %s4073_s28 = int_to_ptr.vmem [resolvable:$false] %s4072_s28 }
 0x131   : > { %s4074_s29 = scalar_lea.vmem %s4073_s28, 4096  ;;  %p4075_p7 = scmp.lt.s32.totalorder %s4587_s26, %s4073_s28 }
 0x132   : > { %p4070_p13 = pnand %p4068_p12, %p4054_p9  ;;  %p4076_p1 = scmp.lt.s32.totalorder %s4074_s29, %s4067_s15 }
 0x134   : > { %p4071_p5 = pneg %p4070_p13  ;;  %p4077_p4 = por %p4076_p1, %p4075_p7 }
 0x136   : > { %p4078_p2 = pnand %p4077_p4, %p4071_p5 }
 0x138   : > { %4081 = shalt.err (!%p4078_p2)
}
 0x139   : > { %s6597_s30 = smov 4   ;;  %s6598_s18 = smov 64  }
 0x13a   : > { %3632 = dma.hbm_to_vmem [thread:$0]  (!%p4583_p11), %s4581_s25, 2048, %s4587_s26, %s4589_s17, %s6598_s18, %s6598_s18, %s6597_s30  }
 0x13b   : > { %s6599_s20 = sld [smem:[#allocation33_spill]] }
 0x141   : > { %p6600_p9 = scmp.ne.s32.totalorder %s6599_s20, 0 }
 0x143   : > { %489 = sbr.rel (%p6600_p9) target bundleno = 1678 (0x68e), region = 68 }
 0x14a   : > { %s4623_s27 = sand.u32 1, %s4164_s22  }
 0x14b   : > { %s3187_s15 = sshll.u32 %s4623_s27, 7  ;;  %s492_s28 = scalar_lea.sflag [#allocation4], %s4623_s27 }
 0x14c   : > { %s4627_s29 = scalar_lea.vmem [#allocation3], %s3187_s15 }
 0x14d   : > { %4127 = dma.done.wait (%p4563_p8), %s492_s28, 2048  }
 0x14e   : > { %4129 = vsyncadd (%p4563_p8), %s492_s28, 4294965248  ;;  %s6601_s16 = sld [smem:[#allocation32_spill]] }
 0x154   : > { %p6602_p7 = scmp.eq.s32.totalorder %s6601_s16, 0 }
 0x156   : > { %4131 = dma.done.wait (%p6602_p7), [#allocation7], 12352   ;;  %p6603_p5 = pmov %p6602_p7 }
 0x158   : > { %4133 = vsyncadd (%p6603_p5), [#allocation7], 4294954944  ;;  %p6604_p11 = pmov %p6603_p5 }
 0x159   : > { %p6605_p0 = pmov %p6603_p5 }
 0x15a   : > { %4135 = dma.done.wait (%p6604_p11), [#allocation10], 272  }
 0x15b   : > { %4137 = vsyncadd (%p6605_p0), [#allocation10], 4294967024  ;;  %p6606_p6 = pmov %p6605_p0 }
 0x15c   : > { %p6607_p10 = pmov %p6605_p0 }
 0x15d   : > { %4139 = dma.done.wait (%p6606_p6), [#allocation13], 528  }
 0x15e   : > { %4141 = vsyncadd (%p6607_p10), [#allocation13], 4294966768  ;;  %p6608_p8 = pmov %p6605_p0 }
 0x15f   : > { %p6609_p3 = pmov %p6605_p0 }
 0x160   : > { %4143 = dma.done.wait (%p6608_p8), [#allocation16], 2064  }
 0x161   : > { %4145 = vsyncadd (%p6609_p3), [#allocation16], 4294965232  ;;  %p6610_p12 = pmov %p6605_p0 }
 0x162   : > { %p6611_p13 = pmov %p6605_p0 }
 0x163   : > { %4147 = dma.done.wait (%p6610_p12), [#allocation19], 272  }
 0x164   : > { %4149 = vsyncadd (%p6611_p13), [#allocation19], 4294967024  ;;  %p6612_p1 = pmov %p6605_p0 }
 0x165   : > { %p6613_p4 = pmov %p6605_p0 }
 0x166   : > { %4151 = dma.done.wait (%p6612_p1), [#allocation22], 16  }
 0x167   : > { %4153 = vsyncadd (%p6613_p4), [#allocation22], 4294967280  ;;  %s3199_s17 = sshll.u32 %s4623_s27, 8  ;;  %vm750_vm0 = vcmask 1043456   ;;  %vm701_vm1 = vcmask 64512   ;;  %v3715_v2 = vld [vmem:[%s4627_s29] sm:$0xff]  }
 0x168   : > { %v613_v0 = vld [vmem:[#allocation8] sm:$0xf]  ;;  %v3716_v3 = vld [vmem:[%s4627_s29 + $0x8] sm:$0xff]   ;;  %3402 = vmatprep.mubr.msk.bf16.mxu0 %vm701_vm1, %v3715_v2  ;;  %v3717_v4 = vld [vmem:[%s4627_s29 + $0x10] sm:$0xff]   ;;  %s4776_s0 = scalar_lea.vmem [#allocation23], %s3199_s17  ;;  %p6614_p2 = scmp.ne.s32.totalorder %s6601_s16, 0 }
 0x169   : > { %3546 = vmatprep.subr.msk.bf16.mxu0 %vm750_vm0, %v613_v0  ;;  %v752_v1 = vsel %vm750_vm0, %v613_v0, 0  ;;  %v3718_v5 = vld [vmem:[%s4627_s29 + $0x18] sm:$0xff]   ;;  %v3719_v6 = vld [vmem:[%s4627_s29 + $0x20] sm:$0xff]   ;;  %v3720_v7 = vld [vmem:[%s4627_s29 + $0x28] sm:$0xff]   ;;  %vm983_vm2 = vcmask (!%p6614_p2), 261120  }
 0x16a   : > { %3401 = vmatpush3.bf16.msra.mxu0 %v752_v1  ;;  %v3721_v8 = vld [vmem:[%s4627_s29 + $0x30] sm:$0xff]   ;;  %v3722_v9 = vld [vmem:[%s4627_s29 + $0x38] sm:$0xff]   ;;  %v3723_v10 = vld [vmem:[%s4627_s29 + $0x40] sm:$0xff]  }
 0x16b   : > { %v3724_v11 = vld [vmem:[%s4627_s29 + $0x48] sm:$0xff]   ;;  %v3725_v12 = vld [vmem:[%s4627_s29 + $0x50] sm:$0xff]   ;;  %v3726_v13 = vld [vmem:[%s4627_s29 + $0x58] sm:$0xff]  }
 0x16c   : > { %v3727_v14 = vld [vmem:[%s4627_s29 + $0x60] sm:$0xff]   ;;  %v3728_v15 = vld [vmem:[%s4627_s29 + $0x68] sm:$0xff]   ;;  %v3729_v16 = vld [vmem:[%s4627_s29 + $0x70] sm:$0xff]  }
 0x16d   : > { %3403 = vmatmul.mubr.msk.bf16.vlgmr.msra.gmra.mrb[0].mxu0 %vm701_vm1, %v3716_v3  ;;  %v3730_v17 = vld [vmem:[%s4627_s29 + $0x78] sm:$0xff]   ;;  %v4690_v18 = vld [vmem:[#allocation9] ss:$0 sm:$0xff] }
 0x16e   : > { %3406 = vmatprep.mubr.msk.bf16.mxu0 %vm701_vm1, %v3717_v4 }
 0x175   : > { %3407 = vmatmul.mubr.msk.bf16.gmra.mrb[4].mxu0 %vm701_vm1, %v3718_v5 }
 0x176   : > { %3410 = vmatprep.mubr.msk.bf16.mxu0 %vm701_vm1, %v3719_v6 }
 0x17d   : > { %3411 = vmatmul.mubr.msk.bf16.gmra.mrb[8].mxu0 %vm701_vm1, %v3720_v7 }
 0x17e   : > { %3414 = vmatprep.mubr.msk.bf16.mxu0 %vm701_vm1, %v3721_v8 }
 0x185   : > { %3415 = vmatmul.mubr.msk.bf16.gmra.mrb[12].mxu0 %vm701_vm1, %v3722_v9 }
 0x186   : > { %3418 = vmatprep.mubr.msk.bf16.mxu0 %vm701_vm1, %v3723_v10 }
 0x18d   : > { %3419 = vmatmul.mubr.msk.bf16.gmra.mrb[16].mxu0 %vm701_vm1, %v3724_v11 }
 0x18e   : > { %3422 = vmatprep.mubr.msk.bf16.mxu0 %vm701_vm1, %v3725_v12 }
 0x195   : > { %3423 = vmatmul.mubr.msk.bf16.gmra.mrb[20].mxu0 %vm701_vm1, %v3726_v13 }
 0x196   : > { %3426 = vmatprep.mubr.msk.bf16.mxu0 %vm701_vm1, %v3727_v14 }
 0x19d   : > { %3427 = vmatmul.mubr.msk.bf16.gmra.mrb[24].mxu0 %vm701_vm1, %v3728_v15 }
 0x19e   : > { %3430 = vmatprep.mubr.msk.bf16.mxu0 %vm701_vm1, %v3729_v16 }
 0x1a5   : > { %3431 = vmatmul.mubr.msk.bf16.gmra.mrb[28].mxu0 %vm701_vm1, %v3730_v17 }
 0x240   : > { %v3404_v19 = vpop.f32.mrb[0].mxu0 }
 0x241   : > { %v797_v20 = vadd.f32 %v3404_v19, %v4690_v18  ;;  %v788_v21 = vpop.f32.mrb[1].mxu0 }
 0x242   : > { %v789_v22 = vadd.f32 %v4690_v18, %v788_v21  ;;  %v3405_v23 = vpop.f32.mrb[2].mxu0 }
 0x243   : > { %v917_v24 = vmax.f32 %v797_v20, 0.0  ;;  %v800_v25 = vadd.f32 %v3405_v23, %v4690_v18  ;;  %v791_v26 = vpop.f32.mrb[3].mxu0 }
 0x244   : > { %v915_v27 = vmax.f32 %v789_v22, 0.0  ;;  %v792_v28 = vadd.f32 %v4690_v18, %v791_v26 }
 0x245   : > { %v4696_v29 = vmin.f32 %v917_v24, 6.0  ;;  %v918_v30 = vmax.f32 %v800_v25, 0.0 }
 0x246   : > { %v4698_v31 = vmin.f32 %v915_v27, 6.0  ;;  %v916_v32 = vmax.f32 %v792_v28, 0.0 }
 0x247   : > { %v4700_v33 = vmin.f32 %v918_v30, 6.0 }
 0x248   : > { %v4702_v34 = vmin.f32 %v916_v32, 6.0  ;;  %v3408_v35 = vpop.f32.mrb[4].mxu0 }
 0x249   : > { %v813_v36 = vadd.f32 %v3408_v35, %v4690_v18  ;;  %v804_v37 = vpop.f32.mrb[5].mxu0 }
 0x24a   : > { %v805_v38 = vadd.f32 %v4690_v18, %v804_v37  ;;  %v3409_v39 = vpop.f32.mrb[6].mxu0 }
 0x24b   : > { %v921_v40 = vmax.f32 %v813_v36, 0.0  ;;  %v816_v41 = vadd.f32 %v3409_v39, %v4690_v18  ;;  %v807_v42 = vpop.f32.mrb[7].mxu0 }
 0x24c   : > { %v919_v43 = vmax.f32 %v805_v38, 0.0  ;;  %v808_v44 = vadd.f32 %v4690_v18, %v807_v42 }
 0x24d   : > { %v4708_v45 = vmin.f32 %v921_v40, 6.0  ;;  %v922_v46 = vmax.f32 %v816_v41, 0.0 }
 0x24e   : > { %v4710_v47 = vmin.f32 %v919_v43, 6.0  ;;  %v920_v48 = vmax.f32 %v808_v44, 0.0 }
 0x24f   : > { %v4712_v49 = vmin.f32 %v922_v46, 6.0 }
 0x250   : > { %v4714_v50 = vmin.f32 %v920_v48, 6.0  ;;  %v3412_v51 = vpop.f32.mrb[8].mxu0 }
 0x251   : > { %v829_v52 = vadd.f32 %v3412_v51, %v4690_v18  ;;  %v820_v53 = vpop.f32.mrb[9].mxu0 }
 0x252   : > { %v821_v54 = vadd.f32 %v4690_v18, %v820_v53  ;;  %v3413_v55 = vpop.f32.mrb[10].mxu0 }
 0x253   : > { %v925_v56 = vmax.f32 %v829_v52, 0.0  ;;  %v832_v57 = vadd.f32 %v3413_v55, %v4690_v18  ;;  %v823_v58 = vpop.f32.mrb[11].mxu0 }
 0x254   : > { %v923_v59 = vmax.f32 %v821_v54, 0.0  ;;  %v824_v60 = vadd.f32 %v4690_v18, %v823_v58 }
 0x255   : > { %v4720_v61 = vmin.f32 %v925_v56, 6.0  ;;  %v926_v62 = vmax.f32 %v832_v57, 0.0 }
 0x256   : > { %v4722_v63 = vmin.f32 %v923_v59, 6.0  ;;  %v924_v0 = vmax.f32 %v824_v60, 0.0 }
 0x257   : > { %v4724_v1 = vmin.f32 %v926_v62, 6.0 }
 0x258   : > { %v4726_v2 = vmin.f32 %v924_v0, 6.0  ;;  %v3416_v3 = vpop.f32.mrb[12].mxu0 }
 0x259   : > { %v845_v4 = vadd.f32 %v3416_v3, %v4690_v18  ;;  %v836_v5 = vpop.f32.mrb[13].mxu0 }
 0x25a   : > { %v837_v6 = vadd.f32 %v4690_v18, %v836_v5  ;;  %v3417_v7 = vpop.f32.mrb[14].mxu0 }
 0x25b   : > { %v929_v8 = vmax.f32 %v845_v4, 0.0  ;;  %v848_v9 = vadd.f32 %v3417_v7, %v4690_v18  ;;  %v839_v10 = vpop.f32.mrb[15].mxu0 }
 0x25c   : > { %v927_v11 = vmax.f32 %v837_v6, 0.0  ;;  %v840_v12 = vadd.f32 %v4690_v18, %v839_v10 }
 0x25d   : > { %v4732_v13 = vmin.f32 %v929_v8, 6.0  ;;  %v930_v14 = vmax.f32 %v848_v9, 0.0 }
 0x25e   : > { %v4734_v15 = vmin.f32 %v927_v11, 6.0  ;;  %v928_v16 = vmax.f32 %v840_v12, 0.0 }
 0x25f   : > { %v4736_v17 = vmin.f32 %v930_v14, 6.0 }
 0x260   : > { %v4738_v19 = vmin.f32 %v928_v16, 6.0  ;;  %v3420_v20 = vpop.f32.mrb[16].mxu0 }
 0x261   : > { %v861_v21 = vadd.f32 %v3420_v20, %v4690_v18  ;;  %v852_v22 = vpop.f32.mrb[17].mxu0 }
 0x262   : > { %v853_v23 = vadd.f32 %v4690_v18, %v852_v22  ;;  %v3421_v24 = vpop.f32.mrb[18].mxu0 }
 0x263   : > { %v933_v25 = vmax.f32 %v861_v21, 0.0  ;;  %v864_v26 = vadd.f32 %v3421_v24, %v4690_v18  ;;  %v855_v27 = vpop.f32.mrb[19].mxu0 }
 0x264   : > { %v931_v28 = vmax.f32 %v853_v23, 0.0  ;;  %v856_v30 = vadd.f32 %v4690_v18, %v855_v27 }
 0x265   : > { %v4744_v32 = vmin.f32 %v933_v25, 6.0  ;;  %v934_v35 = vmax.f32 %v864_v26, 0.0 }
 0x266   : > { %v4746_v36 = vmin.f32 %v931_v28, 6.0  ;;  %v932_v37 = vmax.f32 %v856_v30, 0.0 }
 0x267   : > { %v4748_v38 = vmin.f32 %v934_v35, 6.0 }
 0x268   : > { %v4750_v39 = vmin.f32 %v932_v37, 6.0  ;;  %v3424_v40 = vpop.f32.mrb[20].mxu0 }
 0x269   : > { %v877_v41 = vadd.f32 %v3424_v40, %v4690_v18  ;;  %v868_v42 = vpop.f32.mrb[21].mxu0 }
 0x26a   : > { %v869_v43 = vadd.f32 %v4690_v18, %v868_v42  ;;  %v3425_v44 = vpop.f32.mrb[22].mxu0 }
 0x26b   : > { %v937_v46 = vmax.f32 %v877_v41, 0.0  ;;  %v880_v48 = vadd.f32 %v3425_v44, %v4690_v18  ;;  %v871_v51 = vpop.f32.mrb[23].mxu0 }
 0x26c   : > { %v935_v52 = vmax.f32 %v869_v43, 0.0  ;;  %v872_v53 = vadd.f32 %v4690_v18, %v871_v51 }
 0x26d   : > { %v4756_v54 = vmin.f32 %v937_v46, 6.0  ;;  %v938_v55 = vmax.f32 %v880_v48, 0.0  ;;  %v4190_v46 = vmov (!%p6614_p2), 0.0  }
 0x26e   : > { %v4758_v56 = vmin.f32 %v935_v52, 6.0  ;;  %v936_v57 = vmax.f32 %v872_v53, 0.0  ;;  %984 = vst.msk [vmem:[#allocation2] sm:$0xff] (!%p6614_p2), %vm983_vm2, %v4190_v46  ;;  %985 = vst.msk [vmem:[#allocation2 + $0x8] sm:$0xff] (!%p6614_p2), %vm983_vm2, %v4190_v46 }
 0x26f   : > { %v4760_v58 = vmin.f32 %v938_v55, 6.0  ;;  %986 = vst.msk [vmem:[#allocation2 + $0x110] sm:$0xff] (!%p6614_p2), %vm983_vm2, %v4190_v46  ;;  %987 = vst.msk [vmem:[#allocation2 + $0x118] sm:$0xff] (!%p6614_p2), %vm983_vm2, %v4190_v46 }
 0x270   : > { %v4762_v59 = vmin.f32 %v936_v57, 6.0  ;;  %v3428_v60 = vpop.f32.mrb[24].mxu0 }
 0x271   : > { %v893_v62 = vadd.f32 %v3428_v60, %v4690_v18  ;;  %v884_v0 = vpop.f32.mrb[25].mxu0 }
 0x272   : > { %v885_v3 = vadd.f32 %v4690_v18, %v884_v0  ;;  %v3429_v4 = vpop.f32.mrb[26].mxu0 }
 0x273   : > { %v941_v5 = vmax.f32 %v893_v62, 0.0  ;;  %v896_v6 = vadd.f32 %v3429_v4, %v4690_v18  ;;  %v887_v7 = vpop.f32.mrb[27].mxu0 }
 0x274   : > { %v939_v8 = vmax.f32 %v885_v3, 0.0  ;;  %v888_v9 = vadd.f32 %v4690_v18, %v887_v7 }
 0x275   : > { %v4768_v10 = vmin.f32 %v941_v5, 6.0  ;;  %v942_v11 = vmax.f32 %v896_v6, 0.0 }
 0x276   : > { %v971_v12 = vmin.f32 %v939_v8, 6.0  ;;  %v940_v14 = vmax.f32 %v888_v9, 0.0 }
 0x277   : > { %v974_v16 = vmin.f32 %v942_v11, 6.0 }
 0x278   : > { %v972_v20 = vmin.f32 %v940_v14, 6.0  ;;  %v3432_v21 = vpop.f32.mrb[28].mxu0 }
 0x279   : > { %v909_v22 = vadd.f32 %v3432_v21, %v4690_v18  ;;  %v900_v23 = vpop.f32.mrb[29].mxu0 }
 0x27a   : > { %v901_v24 = vadd.f32 %v4690_v18, %v900_v23  ;;  %v3433_v25 = vpop.f32.mrb[30].mxu0  ;;  %982 = sbr.rel (%p6614_p2) target bundleno = 641 (0x281), region = 120 }
 0x27b   : > { %v945_v26 = vmax.f32 %v909_v22, 0.0  ;;  %v912_v27 = vadd.f32 %v3433_v25, %v4690_v18  ;;  %v903_v28 = vpop.f32.mrb[31].mxu0 }
 0x27c   : > { %v943_v30 = vmax.f32 %v901_v24, 0.0  ;;  %v904_v35 = vadd.f32 %v4690_v18, %v903_v28 }
 0x27d   : > { %v977_v37 = vmin.f32 %v945_v26, 6.0  ;;  %v946_v40 = vmax.f32 %v912_v27, 0.0 }
 0x27e   : > { %v975_v41 = vmin.f32 %v943_v30, 6.0  ;;  %v944_v42 = vmax.f32 %v904_v35, 0.0 }
 0x27f   : > { %v978_v43 = vmin.f32 %v946_v40, 6.0 }
 0x280   : > { %v976_v44 = vmin.f32 %v944_v42, 6.0 }
 0x281 PF: > { %v1300_v18 = vld [vmem:[#allocation6 + $0x10] sm:$0xff]  ;;  %v1298_v48 = vld [vmem:[#allocation6] sm:$0xff]  ;;  %vm988_vm3 = vcmask 261120   ;;  %v4191_v51 = vmov 0   ;;  %v1162_v26 = vld [vmem:[#allocation2 + $0x118] sm:$0xff]  ;;  %vm4193_vm6 = vmmov 0  }
 0x282   : > { %3732 = vset.pattern.permute.xlu1 %v4191_v51  ;;  %3731 = vset.pattern.permute.xlu0 %v4191_v51  ;;  %989 = vst.msk [vmem:[#allocation2 + $0x10] sm:$0xff] %vm988_vm3, %v4698_v31  ;;  %990 = vst.msk [vmem:[#allocation2 + $0x18] sm:$0xff] %vm988_vm3, %v4702_v34  ;;  %v1299_v31 = vld [vmem:[#allocation6 + $0x8] sm:$0xff]  ;;  %v1023_v5 = vld [vmem:[#allocation2] sm:$0xff]  ;;  %s6772_s25 = sld [smem:[#allocation32_spill]]  ;;  %s2991_s30 = sshll.u32 %s4776_s0, 4  ;;  %s6478_s30 = int_to_ptr.vmem [resolvable:$true] %s2991_s30 }
 0x283   : > { %991 = vst.msk [vmem:[#allocation2 + $0x20] sm:$0xff] %vm988_vm3, %v4696_v29  ;;  %992 = vst.msk [vmem:[#allocation2 + $0x28] sm:$0xff] %vm988_vm3, %v4700_v33  ;;  %1342 = vperm.xlu1 %3732, %v1300_v18   ;;  %1332 = vperm.xlu0 %3731, %v1298_v48   ;;  %v1964_v29 = vld [vmem:[#allocation6 + $0x200] sm:$0xff]  ;;  %v1301_v33 = vld [vmem:[#allocation6 + $0x18] sm:$0xff]  ;;  %s6773_s15 = sld [smem:[#allocation82_spill]]  ;;  %s4082_s16 = scalar_lea.vmem %s6478_s30, 4096 }
 0x284   : > { %993 = vst.msk [vmem:[#allocation2 + $0x30] sm:$0xff] %vm988_vm3, %v4710_v47  ;;  %994 = vst.msk [vmem:[#allocation2 + $0x38] sm:$0xff] %vm988_vm3, %v4714_v50  ;;  %v1965_v34 = vld [vmem:[#allocation6 + $0x208] sm:$0xff]  ;;  %v1302_v47 = vld [vmem:[#allocation6 + $0x20] sm:$0xff]  ;;  %p4083_p9 = scmp.ne.s32.totalorder %s6478_s30, %s4082_s16  ;;  %p6774_p7 = scmp.ne.s32.totalorder %s6593_s1, 0 }
 0x285   : > { %995 = vst.msk [vmem:[#allocation2 + $0x40] sm:$0xff] %vm988_vm3, %v4708_v45  ;;  %996 = vst.msk [vmem:[#allocation2 + $0x48] sm:$0xff] %vm988_vm3, %v4712_v49  ;;  %v1055_v45 = vlaneseq  ;;  %v1966_v49 = vld [vmem:[#allocation6 + $0x210] sm:$0xff]  ;;  %v1306_v11 = vld [vmem:[#allocation6 + $0x40] sm:$0xff]  ;;  %s4195_s17 = smov [#allocation23]  }
 0x286   : > { %997 = vst.msk [vmem:[#allocation2 + $0x50] sm:$0xff] %vm988_vm3, %v4722_v63  ;;  %998 = vst.msk [vmem:[#allocation2 + $0x58] sm:$0xff] %vm988_vm3, %v4726_v2  ;;  %v1967_v63 = vld [vmem:[#allocation6 + $0x218] sm:$0xff]  ;;  %p4084_p5 = pnand %p4083_p9, %p6774_p7 }
 0x287   : > { %999 = vst.msk [vmem:[#allocation2 + $0x60] sm:$0xff] %vm988_vm3, %v4720_v61  ;;  %1000 = vst.msk [vmem:[#allocation2 + $0x68] sm:$0xff] %vm988_vm3, %v4724_v1  ;;  %1998 = vperm.xlu1 %3732, %v1964_v29   ;;  %1337 = vperm.xlu0 %3731, %v1299_v31   ;;  %v4837_v50 = vshrl.u32 %v1055_v45, 7  ;;  %v1303_v61 = vld [vmem:[#allocation6 + $0x28] sm:$0xff]  ;;  %v1971_v40 = vld [vmem:[#allocation6 + $0x238] sm:$0xff] }
 0x288   : > { %1001 = vst.msk [vmem:[#allocation2 + $0x70] sm:$0xff] %vm988_vm3, %v4734_v15  ;;  %1002 = vst.msk [vmem:[#allocation2 + $0x78] sm:$0xff] %vm988_vm3, %v4738_v19  ;;  %v1968_v15 = vld [vmem:[#allocation6 + $0x220] sm:$0xff]  ;;  %v1305_v19 = vld [vmem:[#allocation6 + $0x38] sm:$0xff]  ;;  %s3263_s26 = sshll.u32 %s6772_s25, 12  ;;  %p4085_p11 = pneg %p4084_p5 }
 0x289   : > { %1003 = vst.msk [vmem:[#allocation2 + $0x80] sm:$0xff] %vm988_vm3, %v4732_v13  ;;  %1004 = vst.msk [vmem:[#allocation2 + $0x88] sm:$0xff] %vm988_vm3, %v4736_v17  ;;  %v6554_v1 = vsub.s32 0, %v4837_v50  ;;  %v1095_v2 = vsub.s32 3, %v4837_v50  ;;  %v1304_v13 = vld [vmem:[#allocation6 + $0x30] sm:$0xff]  ;;  %v1165_v17 = vsub.s32 6, %v4837_v50  ;;  %s6476_s28 = scalar_lea.hbm %s6773_s15, %s3263_s26 }
 0x28a   : > { %1005 = vst.msk [vmem:[#allocation2 + $0x90] sm:$0xff] %vm988_vm3, %v4746_v36  ;;  %1006 = vst.msk [vmem:[#allocation2 + $0x98] sm:$0xff] %vm988_vm3, %v4750_v39  ;;  %v4842_v36 = vld [vmem:[#allocation2 + $0x8] sm:$0xff]  ;;  %v4844_v39 = vld [vmem:[#allocation2 + $0x18] sm:$0xff]  ;;  %v1560_v60 = vsub.s32 4, %v4837_v50  ;;  %v1728_v27 = vsub.s32 2, %v4837_v50 }
 0x28b   : > { %1007 = vst.msk [vmem:[#allocation2 + $0xa0] sm:$0xff] %vm988_vm3, %v4744_v32  ;;  %1008 = vst.msk [vmem:[#allocation2 + $0xa8] sm:$0xff] %vm988_vm3, %v4748_v38  ;;  %1347 = vperm.xlu1 %3732, %v1301_v33   ;;  %2003 = vperm.xlu0 %3731, %v1965_v34   ;;  %v1021_v32 = vld [vmem:[#allocation11] sm:$0xff]  ;;  %v4854_v55 = vld [vmem:[#allocation2 + $0x10] sm:$0xff]  ;;  %v1764_v28 = vsub.s32 5, %v4837_v50  ;;  %vm1265_vm4 = vcmp.lt.s32.totalorder %v4837_v50, 1 }
 0x28c   : > { %1009 = vst.msk [vmem:[#allocation2 + $0xb0] sm:$0xff] %vm988_vm3, %v4758_v56  ;;  %1010 = vst.msk [vmem:[#allocation2 + $0xb8] sm:$0xff] %vm988_vm3, %v4762_v59  ;;  %v1969_v38 = vld [vmem:[#allocation6 + $0x228] sm:$0xff]  ;;  %v4846_v52 = vld [vmem:[#allocation2 + $0x20] sm:$0xff]  ;;  %v4850_v53 = vrot.slane %v1021_v32, %v6554_v1  ;;  %v1524_v59 = vsub.s32 1, %v4837_v50  ;;  %v4882_v23 = vrot.slane %v1021_v32, %v1560_v60  ;;  %v4899_v51 = vrot.slane %v1021_v32, %v1728_v27  ;;  %s4086_s25 = sshll.u32 %s4195_s17, 4  ;;  %s4087_s25 = int_to_ptr.vmem [resolvable:$false] %s4086_s25 }
 0x28d   : > { %1011 = vst.msk [vmem:[#allocation2 + $0xc0] sm:$0xff] %vm988_vm3, %v4756_v54  ;;  %1012 = vst.msk [vmem:[#allocation2 + $0xc8] sm:$0xff] %vm988_vm3, %v4760_v58  ;;  %v4852_v54 = vrot.slane %v1021_v32, %v1095_v2  ;;  %v4856_v56 = vld [vmem:[#allocation2 + $0x28] sm:$0xff]  ;;  %v4858_v57 = vld [vmem:[#allocation2 + $0x30] sm:$0xff]  ;;  %v4860_v58 = vrot.slane %v1021_v32, %v1165_v17  ;;  %v4901_v29 = vrot.slane %v1021_v32, %v1764_v28  ;;  %vm1930_vm5 = vcmp.lt.s32.totalorder %v4837_v50, 7  ;;  %s4088_s26 = scalar_lea.vmem %s4087_s25, 8192  ;;  %p4089_p0 = scmp.lt.s32.totalorder %s6478_s30, %s4087_s25 }
 0x28e   : > { %1013 = vst.msk [vmem:[#allocation2 + $0xd0] sm:$0xff] %vm988_vm3, %v971_v12  ;;  %1014 = vst.msk [vmem:[#allocation2 + $0xd8] sm:$0xff] %vm988_vm3, %v972_v20  ;;  %v1060_v62 = vmul.f32 %v4850_v53, %v4842_v36  ;;  %v1061_v0 = vmul.f32 %v4850_v53, %v4854_v55  ;;  %v1970_v12 = vld [vmem:[#allocation6 + $0x230] sm:$0xff]  ;;  %v1059_v20 = vmul.f32 %v4850_v53, %v1023_v5  ;;  %v4923_v60 = vld [vmem:[#allocation2 + $0x38] sm:$0xff]  ;;  %p4090_p6 = scmp.lt.s32.totalorder %s4088_s26, %s4082_s16 }
 0x28f   : > { %1015 = vst.msk [vmem:[#allocation2 + $0xe0] sm:$0xff] %vm988_vm3, %v4768_v10  ;;  %1016 = vst.msk [vmem:[#allocation2 + $0xe8] sm:$0xff] %vm988_vm3, %v974_v16  ;;  %1352 = vperm.xlu1 %3732, %v1302_v47   ;;  %2008 = vperm.xlu0 %3731, %v1966_v49   ;;  %v1098_v3 = vmul.f32 %v4852_v54, %v4844_v39  ;;  %v1099_v4 = vmul.f32 %v4852_v54, %v4846_v52  ;;  %v1628_v10 = vsub.s32 7, %v4837_v50  ;;  %v1308_v45 = vld [vmem:[#allocation6 + $0x50] sm:$0xff]  ;;  %v1972_v47 = vld [vmem:[#allocation6 + $0x240] sm:$0xff] }
 0x290   : > { %1017 = vst.msk [vmem:[#allocation2 + $0xf0] sm:$0xff] %vm988_vm3, %v975_v41  ;;  %1018 = vst.msk [vmem:[#allocation2 + $0xf8] sm:$0xff] %vm988_vm3, %v976_v44  ;;  %v1168_v8 = vmul.f32 %v4860_v58, %v4856_v56  ;;  %v1169_v9 = vmul.f32 %v4860_v58, %v4858_v57  ;;  %v1097_v21 = vmul.f32 %v4852_v54, %v4854_v55  ;;  %v1310_v27 = vld [vmem:[#allocation6 + $0x60] sm:$0xff]  ;;  %v1974_v28 = vld [vmem:[#allocation6 + $0x250] sm:$0xff]  ;;  %p4091_p10 = por %p4090_p6, %p4089_p0 }
 0x291   : > { %1019 = vst.msk [vmem:[#allocation2 + $0x100] sm:$0xff] %vm988_vm3, %v977_v37  ;;  %1020 = vst.msk [vmem:[#allocation2 + $0x108] sm:$0xff] %vm988_vm3, %v978_v43  ;;  %v1130_v14 = vadd.f32 %v1098_v3, %v1060_v62  ;;  %v1131_v16 = vadd.f32 %v1099_v4, %v1061_v0  ;;  %v4880_v22 = vrot.slane %v1021_v32, %v1524_v59  ;;  %v1307_v37 = vld [vmem:[#allocation6 + $0x48] sm:$0xff]  ;;  %v1309_v3 = vld [vmem:[#allocation6 + $0x58] sm:$0xff] }
 0x292   : > { %v1564_v35 = vmul.f32 %v4882_v23, %v4846_v52  ;;  %v1129_v43 = vadd.f32 %v1097_v21, %v1059_v20  ;;  %v1167_v44 = vmul.f32 %v4860_v58, %v4846_v52  ;;  %v4896_v46 = vrot.slane %v1021_v32, %v1628_v10  ;;  %v1973_v4 = vld [vmem:[#allocation6 + $0x248] sm:$0xff]  ;;  %p4092_p8 = pnand %p4091_p10, %p4085_p11 }
 0x293   : > { %1357 = vperm.xlu1 %3732, %v1303_v61   ;;  %2013 = vperm.xlu0 %3731, %v1967_v63   ;;  %v1528_v30 = vmul.f32 %v4880_v22, %v4854_v55  ;;  %v1200_v41 = vadd.f32 %v1168_v8, %v1130_v14  ;;  %v4892_v42 = vadd.f32 %v1169_v9, %v1131_v16 }
 0x294   : > { %v1198_v48 = vmul.f32 %v4860_v58, %v1162_v26  ;;  %v1632_v33 = vmul.f32 %v4896_v46, %v4858_v57  ;;  %v1526_v34 = vmul.f32 %v4880_v22, %v1023_v5  ;;  %v1199_v63 = vadd.f32 %v1167_v44, %v1129_v43 }
 0x295   : > { %v1596_v31 = vadd.f32 %v1564_v35, %v1528_v30  ;;  %v1232_v49 = vrot.slane %v1200_v41, 7  ;;  %v1233_v61 = vrot.slane %v4892_v42, 7  ;;  %v1562_v2 = vmul.f32 %v4882_v23, %v4854_v55 }
 0x296   : > { %v1730_v17 = vmul.f32 %v4899_v51, %v1023_v5  ;;  %v1766_v32 = vmul.f32 %v4901_v29, %v4854_v55  ;;  %v1062_v62 = vmul.f32 %v4850_v53, %v4844_v39  ;;  %v1100_v0 = vmul.f32 %v4852_v54, %v4856_v56 }
 0x297   : > { %1362 = vperm.xlu1 %3732, %v1304_v13   ;;  %2018 = vperm.xlu0 %3731, %v1968_v15   ;;  %v1054_v6 = vld [vmem:[#allocation2 + $0xf8] sm:$0xff]  ;;  %v4911_v15 = vld [vmem:[#allocation11 + $0x8] ss:$0 sm:$0xff]  ;;  %v4921_v59 = vadd.f32 %v1632_v33, %v1596_v31  ;;  %v4933_v5 = vsel %vm1265_vm4, %v1232_v49, %v1233_v61  ;;  %v1630_v8 = vmul.f32 %v4896_v46, %v4846_v52 }
 0x298   : > { %v1092_v7 = vld [vmem:[#allocation2 + $0x108] sm:$0xff]  ;;  %v1090_v24 = vmul.f32 %v4850_v53, %v1054_v6  ;;  %v1231_v6 = vrot.slane %v1199_v63, 7  ;;  %v1834_v10 = vmul.f32 %v4911_v15, %v4846_v52  ;;  %v1798_v14 = vadd.f32 %v1766_v32, %v1730_v17  ;;  %v1975_v63 = vld [vmem:[#allocation6 + $0x258] sm:$0xff] }
 0x299   : > { %v1128_v25 = vmul.f32 %v4852_v54, %v1092_v7  ;;  %v1594_v7 = vadd.f32 %v1562_v2, %v1526_v34  ;;  %v1563_v20 = vmul.f32 %v4882_v23, %v4844_v39  ;;  %v1170_v21 = vmul.f32 %v4860_v58, %v4923_v60 }
 0x29a   : > { %v1565_v26 = vmul.f32 %v4882_v23, %v4856_v56  ;;  %v4956_v30 = vsel %vm1265_vm4, %v1231_v6, %v1232_v49  ;;  %v1732_v35 = vmul.f32 %v4899_v51, %v4854_v55  ;;  %v1631_v41 = vmul.f32 %v4896_v46, %v4856_v56  ;;  %v1311_v49 = vld [vmem:[#allocation6 + $0x68] sm:$0xff] }
 0x29b   : > { %1367 = vperm.xlu1 %3732, %v1305_v19   ;;  %2023 = vperm.xlu0 %3731, %v1969_v38   ;;  %v1160_v18 = vadd.f32 %v1128_v25, %v1090_v24  ;;  %v1731_v19 = vmul.f32 %v4899_v51, %v4842_v36  ;;  %v1767_v38 = vmul.f32 %v4901_v29, %v4844_v39 }
 0x29c   : > { %v1132_v24 = vadd.f32 %v1100_v0, %v1062_v62  ;;  %v1529_v25 = vmul.f32 %v4880_v22, %v4844_v39  ;;  %v1063_v43 = vmul.f32 %v4850_v53, %v4846_v52  ;;  %v1101_v44 = vmul.f32 %v4852_v54, %v4858_v57 }
 0x29d   : > { %v4909_v13 = vadd.f32 %v1198_v48, %v1160_v18  ;;  %v1799_v16 = vadd.f32 %v1767_v38, %v1731_v19  ;;  %v4974_v18 = vadd.f32 %v1834_v10, %v1798_v14  ;;  %v4976_v48 = vld [vmem:[#allocation2 + $0x40] sm:$0xff]  ;;  %v1733_v31 = vmul.f32 %v4899_v51, %v4844_v39 }
 0x29e   : > { %v1769_v33 = vmul.f32 %v4901_v29, %v4856_v56  ;;  %v1836_v17 = vmul.f32 %v4911_v15, %v4858_v57  ;;  %v1064_v39 = vmul.f32 %v4850_v53, %v4856_v56  ;;  %v1102_v19 = vmul.f32 %v4852_v54, %v4923_v60 }
 0x29f   : > { %1372 = vperm.xlu1 %3732, %v1306_v11   ;;  %2028 = vperm.xlu0 %3731, %v1970_v12   ;;  %6615 = vst [vmem:[#allocation34_spill] sm:$0xff] %v4909_v13  ;;  %v6556_v9 = vrot.slane %v4909_v13, 7  ;;  %v1835_v11 = vmul.f32 %v4911_v15, %v4856_v56  ;;  %v1527_v12 = vmul.f32 %v4880_v22, %v4842_v36  ;;  %6616 = vst [vmem:[#allocation35_spill] sm:$0xff] %v4974_v18 }
 0x2a0   : > { %v4952_v36 = vadd.f32 %v1630_v8, %v1594_v7  ;;  %v1133_v32 = vadd.f32 %v1101_v44, %v1063_v43  ;;  %v1171_v38 = vmul.f32 %v4860_v58, %v4976_v48  ;;  %v1530_v62 = vmul.f32 %v4880_v22, %v4846_v52 }
 0x2a1   : > { %v1595_v55 = vadd.f32 %v1563_v20, %v1527_v12  ;;  %v4982_v34 = vadd.f32 %v1835_v11, %v1799_v16  ;;  %v1566_v0 = vmul.f32 %v4882_v23, %v4858_v57  ;;  %v1734_v7 = vmul.f32 %v4899_v51, %v4846_v52  ;;  %v1312_v16 = vld [vmem:[#allocation6 + $0x70] sm:$0xff]  ;;  %v1976_v20 = vld [vmem:[#allocation6 + $0x260] sm:$0xff] }
 0x2a2   : > { %v1770_v8 = vmul.f32 %v4901_v29, %v4858_v57  ;;  %v6555_v10 = vrot.slane %v4974_v18, 1  ;;  %v1633_v14 = vmul.f32 %v4896_v46, %v4923_v60  ;;  %v1531_v44 = vmul.f32 %v4880_v22, %v4856_v56 }
 0x2a3   : > { %1377 = vperm.xlu1 %3732, %v1307_v37   ;;  %2033 = vperm.xlu0 %3731, %v1971_v40   ;;  %v1768_v37 = vmul.f32 %v4901_v29, %v4846_v52  ;;  %v4966_v40 = vsel %vm1265_vm4, %v6556_v9, %v1231_v6  ;;  %v1837_v6 = vmul.f32 %v4911_v15, %v4923_v60  ;;  %v1899_v11 = vrot.slane %v4982_v34, 1  ;;  %v1313_v34 = vld [vmem:[#allocation6 + $0x78] sm:$0xff]  ;;  %v1981_v9 = vld [vmem:[#allocation6 + $0x288] sm:$0xff] }
 0x2a4   : > { %v1134_v52 = vadd.f32 %v1102_v19, %v1064_v39  ;;  %v1103_v39 = vmul.f32 %v4852_v54, %v4976_v48  ;;  %v1534_v1 = vmul.f32 %v4880_v22, %v4976_v48 }
 0x2a5   : > { %v1800_v2 = vadd.f32 %v1768_v37, %v1732_v35  ;;  %v1838_v35 = vmul.f32 %v4911_v15, %v4976_v48  ;;  %v1598_v37 = vadd.f32 %v1566_v0, %v1530_v62 }
 0x2a7   : > { %1382 = vperm.xlu1 %3732, %v1308_v45   ;;  %2038 = vperm.xlu0 %3731, %v1972_v47   ;;  %v4985_v45 = vadd.f32 %v1170_v21, %v1132_v24  ;;  %v1597_v47 = vadd.f32 %v1565_v26, %v1529_v25  ;;  %v5012_v21 = vadd.f32 %v1631_v41, %v1595_v55 }
 0x2a8   : > { %v1868_v24 = vadd.f32 %v1836_v17, %v1800_v2  ;;  %v1203_v26 = vadd.f32 %v1171_v38, %v1133_v32  ;;  %v1567_v41 = vmul.f32 %v4882_v23, %v4923_v60  ;;  %v5028_v55 = vsel %vm1930_vm5, %v6555_v10, %v1899_v11  ;;  %v5040_v2 = vld [vmem:[#allocation2 + $0x50] sm:$0xff] }
 0x2a9   : > { %v1234_v12 = vrot.slane %v4985_v45, 7  ;;  %v1977_v45 = vld [vmem:[#allocation6 + $0x268] sm:$0xff]  ;;  %v1065_v17 = vmul.f32 %v4850_v53, %v4858_v57  ;;  %v1738_v10 = vmul.f32 %v4899_v51, %v4976_v48 }
 0x2aa   : > { %v1235_v42 = vrot.slane %v1203_v26, 7  ;;  %v1599_v62 = vadd.f32 %v1567_v41, %v1531_v44  ;;  %v1736_v41 = vmul.f32 %v4899_v51, %v4858_v57 }
 0x2ab   : > { %1387 = vperm.xlu1 %3732, %v1309_v3   ;;  %2043 = vperm.xlu0 %3731, %v1973_v4   ;;  %v4999_v3 = vld [vmem:[#allocation2 + $0x48] sm:$0xff]  ;;  %v1801_v4 = vadd.f32 %v1769_v33, %v1733_v31  ;;  %v5034_v31 = vsel %vm1265_vm4, %v1233_v61, %v1234_v12  ;;  %v5036_v33 = vadd.f32 %v1633_v14, %v1597_v47  ;;  %v1978_v14 = vld [vmem:[#allocation6 + $0x270] sm:$0xff] }
 0x2ac   : > { %v1172_v25 = vmul.f32 %v4860_v58, %v4999_v3  ;;  %v1532_v61 = vmul.f32 %v4880_v22, %v4858_v57  ;;  %v1568_v47 = vmul.f32 %v4882_v23, %v4976_v48  ;;  %v1635_v0 = vmul.f32 %v4896_v46, %v4999_v3 }
 0x2ad   : > { %v1869_v43 = vadd.f32 %v1837_v6, %v1801_v4  ;;  %v1173_v4 = vmul.f32 %v4860_v58, %v5040_v2  ;;  %v1735_v6 = vmul.f32 %v4899_v51, %v4856_v56  ;;  %v1535_v13 = vmul.f32 %v4880_v22, %v4999_v3 }
 0x2ae   : > { %v1600_v26 = vadd.f32 %v1568_v47, %v1532_v61 }
 0x2af   : > { %1392 = vperm.xlu1 %3732, %v1310_v27   ;;  %2048 = vperm.xlu0 %3731, %v1974_v28   ;;  %v1634_v27 = vmul.f32 %v4896_v46, %v4976_v48  ;;  %v1802_v28 = vadd.f32 %v1770_v8, %v1734_v7  ;;  %v1901_v38 = vrot.slane %v1869_v43, 1  ;;  %v1771_v7 = vmul.f32 %v4901_v29, %v4923_v60  ;;  %v1314_v8 = vld [vmem:[#allocation6 + $0x80] sm:$0xff] }
 0x2b0   : > { %v5084_v43 = vadd.f32 %v1635_v0, %v1599_v62  ;;  %v5110_v62 = vld [vmem:[#allocation2 + $0x60] sm:$0xff]  ;;  %v1105_v0 = vmul.f32 %v4852_v54, %v5040_v2 }
 0x2b1   : > { %v5046_v19 = vadd.f32 %v1838_v35, %v1802_v28  ;;  %v5052_v32 = vadd.f32 %v1634_v27, %v1598_v37  ;;  %v1636_v27 = vmul.f32 %v4896_v46, %v5040_v2  ;;  %v5074_v28 = vld [vmem:[#allocation2 + $0x58] sm:$0xff]  ;;  %v5078_v35 = vsel %vm1265_vm4, %v1234_v12, %v1235_v42  ;;  %v1315_v12 = vld [vmem:[#allocation6 + $0x88] sm:$0xff] }
 0x2b2   : > { %6617 = vst [vmem:[#allocation36_spill] sm:$0xff] %v5084_v43  ;;  %v1803_v44 = vadd.f32 %v1771_v7, %v1735_v6  ;;  %v1174_v61 = vmul.f32 %v4860_v58, %v5074_v28  ;;  %v1569_v6 = vmul.f32 %v4882_v23, %v4999_v3  ;;  %v1773_v7 = vmul.f32 %v4901_v29, %v4999_v3 }
 0x2b3   : > { %1397 = vperm.xlu1 %3732, %v1311_v49   ;;  %2053 = vperm.xlu0 %3731, %v1975_v63   ;;  %v1900_v49 = vrot.slane %v1868_v24, 1  ;;  %v5038_v63 = vadd.f32 %v1172_v25, %v1134_v52  ;;  %v1066_v24 = vmul.f32 %v4850_v53, %v4923_v60  ;;  %v1104_v52 = vmul.f32 %v4852_v54, %v4999_v3 }
 0x2b4   : > { %v6557_v56 = vrot.slane %v5046_v19, 1  ;;  %v5108_v47 = vadd.f32 %v1636_v27, %v1600_v26 }
 0x2b5   : > { %v5069_v25 = vsel %vm1930_vm5, %v1899_v11, %v1900_v49  ;;  %v5082_v37 = vsel %vm1930_vm5, %v1900_v49, %v1901_v38  ;;  %v1839_v11 = vmul.f32 %v4911_v15, %v4999_v3 }
 0x2b6   : > { %v5106_v57 = vsel %vm1930_vm5, %v1901_v38, %v6557_v56  ;;  %6619 = vst [vmem:[#allocation38_spill] sm:$0xff] %v5108_v47  ;;  %v1737_v38 = vmul.f32 %v4899_v51, %v4923_v60  ;;  %v5163_v56 = vld [vmem:[#allocation2 + $0x70] sm:$0xff] }
 0x2b7   : > { %1402 = vperm.xlu1 %3732, %v1312_v16   ;;  %2058 = vperm.xlu0 %3731, %v1976_v20   ;;  %v1236_v16 = vrot.slane %v5038_v63, 7  ;;  %v1135_v20 = vadd.f32 %v1103_v39, %v1065_v17  ;;  %v1136_v39 = vadd.f32 %v1104_v52, %v1066_v24  ;;  %v1316_v24 = vld [vmem:[#allocation6 + $0x90] sm:$0xff]  ;;  %v1980_v52 = vld [vmem:[#allocation6 + $0x280] sm:$0xff]  ;;  %v1842_v63 = vmul.f32 %v4911_v15, %v5110_v62 }
 0x2b9   : > { %v5096_v49 = vsel %vm1265_vm4, %v1235_v42, %v1236_v16  ;;  %v5098_v17 = vadd.f32 %v1173_v4, %v1135_v20  ;;  %v1067_v42 = vmul.f32 %v4850_v53, %v4976_v48  ;;  %v1533_v4 = vmul.f32 %v4880_v22, %v4923_v60 }
 0x2ba   : > { %6618 = vst [vmem:[#allocation37_spill] sm:$0xff] %v5096_v49  ;;  %v1840_v20 = vmul.f32 %v4911_v15, %v5040_v2  ;;  %v5129_v27 = vadd.f32 %v1174_v61, %v1136_v39  ;;  %v1175_v60 = vmul.f32 %v4860_v58, %v5110_v62  ;;  %v1841_v39 = vmul.f32 %v4911_v15, %v5074_v28  ;;  %v5145_v61 = vld [vmem:[#allocation2 + $0x68] sm:$0xff] }
 0x2bb   : > { %1407 = vperm.xlu1 %3732, %v1313_v34   ;;  %2063 = vperm.xlu0 %3731, %v1977_v45   ;;  %v1772_v34 = vmul.f32 %v4901_v29, %v4976_v48  ;;  %v1979_v45 = vld [vmem:[#allocation6 + $0x278] sm:$0xff]  ;;  %v1237_v26 = vrot.slane %v5098_v17, 7  ;;  %v1805_v17 = vadd.f32 %v1773_v7, %v1737_v38  ;;  %v1638_v7 = vmul.f32 %v4896_v46, %v5110_v62 }
 0x2bc   : > { %v1238_v38 = vrot.slane %v5129_v27, 7 }
 0x2bd   : > { %v5169_v27 = vsel %vm1265_vm4, %v1236_v16, %v1237_v26  ;;  %v5171_v18 = vadd.f32 %v1841_v39, %v1805_v17  ;;  %v1982_v16 = vld [vmem:[#allocation6 + $0x290] sm:$0xff] }
 0x2be   : > { %6620 = vst [vmem:[#allocation39_spill] sm:$0xff] %v5169_v27  ;;  %v5189_v39 = vsel %vm1265_vm4, %v1237_v26, %v1238_v38  ;;  %v1572_v26 = vmul.f32 %v4882_v23, %v5110_v62 }
 0x2bf   : > { %1412 = vperm.xlu1 %3732, %v1314_v8   ;;  %2068 = vperm.xlu0 %3731, %v1978_v14   ;;  %v5124_v8 = vadd.f32 %v1839_v11, %v1803_v44  ;;  %v1804_v14 = vadd.f32 %v1772_v34, %v1736_v41  ;;  %v1570_v11 = vmul.f32 %v4882_v23, %v5040_v2 }
 0x2c0   : > { %v1068_v44 = vmul.f32 %v4850_v53, %v4999_v3  ;;  %v1106_v41 = vmul.f32 %v4852_v54, %v5074_v28  ;;  %v1601_v34 = vadd.f32 %v1569_v6, %v1533_v4  ;;  %v1774_v4 = vmul.f32 %v4901_v29, %v5040_v2  ;;  %v1317_v6 = vld [vmem:[#allocation6 + $0x98] sm:$0xff]  ;;  %6623 = vst [vmem:[#allocation41_spill] sm:$0xff] %v5189_v39 }
 0x2c2   : > { %v1138_v48 = vadd.f32 %v1106_v41, %v1068_v44  ;;  %v1318_v44 = vld [vmem:[#allocation6 + $0xa0] sm:$0xff]  ;;  %v6622_v41 = vrot.slane %v5046_v19, 1  ;;  %v1639_v19 = vmul.f32 %v4896_v46, %v5145_v61 }
 0x2c3   : > { %1417 = vperm.xlu1 %3732, %v1315_v12   ;;  %2073 = vperm.xlu0 %3731, %v1979_v45   ;;  %v1137_v12 = vadd.f32 %v1105_v0, %v1067_v42  ;;  %v1637_v45 = vmul.f32 %v4896_v46, %v5074_v28  ;;  %v1903_v42 = vrot.slane %v5124_v8, 1  ;;  %v1872_v0 = vadd.f32 %v1840_v20, %v1804_v14 }
 0x2c4   : > { %v1107_v8 = vmul.f32 %v4852_v54, %v5110_v62  ;;  %v1602_v20 = vadd.f32 %v1570_v11, %v1534_v1  ;;  %v1571_v1 = vmul.f32 %v4882_v23, %v5074_v28  ;;  %v1806_v11 = vadd.f32 %v1774_v4, %v1738_v10 }
 0x2c5   : > { %v5159_v14 = vadd.f32 %v1175_v60, %v1137_v12  ;;  %v5177_v60 = vadd.f32 %v1637_v45, %v1601_v34  ;;  %v1904_v12 = vrot.slane %v1872_v0, 1  ;;  %v5185_v17 = vsel %vm1930_vm5, %v6622_v41, %v1903_v42 }
 0x2c6   : > { %v1177_v34 = vmul.f32 %v4860_v58, %v5163_v56  ;;  %v5194_v45 = vadd.f32 %v1638_v7, %v1602_v20  ;;  %v1905_v4 = vrot.slane %v5171_v18, 1  ;;  %v1536_v41 = vmul.f32 %v4880_v22, %v5040_v2  ;;  %v1983_v18 = vld [vmem:[#allocation6 + $0x298] sm:$0xff] }
 0x2c7   : > { %1422 = vperm.xlu1 %3732, %v1316_v24   ;;  %2078 = vperm.xlu0 %3731, %v1980_v52   ;;  %v1069_v24 = vmul.f32 %v4850_v53, %v5040_v2  ;;  %v1176_v52 = vmul.f32 %v4860_v58, %v5145_v61  ;;  %6621 = vst [vmem:[#allocation40_spill] sm:$0xff] %v5177_v60  ;;  %v1239_v10 = vrot.slane %v5159_v14, 7  ;;  %v1319_v14 = vld [vmem:[#allocation6 + $0xa8] sm:$0xff] }
 0x2c8   : > { %6624 = vst [vmem:[#allocation42_spill] sm:$0xff] %v5194_v45  ;;  %v5207_v7 = vadd.f32 %v1842_v63, %v1806_v11  ;;  %v1775_v20 = vmul.f32 %v4901_v29, %v5074_v28  ;;  %v5223_v11 = vld [vmem:[#allocation2 + $0x78] sm:$0xff]  ;;  %v1776_v63 = vmul.f32 %v4901_v29, %v5110_v62  ;;  %v1071_v45 = vmul.f32 %v4850_v53, %v5110_v62 }
 0x2c9   : > { %v1208_v0 = vadd.f32 %v1176_v52, %v1138_v48  ;;  %v1070_v48 = vmul.f32 %v4850_v53, %v5074_v28  ;;  %v1108_v52 = vmul.f32 %v4852_v54, %v5145_v61  ;;  %v1844_v60 = vmul.f32 %v4911_v15, %v5163_v56 }
 0x2ca   : > { %v1641_v27 = vmul.f32 %v4896_v46, %v5223_v11 }
 0x2cb   : > { %1427 = vperm.xlu1 %3732, %v1317_v6   ;;  %2083 = vperm.xlu0 %3731, %v1981_v9   ;;  %v1139_v9 = vadd.f32 %v1107_v8, %v1069_v24  ;;  %v1603_v6 = vadd.f32 %v1571_v1, %v1535_v13  ;;  %v5205_v24 = vsel %vm1930_vm5, %v1903_v42, %v1904_v12  ;;  %v1240_v1 = vrot.slane %v1208_v0, 7  ;;  %v5240_v0 = vld [vmem:[#allocation2 + $0x80] sm:$0xff] }
 0x2cc   : > { %6625 = vst [vmem:[#allocation43_spill] sm:$0xff] %v5205_v24  ;;  %v1739_v8 = vmul.f32 %v4899_v51, %v4999_v3  ;;  %v5221_v42 = vsel %vm1265_vm4, %v1238_v38, %v1239_v10  ;;  %v1740_v3 = vmul.f32 %v4899_v51, %v5040_v2  ;;  %v1640_v38 = vmul.f32 %v4896_v46, %v5163_v56 }
 0x2cd   : > { %v5211_v13 = vadd.f32 %v1177_v34, %v1139_v9  ;;  %6626 = vst [vmem:[#allocation44_spill] sm:$0xff] %v5221_v42  ;;  %v1604_v9 = vadd.f32 %v1572_v26, %v1536_v41  ;;  %v1843_v2 = vmul.f32 %v4911_v15, %v5145_v61  ;;  %v1537_v34 = vmul.f32 %v4880_v22, %v5074_v28  ;;  %v1985_v41 = vld [vmem:[#allocation6 + $0x2a8] sm:$0xff] }
 0x2ce   : > { %v1807_v26 = vadd.f32 %v1775_v20, %v1739_v8  ;;  %v1808_v42 = vadd.f32 %v1776_v63, %v1740_v3  ;;  %v5257_v47 = vsel %vm1265_vm4, %v1239_v10, %v1240_v1  ;;  %v1179_v8 = vmul.f32 %v4860_v58, %v5240_v0  ;;  %v1321_v10 = vld [vmem:[#allocation6 + $0xb8] sm:$0xff] }
 0x2cf   : > { %1432 = vperm.xlu1 %3732, %v1318_v44   ;;  %2088 = vperm.xlu0 %3731, %v1982_v16   ;;  %v5231_v44 = vsel %vm1930_vm5, %v1904_v12, %v1905_v4  ;;  %v5233_v16 = vadd.f32 %v1639_v19, %v1603_v6  ;;  %v1109_v12 = vmul.f32 %v4852_v54, %v5163_v56  ;;  %v1320_v19 = vld [vmem:[#allocation6 + $0xb0] sm:$0xff]  ;;  %v1984_v6 = vld [vmem:[#allocation6 + $0x2a0] sm:$0xff] }
 0x2d0   : > { %6627 = vst [vmem:[#allocation45_spill] sm:$0xff] %v5231_v44  ;;  %6629 = vst [vmem:[#allocation47_spill] sm:$0xff] %v5257_v47  ;;  %v1741_v20 = vmul.f32 %v4899_v51, %v5074_v28  ;;  %v1072_v3 = vmul.f32 %v4850_v53, %v5145_v61  ;;  %v1110_v63 = vmul.f32 %v4852_v54, %v5223_v11  ;;  %v6630_v47 = vrot.slane %v5207_v7, 1 }
 0x2d1   : > { %6628 = vst [vmem:[#allocation46_spill] sm:$0xff] %v5233_v16  ;;  %v1573_v16 = vmul.f32 %v4882_v23, %v5145_v61  ;;  %v6632_v28 = vrot.slane %v5211_v13, 7  ;;  %v5287_v24 = vadd.f32 %v1844_v60, %v1808_v42  ;;  %v1322_v60 = vld [vmem:[#allocation6 + $0xc0] sm:$0xff]  ;;  %v1986_v42 = vld [vmem:[#allocation6 + $0x2b0] sm:$0xff] }
 0x2d2   : > { %v5273_v44 = vsel %vm1930_vm5, %v1905_v4, %v6630_v47  ;;  %v1538_v47 = vmul.f32 %v4880_v22, %v5110_v62  ;;  %v1574_v4 = vmul.f32 %v4882_v23, %v5163_v56 }
 0x2d3   : > { %1437 = vperm.xlu1 %3732, %v1319_v14   ;;  %2093 = vperm.xlu0 %3731, %v1983_v18   ;;  %v1140_v14 = vadd.f32 %v1108_v52, %v1070_v48  ;;  %v1178_v18 = vmul.f32 %v4860_v58, %v5223_v11  ;;  %v1777_v48 = vmul.f32 %v4901_v29, %v5145_v61 }
 0x2d4   : > { %v1141_v52 = vadd.f32 %v1109_v12, %v1071_v45  ;;  %6631 = vst [vmem:[#allocation48_spill] sm:$0xff] %v5273_v44  ;;  %v5281_v45 = vadd.f32 %v1640_v38, %v1604_v9  ;;  %v1875_v12 = vadd.f32 %v1843_v2, %v1807_v26  ;;  %v1605_v43 = vadd.f32 %v1573_v16, %v1537_v34 }
 0x2d5   : > { %v1210_v39 = vadd.f32 %v1178_v18, %v1140_v14  ;;  %v1845_v9 = vmul.f32 %v4911_v15, %v5223_v11  ;;  %v1142_v16 = vadd.f32 %v1110_v63, %v1072_v3  ;;  %v1742_v2 = vmul.f32 %v4899_v51, %v5110_v62  ;;  %v5303_v14 = vld [vmem:[#allocation2 + $0x90] sm:$0xff] }
 0x2d6   : > { %6634 = vst [vmem:[#allocation50_spill] sm:$0xff] %v5281_v45  ;;  %v5295_v38 = vadd.f32 %v1179_v8, %v1141_v52  ;;  %v1778_v26 = vmul.f32 %v4901_v29, %v5163_v56  ;;  %v1073_v18 = vmul.f32 %v4850_v53, %v5163_v56  ;;  %v1907_v8 = vrot.slane %v1875_v12, 1 }
 0x2d7   : > { %1442 = vperm.xlu1 %3732, %v1320_v19   ;;  %2098 = vperm.xlu0 %3731, %v1984_v6   ;;  %v5279_v19 = vsel %vm1265_vm4, %v1240_v1, %v6632_v28  ;;  %v5283_v6 = vld [vmem:[#allocation2 + $0x88] sm:$0xff]  ;;  %v1809_v1 = vadd.f32 %v1777_v48, %v1741_v20  ;;  %v1242_v20 = vrot.slane %v1210_v39, 7  ;;  %v1908_v48 = vrot.slane %v5287_v24, 1 }
 0x2d8   : > { %6633 = vst [vmem:[#allocation49_spill] sm:$0xff] %v5279_v19  ;;  %v1180_v34 = vmul.f32 %v4860_v58, %v5283_v6  ;;  %v1642_v52 = vmul.f32 %v4896_v46, %v5240_v0  ;;  %v1606_v3 = vadd.f32 %v1574_v4, %v1538_v47  ;;  %v1539_v63 = vmul.f32 %v4880_v22, %v5145_v61  ;;  %v1323_v47 = vld [vmem:[#allocation6 + $0xc8] sm:$0xff]  ;;  %v1987_v4 = vld [vmem:[#allocation6 + $0x2b8] sm:$0xff] }
 0x2d9   : > { %v5312_v62 = vadd.f32 %v1845_v9, %v1809_v1  ;;  %v1243_v28 = vrot.slane %v5295_v38, 7  ;;  %v1846_v39 = vmul.f32 %v4911_v15, %v5240_v0  ;;  %v1181_v24 = vmul.f32 %v4860_v58, %v5303_v14 }
 0x2da   : > { %v5319_v12 = vadd.f32 %v1180_v34, %v1142_v16  ;;  %v1810_v1 = vadd.f32 %v1778_v26, %v1742_v2  ;;  %v1743_v45 = vmul.f32 %v4899_v51, %v5145_v61  ;;  %v6635_v38 = vrot.slane %v5207_v7, 1 }
 0x2db   : > { %1447 = vperm.xlu1 %3732, %v1321_v10   ;;  %2103 = vperm.xlu0 %3731, %v1985_v41   ;;  %v1111_v41 = vmul.f32 %v4852_v54, %v5240_v0  ;;  %v1575_v10 = vmul.f32 %v4882_v23, %v5223_v11  ;;  %v6637_v34 = vrot.slane %v5211_v13, 7  ;;  %v5341_v2 = vadd.f32 %v1641_v27, %v1605_v43 }
 0x2dc   : > { %v5333_v16 = vsel %vm1930_vm5, %v6635_v38, %v1907_v8  ;;  %v5345_v61 = vsel %vm1930_vm5, %v1907_v8, %v1908_v48  ;;  %v5347_v26 = vadd.f32 %v1642_v52, %v1606_v3  ;;  %v1909_v7 = vrot.slane %v5312_v62, 1  ;;  %v1324_v52 = vld [vmem:[#allocation6 + $0xd0] sm:$0xff]  ;;  %v1988_v3 = vld [vmem:[#allocation6 + $0x2c0] sm:$0xff] }
 0x2dd   : > { %v1143_v9 = vadd.f32 %v1111_v41, %v1073_v18  ;;  %6636 = vst [vmem:[#allocation51_spill] sm:$0xff] %v5333_v16  ;;  %6639 = vst [vmem:[#allocation53_spill] sm:$0xff] %v5341_v2  ;;  %v1607_v18 = vadd.f32 %v1575_v10, %v1539_v63  ;;  %v1643_v41 = vmul.f32 %v4896_v46, %v5283_v6  ;;  %v1244_v43 = vrot.slane %v5319_v12, 7 }
 0x2de   : > { %6640 = vst [vmem:[#allocation54_spill] sm:$0xff] %v5345_v61  ;;  %6641 = vst [vmem:[#allocation55_spill] sm:$0xff] %v5347_v26  ;;  %v5354_v13 = vsel %vm1265_vm4, %v1242_v20, %v1243_v28  ;;  %v1540_v27 = vmul.f32 %v4880_v22, %v5163_v56  ;;  %v1576_v8 = vmul.f32 %v4882_v23, %v5240_v0 }
 0x2df   : > { %1452 = vperm.xlu1 %3732, %v1322_v60   ;;  %2108 = vperm.xlu0 %3731, %v1986_v42   ;;  %v1779_v60 = vmul.f32 %v4901_v29, %v5223_v11  ;;  %v5339_v42 = vsel %vm1265_vm4, %v6637_v34, %v1242_v20  ;;  %6642 = vst [vmem:[#allocation56_spill] sm:$0xff] %v5354_v13  ;;  %v5367_v20 = vld [vmem:[#allocation2 + $0x98] sm:$0xff] }
 0x2e0   : > { %6638 = vst [vmem:[#allocation52_spill] sm:$0xff] %v5339_v42  ;;  %v5361_v62 = vadd.f32 %v1846_v39, %v1810_v1  ;;  %v5363_v63 = vadd.f32 %v1181_v24, %v1143_v9  ;;  %v1074_v12 = vmul.f32 %v4850_v53, %v5223_v11  ;;  %v1744_v38 = vmul.f32 %v4899_v51, %v5163_v56 }
 0x2e1   : > { %v1811_v10 = vadd.f32 %v1779_v60, %v1743_v45  ;;  %v1780_v39 = vmul.f32 %v4901_v29, %v5240_v0  ;;  %v5379_v45 = vsel %vm1930_vm5, %v1908_v48, %v1909_v7  ;;  %v5381_v24 = vadd.f32 %v1643_v41, %v1607_v18  ;;  %v5393_v48 = vld [vmem:[#allocation2 + $0xa0] sm:$0xff]  ;;  %v1325_v18 = vld [vmem:[#allocation6 + $0xd8] sm:$0xff]  ;;  %v1989_v41 = vld [vmem:[#allocation6 + $0x2c8] sm:$0xff] }
 0x2e2   : > { %6643 = vst [vmem:[#allocation57_spill] sm:$0xff] %v5379_v45  ;;  %v1075_v1 = vmul.f32 %v4850_v53, %v5240_v0  ;;  %v1113_v9 = vmul.f32 %v4852_v54, %v5303_v14  ;;  %v5389_v56 = vsel %vm1265_vm4, %v1243_v28, %v1244_v43  ;;  %v1608_v60 = vadd.f32 %v1576_v8, %v1540_v27 }
 0x2e3   : > { %1457 = vperm.xlu1 %3732, %v1323_v47   ;;  %2113 = vperm.xlu0 %3731, %v1987_v4   ;;  %v1847_v47 = vmul.f32 %v4911_v15, %v5283_v6  ;;  %v1112_v4 = vmul.f32 %v4852_v54, %v5283_v6  ;;  %6644 = vst [vmem:[#allocation58_spill] sm:$0xff] %v5381_v24  ;;  %6645 = vst [vmem:[#allocation59_spill] sm:$0xff] %v5389_v56  ;;  %v1910_v24 = vrot.slane %v5361_v62, 1 }
 0x2e4   : > { %v1644_v34 = vmul.f32 %v4896_v46, %v5303_v14  ;;  %v1812_v27 = vadd.f32 %v1780_v39, %v1744_v38  ;;  %v1848_v8 = vmul.f32 %v4911_v15, %v5303_v14  ;;  %v1577_v13 = vmul.f32 %v4882_v23, %v5283_v6  ;;  %v1990_v38 = vld [vmem:[#allocation6 + $0x2d0] sm:$0xff] }
 0x2e5   : > { %v1879_v28 = vadd.f32 %v1847_v47, %v1811_v10  ;;  %v1144_v56 = vadd.f32 %v1112_v4, %v1074_v12  ;;  %v1145_v2 = vadd.f32 %v1113_v9, %v1075_v1  ;;  %v1183_v62 = vmul.f32 %v4860_v58, %v5393_v48  ;;  %v1326_v4 = vld [vmem:[#allocation6 + $0xe0] sm:$0xff] }
 0x2e6   : > { %v1745_v26 = vmul.f32 %v4899_v51, %v5223_v11  ;;  %v1781_v10 = vmul.f32 %v4901_v29, %v5283_v6  ;;  %v1076_v47 = vmul.f32 %v4850_v53, %v5283_v6  ;;  %v1114_v12 = vmul.f32 %v4852_v54, %v5367_v20 }
 0x2e7   : > { %1462 = vperm.xlu1 %3732, %v1324_v52   ;;  %2118 = vperm.xlu0 %3731, %v1988_v3   ;;  %v1182_v52 = vmul.f32 %v4860_v58, %v5367_v20  ;;  %v1541_v3 = vmul.f32 %v4880_v22, %v5223_v11  ;;  %v5417_v39 = vsel %vm1930_vm5, %v1909_v7, %v1910_v24  ;;  %v6647_v1 = vrot.slane %v5363_v63, 7 }
 0x2e8   : > { %6646 = vst [vmem:[#allocation60_spill] sm:$0xff] %v5417_v39  ;;  %v5425_v9 = vadd.f32 %v1644_v34, %v1608_v60  ;;  %v5431_v42 = vadd.f32 %v1848_v8, %v1812_v27  ;;  %v1542_v7 = vmul.f32 %v4880_v22, %v5240_v0  ;;  %v1578_v39 = vmul.f32 %v4882_v23, %v5303_v14  ;;  %v1991_v27 = vld [vmem:[#allocation6 + $0x2d8] sm:$0xff] }
 0x2e9   : > { %v5423_v11 = vsel %vm1265_vm4, %v1244_v43, %v6647_v1  ;;  %v1214_v45 = vadd.f32 %v1182_v52, %v1144_v56  ;;  %v1911_v61 = vrot.slane %v1879_v28, 1  ;;  %v1609_v19 = vadd.f32 %v1577_v13, %v1541_v3  ;;  %v1327_v52 = vld [vmem:[#allocation6 + $0xe8] sm:$0xff] }
 0x2ea   : > { %6648 = vst [vmem:[#allocation61_spill] sm:$0xff] %v5423_v11  ;;  %6649 = vst [vmem:[#allocation62_spill] sm:$0xff] %v5425_v9  ;;  %v5437_v43 = vadd.f32 %v1183_v62, %v1145_v2  ;;  %v1849_v60 = vmul.f32 %v4911_v15, %v5367_v20  ;;  %v1813_v34 = vadd.f32 %v1781_v10, %v1745_v26  ;;  %v1328_v26 = vld [vmem:[#allocation6 + $0xf0] sm:$0xff]  ;;  %v1992_v9 = vld [vmem:[#allocation6 + $0x2e0] sm:$0xff]  ;;  %v6652_v16 = vrot.slane %v5363_v63, 7 }
 0x2eb   : > { %1467 = vperm.xlu1 %3732, %v1325_v18   ;;  %2123 = vperm.xlu0 %3731, %v1989_v41   ;;  %v1645_v18 = vmul.f32 %v4896_v46, %v5367_v20  ;;  %v5429_v41 = vld [vmem:[#allocation2 + $0xa8] sm:$0xff]  ;;  %v1146_v1 = vadd.f32 %v1114_v12, %v1076_v47  ;;  %v1746_v8 = vmul.f32 %v4899_v51, %v5240_v0  ;;  %v1246_v28 = vrot.slane %v1214_v45, 7  ;;  %v5454_v47 = vld [vmem:[#allocation2 + $0xb0] sm:$0xff] }
 0x2ec   : > { %v1184_v56 = vmul.f32 %v4860_v58, %v5429_v41  ;;  %v1782_v13 = vmul.f32 %v4901_v29, %v5303_v14  ;;  %v1077_v2 = vmul.f32 %v4850_v53, %v5303_v14  ;;  %v1115_v3 = vmul.f32 %v4852_v54, %v5393_v48 }
 0x2ed   : > { %v1610_v62 = vadd.f32 %v1578_v39, %v1542_v7  ;;  %v1646_v10 = vmul.f32 %v4896_v46, %v5393_v48  ;;  %v5458_v0 = vsel %vm1930_vm5, %v1910_v24, %v1911_v61  ;;  %v1247_v12 = vrot.slane %v5437_v43, 7 }
 0x2ee   : > { %6650 = vst [vmem:[#allocation63_spill] sm:$0xff] %v5458_v0  ;;  %v1579_v45 = vmul.f32 %v4882_v23, %v5367_v20  ;;  %v5467_v39 = vadd.f32 %v1849_v60, %v1813_v34  ;;  %v5469_v7 = vadd.f32 %v1184_v56, %v1146_v1  ;;  %v1814_v24 = vadd.f32 %v1782_v13, %v1746_v8 }
 0x2ef   : > { %1472 = vperm.xlu1 %3732, %v1326_v4   ;;  %2128 = vperm.xlu0 %3731, %v1990_v38   ;;  %v1543_v4 = vmul.f32 %v4880_v22, %v5283_v6  ;;  %v5465_v38 = vadd.f32 %v1645_v18, %v1609_v19  ;;  %v1850_v43 = vmul.f32 %v4911_v15, %v5393_v48  ;;  %v6654_v18 = vrot.slane %v5431_v42, 1 }
 0x2f0   : > { %v1147_v11 = vadd.f32 %v1115_v3, %v1077_v2  ;;  %v1185_v0 = vmul.f32 %v4860_v58, %v5454_v47  ;;  %v5479_v19 = vsel %vm1265_vm4, %v6652_v16, %v1246_v28  ;;  %v5487_v34 = vadd.f32 %v1646_v10, %v1610_v62  ;;  %v1329_v2 = vld [vmem:[#allocation6 + $0xf8] sm:$0xff]  ;;  %v1993_v3 = vld [vmem:[#allocation6 + $0x2e8] sm:$0xff] }
 0x2f1   : > { %6651 = vst [vmem:[#allocation64_spill] sm:$0xff] %v5465_v38  ;;  %6653 = vst [vmem:[#allocation65_spill] sm:$0xff] %v5479_v19  ;;  %v5485_v60 = vsel %vm1930_vm5, %v1911_v61, %v6654_v18  ;;  %v1647_v1 = vmul.f32 %v4896_v46, %v5429_v41  ;;  %v5493_v56 = vsel %vm1265_vm4, %v1246_v28, %v1247_v12  ;;  %v1913_v61 = vrot.slane %v5467_v39, 1  ;;  %v5513_v10 = vld [vmem:[#allocation2 + $0xb8] sm:$0xff] }
 0x2f2   : > { %6655 = vst [vmem:[#allocation66_spill] sm:$0xff] %v5485_v60  ;;  %6656 = vst [vmem:[#allocation67_spill] sm:$0xff] %v5487_v34  ;;  %v1611_v63 = vadd.f32 %v1579_v45, %v1543_v4  ;;  %v1544_v16 = vmul.f32 %v4880_v22, %v5303_v14  ;;  %v1747_v8 = vmul.f32 %v4899_v51, %v5283_v6 }
 0x2f3   : > { %1477 = vperm.xlu1 %3732, %v1327_v52   ;;  %2133 = vperm.xlu0 %3731, %v1991_v27   ;;  %6657 = vst [vmem:[#allocation68_spill] sm:$0xff] %v5493_v56  ;;  %v1580_v52 = vmul.f32 %v4882_v23, %v5393_v48  ;;  %v1248_v27 = vrot.slane %v5469_v7, 7  ;;  %v1783_v13 = vmul.f32 %v4901_v29, %v5367_v20 }
 0x2f4   : > { %v5505_v28 = vadd.f32 %v1850_v43, %v1814_v24  ;;  %v5507_v62 = vadd.f32 %v1185_v0, %v1147_v11  ;;  %v1748_v6 = vmul.f32 %v4899_v51, %v5303_v14  ;;  %v1784_v4 = vmul.f32 %v4901_v29, %v5393_v48  ;;  %v5529_v43 = vld [vmem:[#allocation2 + $0xc0] sm:$0xff] }
 0x2f5   : > { %v1079_v45 = vmul.f32 %v4850_v53, %v5393_v48  ;;  %v1117_v11 = vmul.f32 %v4852_v54, %v5454_v47  ;;  %v5523_v0 = vadd.f32 %v1647_v1, %v1611_v63  ;;  %v1612_v39 = vadd.f32 %v1580_v52, %v1544_v16  ;;  %v1995_v1 = vld [vmem:[#allocation6 + $0x2f8] sm:$0xff]  ;;  %v1994_v63 = vld [vmem:[#allocation6 + $0x2f0] sm:$0xff] }
 0x2f6   : > { %v1648_v7 = vmul.f32 %v4896_v46, %v5454_v47  ;;  %v1851_v24 = vmul.f32 %v4911_v15, %v5429_v41  ;;  %v1815_v14 = vadd.f32 %v1783_v13, %v1747_v8  ;;  %v1545_v18 = vmul.f32 %v4880_v22, %v5367_v20 }
 0x2f7   : > { %1482 = vperm.xlu1 %3732, %v1328_v26   ;;  %2138 = vperm.xlu0 %3731, %v1992_v9   ;;  %v1078_v26 = vmul.f32 %v4850_v53, %v5367_v20  ;;  %v1116_v9 = vmul.f32 %v4852_v54, %v5429_v41  ;;  %6658 = vst [vmem:[#allocation69_spill] sm:$0xff] %v5523_v0  ;;  %v1914_v16 = vrot.slane %v5505_v28, 1  ;;  %v1249_v52 = vrot.slane %v5507_v62, 7 }
 0x2f8   : > { %v1581_v34 = vmul.f32 %v4882_v23, %v5429_v41  ;;  %v1186_v38 = vmul.f32 %v4860_v58, %v5513_v10  ;;  %v1816_v56 = vadd.f32 %v1784_v4, %v1748_v6  ;;  %v1852_v8 = vmul.f32 %v4911_v15, %v5454_v47 }
 0x2f9   : > { %v1148_v0 = vadd.f32 %v1116_v9, %v1078_v26  ;;  %v1149_v13 = vadd.f32 %v1117_v11, %v1079_v45  ;;  %v5551_v28 = vsel %vm1265_vm4, %v1247_v12, %v1248_v27  ;;  %v1749_v62 = vmul.f32 %v4899_v51, %v5367_v20 }
 0x2fa   : > { %6661 = vst [vmem:[#allocation71_spill] sm:$0xff] %v5551_v28  ;;  %v1785_v26 = vmul.f32 %v4901_v29, %v5429_v41  ;;  %v1883_v9 = vadd.f32 %v1851_v24, %v1815_v14  ;;  %v1613_v6 = vadd.f32 %v1581_v34, %v1545_v18  ;;  %v5561_v4 = vsel %vm1930_vm5, %v1913_v61, %v1914_v16 }
 0x2fb   : > { %1487 = vperm.xlu1 %3732, %v1329_v2   ;;  %2143 = vperm.xlu0 %3731, %v1993_v3   ;;  %v1187_v2 = vmul.f32 %v4860_v58, %v5529_v43  ;;  %v6659_v3 = vrot.slane %v5431_v42, 1  ;;  %v1649_v42 = vmul.f32 %v4896_v46, %v5513_v10  ;;  %6662 = vst [vmem:[#allocation72_spill] sm:$0xff] %v5561_v4 }
 0x2fc   : > { %v5565_v12 = vsel %vm1265_vm4, %v1248_v27, %v1249_v52  ;;  %v5567_v45 = vadd.f32 %v1648_v7, %v1612_v39  ;;  %v1218_v20 = vadd.f32 %v1186_v38, %v1148_v0  ;;  %v5569_v11 = vadd.f32 %v1852_v8, %v1816_v56  ;;  %v5585_v7 = vld [vmem:[#allocation2 + $0xc8] sm:$0xff] }
 0x2fd   : > { %v5547_v19 = vsel %vm1930_vm5, %v6659_v3, %v1913_v61  ;;  %6663 = vst [vmem:[#allocation73_spill] sm:$0xff] %v5565_v12  ;;  %v1546_v34 = vmul.f32 %v4880_v22, %v5393_v48  ;;  %v1582_v24 = vmul.f32 %v4882_v23, %v5454_v47  ;;  %v1817_v18 = vadd.f32 %v1785_v26, %v1749_v62 }
 0x2fe   : > { %6660 = vst [vmem:[#allocation70_spill] sm:$0xff] %v5547_v19  ;;  %6664 = vst [vmem:[#allocation74_spill] sm:$0xff] %v5567_v45  ;;  %v1853_v27 = vmul.f32 %v4911_v15, %v5513_v10  ;;  %v1080_v39 = vmul.f32 %v4850_v53, %v5429_v41  ;;  %v1118_v38 = vmul.f32 %v4852_v54, %v5513_v10  ;;  %v1915_v56 = vrot.slane %v1883_v9, 1 }
 0x2ff   : > { %2153 = vperm.xlu1 %3732, %v1995_v1   ;;  %2148 = vperm.xlu0 %3731, %v1994_v63   ;;  %v5571_v1 = vadd.f32 %v1187_v2, %v1149_v13  ;;  %v5583_v0 = vadd.f32 %v1649_v42, %v1613_v6  ;;  %v1547_v63 = vmul.f32 %v4880_v22, %v5429_v41  ;;  %v1250_v26 = vrot.slane %v1218_v20, 7 }
 0x300   : > { %v1583_v8 = vmul.f32 %v4882_v23, %v5513_v10  ;;  %v1750_v13 = vmul.f32 %v4899_v51, %v5393_v48  ;;  %v1786_v2 = vmul.f32 %v4901_v29, %v5454_v47  ;;  %v1081_v3 = vmul.f32 %v4850_v53, %v5454_v47 }
 0x301   : > { %6665 = vst [vmem:[#allocation75_spill] sm:$0xff] %v5583_v0  ;;  %v1119_v62 = vmul.f32 %v4852_v54, %v5529_v43  ;;  %v1916_v9 = vrot.slane %v5569_v11, 1  ;;  %v1614_v6 = vadd.f32 %v1582_v24, %v1546_v34  ;;  %v1650_v42 = vmul.f32 %v4896_v46, %v5529_v43  ;;  %v5602_v0 = vld [vmem:[#allocation2 + $0xd0] sm:$0xff] }
 0x302   : > { %v1343_v14 = vpop.permute.xlu1 %1342  ;;  %v1333_v61 = vpop.permute.xlu0 %1332  ;;  %v1251_v12 = vrot.slane %v5571_v1, 7  ;;  %v5605_v28 = vadd.f32 %v1853_v27, %v1817_v18  ;;  %v1150_v4 = vadd.f32 %v1118_v38, %v1080_v39  ;;  %v1188_v19 = vmul.f32 %v4860_v58, %v5585_v7 }
 0x303   : > { %v1615_v60 = vadd.f32 %v1583_v8, %v1547_v63  ;;  %v1651_v11 = vmul.f32 %v4896_v46, %v5585_v7  ;;  %v1854_v34 = vmul.f32 %v4911_v15, %v5529_v43  ;;  %v1490_v24 = vmul.f32 %v1333_v61, %v4966_v40 }
 0x304   : > { %v1818_v44 = vadd.f32 %v1786_v2, %v1750_v13  ;;  %v1151_v49 = vadd.f32 %v1119_v62, %v1081_v3  ;;  %v1189_v1 = vmul.f32 %v4860_v58, %v5602_v0  ;;  %v5619_v18 = vsel %vm1930_vm5, %v1914_v16, %v1915_v56 }
 0x305   : > { %v5627_v27 = vsel %vm1930_vm5, %v1915_v56, %v1916_v9  ;;  %v5629_v15 = vadd.f32 %v1650_v42, %v1614_v6  ;;  %v5634_v38 = vsel %vm1265_vm4, %v1250_v26, %v1251_v12  ;;  %v1917_v16 = vrot.slane %v5605_v28, 1  ;;  %v5669_v42 = vld [vmem:[#allocation2 + $0xd8] sm:$0xff] }
 0x306   : > { %v1999_v45 = vpop.permute.xlu1 %1998  ;;  %v1338_v48 = vpop.permute.xlu0 %1337  ;;  %v1220_v63 = vadd.f32 %v1188_v19, %v1150_v4  ;;  %v5640_v13 = vadd.f32 %v1651_v11, %v1615_v60  ;;  %v1694_v2 = vadd.f32 %v4952_v36, %v1490_v24  ;;  %v1548_v3 = vmul.f32 %v4880_v22, %v5454_v47 }
 0x307   : > { %v1491_v20 = vmul.f32 %v1338_v48, %v4956_v30  ;;  %v5623_v30 = vsel %vm1265_vm4, %v1249_v52, %v1250_v26  ;;  %v2156_v40 = vmul.f32 %v1999_v45, %v5028_v55  ;;  %v1492_v52 = vmul.f32 %v1343_v14, %v4933_v5  ;;  %v5660_v14 = vld [vmem:[#allocation12] ss:$0 sm:$0xff] }
 0x308   : > { %v5643_v55 = vadd.f32 %v1854_v34, %v1818_v44  ;;  %v5645_v45 = vadd.f32 %v1189_v1, %v1151_v49  ;;  %v1584_v19 = vmul.f32 %v4882_v23, %v5529_v43  ;;  %v1751_v5 = vmul.f32 %v4899_v51, %v5429_v41  ;;  %v5675_v1 = vld [vmem:[#allocation11 + $0x8] ss:$0 sm:$0xff] }
 0x309   : > { %v1695_v8 = vadd.f32 %v5012_v21, %v1491_v20  ;;  %v1787_v21 = vmul.f32 %v4901_v29, %v5513_v10  ;;  %v1252_v44 = vrot.slane %v1220_v63, 7  ;;  %v1082_v49 = vmul.f32 %v4850_v53, %v5513_v10 }
 0x30a   : > { %v1348_v61 = vpop.permute.xlu1 %1347  ;;  %v2004_v39 = vpop.permute.xlu0 %2003  ;;  %v1120_v28 = vmul.f32 %v4852_v54, %v5585_v7  ;;  %v1696_v4 = vadd.f32 %v4921_v59, %v1492_v52  ;;  %v5665_v41 = vsel %vm1930_vm5, %v1916_v9, %v1917_v16  ;;  %v1652_v6 = vmul.f32 %v4896_v46, %v5602_v0 }
 0x30b   : > { %v2157_v56 = vmul.f32 %v2004_v39, %v5069_v25  ;;  %v2188_v25 = vadd.f32 %v2156_v40, %v1694_v2  ;;  %v1493_v48 = vmul.f32 %v1348_v61, %v5034_v31  ;;  %v1918_v11 = vrot.slane %v5643_v55, 1 }
 0x30c   : > { %v1253_v59 = vrot.slane %v5645_v45, 7  ;;  %v1616_v24 = vadd.f32 %v1584_v19, %v1548_v3  ;;  %v1855_v9 = vmul.f32 %v5675_v1, %v5585_v7  ;;  %v5682_v31 = vsel %vm1265_vm4, %v1251_v12, %v1252_v44 }
 0x30d   : > { %v2189_v62 = vadd.f32 %v2157_v56, %v1695_v8  ;;  %v2227_v40 = vadd.f32 %v5660_v14, %v2188_v25  ;;  %v1152_v61 = vadd.f32 %v1120_v28, %v1082_v49  ;;  %v1190_v52 = vmul.f32 %v4860_v58, %v5669_v42 }
 0x30e   : > { %v1353_v60 = vpop.permute.xlu1 %1352  ;;  %v2009_v36 = vpop.permute.xlu0 %2008  ;;  %v1752_v2 = vmul.f32 %v4899_v51, %v5454_v47  ;;  %v1788_v55 = vmul.f32 %v4901_v29, %v5529_v43  ;;  %v1697_v3 = vadd.f32 %v5036_v33, %v1493_v48  ;;  %v5695_v12 = vsel %vm1930_vm5, %v1917_v16, %v1918_v11  ;;  %v5722_v48 = vld [vmem:[#allocation2 + $0xe0] sm:$0xff] }
 0x30f   : > { %v2158_v26 = vmul.f32 %v2009_v36, %v5082_v37  ;;  %v2228_v20 = vadd.f32 %v5660_v14, %v2189_v62  ;;  %v1819_v37 = vadd.f32 %v1787_v21, %v1751_v5  ;;  %v1494_v8 = vmul.f32 %v1353_v60, %v5078_v35 }
 0x310   : > { %v5701_v35 = vsel %vm1265_vm4, %v1252_v44, %v1253_v59  ;;  %v5704_v19 = vadd.f32 %v1652_v6, %v1616_v24  ;;  %v1549_v33 = vmul.f32 %v4880_v22, %v5513_v10  ;;  %v2259_v5 = vmax.f32 %v2227_v40, 0.0  ;;  %v6669_v24 = vld [vmem:[#allocation37_spill] sm:$0xff] }
 0x311   : > { %v2190_v34 = vadd.f32 %v2158_v26, %v1696_v4  ;;  %v2260_v62 = vmax.f32 %v2228_v20, 0.0  ;;  %6666 = vst [vmem:[#allocation76_spill] sm:$0xff] %v5701_v35  ;;  %v5706_v47 = vadd.f32 %v1855_v9, %v1819_v37  ;;  %v5710_v60 = vadd.f32 %v1190_v52, %v1152_v61 }
 0x312   : > { %v1358_v39 = vpop.permute.xlu1 %1357  ;;  %v2014_v63 = vpop.permute.xlu0 %2013  ;;  %6667 = vst [vmem:[#allocation77_spill] sm:$0xff] %v5704_v19  ;;  %v1585_v36 = vmul.f32 %v4882_v23, %v5585_v7  ;;  %v1698_v44 = vadd.f32 %v5052_v32, %v1494_v8  ;;  %v1820_v28 = vadd.f32 %v1788_v55, %v1752_v2  ;;  %v1856_v4 = vmul.f32 %v5675_v1, %v5602_v0  ;;  %v6671_v2 = vld [vmem:[#allocation43_spill] sm:$0xff] }
 0x313   : > { %v2159_v56 = vmul.f32 %v2014_v63, %v5106_v57  ;;  %v2229_v57 = vadd.f32 %v5660_v14, %v2190_v34  ;;  %v5718_v26 = vmin.f32 %v2260_v62, 6.0  ;;  %v1653_v6 = vmul.f32 %v4896_v46, %v5669_v42 }
 0x314   : > { %v1083_v20 = vmul.f32 %v4850_v53, %v5529_v43  ;;  %v1121_v34 = vmul.f32 %v4852_v54, %v5602_v0  ;;  %v1919_v9 = vrot.slane %v5706_v47, 1  ;;  %v5730_v40 = vmin.f32 %v2259_v5, 6.0  ;;  %v6672_v47 = vld [vmem:[#allocation39_spill] sm:$0xff] }
 0x315   : > { %v2191_v21 = vadd.f32 %v2159_v56, %v1697_v3  ;;  %6668 = vst [vmem:[#allocation78_spill] sm:$0xff] %v5718_v26  ;;  %v2261_v32 = vmax.f32 %v2229_v57, 0.0  ;;  %v6563_v8 = vrot.slane %v5710_v60, 7  ;;  %v1617_v56 = vadd.f32 %v1585_v36, %v1549_v33  ;;  %v6674_v36 = vld [vmem:[#allocation36_spill] sm:$0xff] }
 0x316   : > { %v1363_v25 = vpop.permute.xlu1 %1362  ;;  %v2019_v16 = vpop.permute.xlu0 %2018  ;;  %6670 = vst [vmem:[#allocation37_spill] sm:$0xff] %v5730_v40  ;;  %v5735_v3 = vadd.f32 %v1856_v4, %v1820_v28  ;;  %v1191_v62 = vmul.f32 %v4860_v58, %v5722_v48  ;;  %v2324_v57 = vsel %vm988_vm3, %v5718_v26, 0.0  ;;  %v5752_v28 = vsel %vm1930_vm5, %v1918_v11, %v1919_v9 }
 0x317   : > { %v2160_v49 = vmul.f32 %v2019_v16, %v5185_v17  ;;  %v1495_v17 = vmul.f32 %v1358_v39, %v6669_v24  ;;  %v2230_v63 = vadd.f32 %v5660_v14, %v2191_v21  ;;  %v1550_v39 = vmul.f32 %v4880_v22, %v5529_v43 }
 0x318   : > { %v1496_v5 = vmul.f32 %v1363_v25, %v6672_v47  ;;  %v1153_v21 = vadd.f32 %v1121_v34, %v1083_v20  ;;  %v1586_v16 = vmul.f32 %v4882_v23, %v5602_v0  ;;  %v5746_v33 = vmin.f32 %v2261_v32, 6.0 }
 0x319   : > { %v2192_v37 = vadd.f32 %v2160_v49, %v1698_v44  ;;  %v1699_v44 = vadd.f32 %v6674_v36, %v1495_v17  ;;  %v2323_v4 = vsel %vm988_vm3, %v5730_v40, 0.0  ;;  %v2262_v24 = vmax.f32 %v2230_v63, 0.0  ;;  %v6677_v17 = vld [vmem:[#allocation41_spill] sm:$0xff]  ;;  %v6679_v36 = vld [vmem:[#allocation38_spill] sm:$0xff] }
 0x31a   : > { %v1368_v61 = vpop.permute.xlu1 %1367  ;;  %v2024_v52 = vpop.permute.xlu0 %2023  ;;  %6673 = vst [vmem:[#allocation43_spill] sm:$0xff] %v5746_v33  ;;  %v5762_v20 = vsel %vm1265_vm4, %v1253_v59, %v6563_v8  ;;  %v5764_v34 = vadd.f32 %v1653_v6, %v1617_v56  ;;  %v2325_v32 = vadd.f32 %v2324_v57, %v2323_v4  ;;  %v1700_v63 = vadd.f32 %v6679_v36, %v1496_v5  ;;  %v6686_v8 = vld [vmem:[#allocation51_spill] sm:$0xff] }
 0x31b   : > { %v2161_v55 = vmul.f32 %v2024_v52, %v6671_v2  ;;  %v2231_v49 = vadd.f32 %v5660_v14, %v2192_v37  ;;  %6675 = vst [vmem:[#allocation39_spill] sm:$0xff] %v5762_v20  ;;  %v1497_v11 = vmul.f32 %v1368_v61, %v6677_v17  ;;  %v6678_v2 = vld [vmem:[#allocation45_spill] sm:$0xff]  ;;  %v6562_v26 = vrot.slane %v5735_v3, 1  ;;  %v6683_v17 = vld [vmem:[#allocation44_spill] sm:$0xff] }
 0x31c   : > { %6676 = vst [vmem:[#allocation36_spill] sm:$0xff] %v5764_v34  ;;  %v5770_v40 = vadd.f32 %v1191_v62, %v1153_v21  ;;  %v1618_v19 = vadd.f32 %v1586_v16, %v1550_v39  ;;  %v2326_v45 = vsel %vm988_vm3, %v5746_v33, 0.0  ;;  %v1753_v6 = vmul.f32 %v4899_v51, %v5513_v10  ;;  %v6681_v21 = vld [vmem:[#allocation40_spill] sm:$0xff]  ;;  %v6695_v33 = vld [vmem:[#allocation54_spill] sm:$0xff] }
 0x31d   : > { %v2193_v37 = vadd.f32 %v2161_v55, %v1699_v44  ;;  %v2263_v59 = vmax.f32 %v2231_v49, 0.0  ;;  %v1789_v61 = vmul.f32 %v4901_v29, %v5585_v7  ;;  %v5778_v56 = vmin.f32 %v2262_v24, 6.0  ;;  %v6682_v49 = vld [vmem:[#allocation48_spill] sm:$0xff]  ;;  %v5789_v24 = vld [vmem:[#allocation2 + $0xe8] sm:$0xff] }
 0x31e   : > { %v1373_v52 = vpop.permute.xlu1 %1372  ;;  %v2029_v25 = vpop.permute.xlu0 %2028  ;;  %v1084_v62 = vmul.f32 %v4850_v53, %v5585_v7  ;;  %v1122_v39 = vmul.f32 %v4852_v54, %v5669_v42  ;;  %v1701_v16 = vadd.f32 %v6681_v21, %v1497_v11  ;;  %v1654_v4 = vmul.f32 %v4896_v46, %v5722_v48 }
 0x31f   : > { %v2162_v47 = vmul.f32 %v2029_v25, %v6678_v2  ;;  %6680 = vst [vmem:[#allocation41_spill] sm:$0xff] %v5778_v56  ;;  %v2232_v44 = vadd.f32 %v5660_v14, %v2193_v37  ;;  %v2327_v25 = vadd.f32 %v2326_v45, %v2325_v32  ;;  %v1498_v2 = vmul.f32 %v1373_v52, %v6683_v17 }
 0x320   : > { %v5799_v36 = vmin.f32 %v2263_v59, 6.0  ;;  %v2328_v32 = vsel %vm988_vm3, %v5778_v56, 0.0 }
 0x321   : > { %v2194_v55 = vadd.f32 %v2162_v47, %v1700_v63  ;;  %v5796_v47 = vsel %vm1930_vm5, %v1919_v9, %v6562_v26  ;;  %v1821_v63 = vadd.f32 %v1789_v61, %v1753_v6  ;;  %v1192_v9 = vmul.f32 %v4860_v58, %v5789_v24  ;;  %v6685_v26 = vld [vmem:[#allocation47_spill] sm:$0xff]  ;;  %v6688_v61 = vld [vmem:[#allocation42_spill] sm:$0xff] }
 0x322   : > { %v1378_v57 = vpop.permute.xlu1 %1377  ;;  %v2034_v5 = vpop.permute.xlu0 %2033  ;;  %6684 = vst [vmem:[#allocation45_spill] sm:$0xff] %v5799_v36  ;;  %v2264_v17 = vmax.f32 %v2232_v44, 0.0  ;;  %v5810_v6 = vadd.f32 %v1654_v4, %v1618_v19  ;;  %v2330_v44 = vsel %vm988_vm3, %v5799_v36, 0.0 }
 0x323   : > { %v2163_v10 = vmul.f32 %v2034_v5, %v6682_v49  ;;  %v1857_v5 = vmul.f32 %v5675_v1, %v5669_v42  ;;  %v2233_v52 = vadd.f32 %v5660_v14, %v2194_v55  ;;  %v1154_v49 = vadd.f32 %v1122_v39, %v1084_v62 }
 0x324   : > { %v1499_v59 = vmul.f32 %v1378_v57, %v6685_v26  ;;  %6687 = vst [vmem:[#allocation38_spill] sm:$0xff] %v5810_v6  ;;  %v1754_v55 = vmul.f32 %v4899_v51, %v5529_v43  ;;  %v1790_v62 = vmul.f32 %v4901_v29, %v5602_v0  ;;  %v2329_v39 = vadd.f32 %v2328_v32, %v2327_v25 }
 0x325   : > { %v2195_v37 = vadd.f32 %v2163_v10, %v1701_v16  ;;  %v1702_v10 = vadd.f32 %v6688_v61, %v1498_v2  ;;  %v6689_v26 = vrot.slane %v5770_v40, 7  ;;  %v5828_v57 = vadd.f32 %v1857_v5, %v1821_v63  ;;  %v6693_v61 = vld [vmem:[#allocation46_spill] sm:$0xff] }
 0x326   : > { %v1383_v45 = vpop.permute.xlu1 %1382  ;;  %v2039_v21 = vpop.permute.xlu0 %2038  ;;  %v2265_v4 = vmax.f32 %v2233_v52, 0.0  ;;  %v1551_v25 = vmul.f32 %v4880_v22, %v5585_v7  ;;  %v5834_v32 = vmin.f32 %v2264_v17, 6.0  ;;  %v1703_v36 = vadd.f32 %v6693_v61, %v1499_v59 }
 0x327   : > { %v2164_v16 = vmul.f32 %v2039_v21, %v6686_v8  ;;  %v2234_v11 = vadd.f32 %v5660_v14, %v2195_v37  ;;  %v6690_v8 = vrot.slane %v5710_v60, 7  ;;  %v5830_v21 = vadd.f32 %v1192_v9, %v1154_v49  ;;  %v6694_v60 = vld [vmem:[#allocation49_spill] sm:$0xff] }
 0x328   : > { %6692 = vst [vmem:[#allocation48_spill] sm:$0xff] %v5834_v32  ;;  %v1500_v56 = vmul.f32 %v1383_v45, %v6694_v60  ;;  %v1587_v5 = vmul.f32 %v4882_v23, %v5669_v42  ;;  %v1822_v52 = vadd.f32 %v1790_v62, %v1754_v55  ;;  %v1858_v49 = vmul.f32 %v5675_v1, %v5722_v48  ;;  %v6699_v60 = vld [vmem:[#allocation57_spill] sm:$0xff] }
 0x329   : > { %v5826_v19 = vsel %vm1265_vm4, %v6690_v8, %v6689_v26  ;;  %v2196_v2 = vadd.f32 %v2164_v16, %v1702_v10  ;;  %v2331_v8 = vadd.f32 %v2330_v44, %v2329_v39  ;;  %v2266_v63 = vmax.f32 %v2234_v11, 0.0  ;;  %v6697_v39 = vld [vmem:[#allocation50_spill] sm:$0xff] }
 0x32a   : > { %6691 = vst [vmem:[#allocation40_spill] sm:$0xff] %v5826_v19  ;;  %v1388_v43 = vpop.permute.xlu1 %1387  ;;  %v2044_v37 = vpop.permute.xlu0 %2043  ;;  %v1085_v9 = vmul.f32 %v4850_v53, %v5602_v0  ;;  %v1123_v17 = vmul.f32 %v4852_v54, %v5722_v48  ;;  %v5847_v59 = vmin.f32 %v2265_v4, 6.0  ;;  %v1921_v10 = vrot.slane %v5828_v57, 1 }
 0x32b   : > { %v2165_v26 = vmul.f32 %v2044_v37, %v6695_v33  ;;  %v2235_v33 = vadd.f32 %v5660_v14, %v2196_v2  ;;  %v2332_v62 = vsel %vm988_vm3, %v5834_v32, 0.0  ;;  %v1704_v44 = vadd.f32 %v6697_v39, %v1500_v56  ;;  %v6698_v37 = vld [vmem:[#allocation52_spill] sm:$0xff] }
 0x32c   : > { %6696 = vst [vmem:[#allocation44_spill] sm:$0xff] %v5847_v59  ;;  %v1501_v61 = vmul.f32 %v1388_v43, %v6698_v37  ;;  %v1619_v6 = vadd.f32 %v1587_v5, %v1551_v25  ;;  %v1655_v57 = vmul.f32 %v4896_v46, %v5789_v24  ;;  %v5864_v34 = vadd.f32 %v1858_v49, %v1822_v52  ;;  %v6703_v5 = vld [vmem:[#allocation53_spill] sm:$0xff]  ;;  %v6704_v49 = vld [vmem:[#allocation56_spill] sm:$0xff] }
 0x32d   : > { %v2197_v16 = vadd.f32 %v2165_v26, %v1703_v36  ;;  %v5852_v36 = vld [vmem:[#allocation2 + $0xf0] sm:$0xff]  ;;  %v5859_v26 = vmin.f32 %v2266_v63, 6.0  ;;  %v1155_v19 = vadd.f32 %v1123_v17, %v1085_v9  ;;  %v2333_v56 = vadd.f32 %v2332_v62, %v2331_v8  ;;  %v6705_v17 = vld [vmem:[#allocation60_spill] sm:$0xff] }
 0x32e   : > { %v1393_v45 = vpop.permute.xlu1 %1392  ;;  %v2049_v11 = vpop.permute.xlu0 %2048  ;;  %v1193_v32 = vmul.f32 %v4860_v58, %v5852_v36  ;;  %v2334_v43 = vsel %vm988_vm3, %v5847_v59, 0.0  ;;  %v1705_v52 = vadd.f32 %v6703_v5, %v1501_v61  ;;  %v6706_v8 = vrot.slane %v5830_v21, 7 }
 0x32f   : > { %v2166_v4 = vmul.f32 %v2049_v11, %v6699_v60  ;;  %6700 = vst [vmem:[#allocation47_spill] sm:$0xff] %v5859_v26  ;;  %v2236_v2 = vadd.f32 %v5660_v14, %v2197_v16  ;;  %v2267_v11 = vmax.f32 %v2235_v33, 0.0  ;;  %v6701_v16 = vrot.slane %v5735_v3, 1 }
 0x330   : > { %v1502_v9 = vmul.f32 %v1393_v45, %v6704_v49  ;;  %v6707_v62 = vrot.slane %v5770_v40, 7  ;;  %v2336_v3 = vsel %vm988_vm3, %v5859_v26, 0.0  ;;  %v2335_v61 = vadd.f32 %v2334_v43, %v2333_v56  ;;  %v6712_v43 = vld [vmem:[#allocation63_spill] sm:$0xff] }
 0x331   : > { %v2198_v55 = vadd.f32 %v2166_v4, %v1704_v44  ;;  %v5874_v25 = vsel %vm1930_vm5, %v6701_v16, %v1921_v10  ;;  %v2268_v37 = vmax.f32 %v2236_v2, 0.0  ;;  %v5890_v4 = vadd.f32 %v1655_v57, %v1619_v6  ;;  %v6711_v57 = vld [vmem:[#allocation55_spill] sm:$0xff] }
 0x332   : > { %v1398_v63 = vpop.permute.xlu1 %1397  ;;  %v2054_v39 = vpop.permute.xlu0 %2053  ;;  %6702 = vst [vmem:[#allocation51_spill] sm:$0xff] %v5874_v25  ;;  %v5885_v33 = vsel %vm1265_vm4, %v6707_v62, %v6706_v8  ;;  %v5893_v16 = vadd.f32 %v1193_v32, %v1155_v19  ;;  %v5895_v5 = vmin.f32 %v2267_v11, 6.0  ;;  %v1755_v2 = vmul.f32 %v4899_v51, %v5585_v7 }
 0x333   : > { %v2167_v44 = vmul.f32 %v2054_v39, %v6705_v17  ;;  %6708 = vst [vmem:[#allocation42_spill] sm:$0xff] %v5885_v33  ;;  %v2237_v60 = vadd.f32 %v5660_v14, %v2198_v55  ;;  %6709 = vst [vmem:[#allocation46_spill] sm:$0xff] %v5890_v4  ;;  %v6570_v39 = vrot.slane %v5864_v34, 1  ;;  %v1552_v17 = vmul.f32 %v4880_v22, %v5602_v0 }
 0x334   : > { %6710 = vst [vmem:[#allocation49_spill] sm:$0xff] %v5895_v5  ;;  %v1791_v6 = vmul.f32 %v4901_v29, %v5669_v42  ;;  %v2337_v55 = vadd.f32 %v2336_v3, %v2335_v61  ;;  %v1706_v56 = vadd.f32 %v6711_v57, %v1502_v9  ;;  %v1588_v19 = vmul.f32 %v4882_v23, %v5722_v48 }
 0x335   : > { %v2199_v45 = vadd.f32 %v2167_v44, %v1705_v52  ;;  %v5907_v32 = vmin.f32 %v2268_v37, 6.0  ;;  %v2269_v11 = vmax.f32 %v2237_v60, 0.0  ;;  %v1086_v44 = vmul.f32 %v4850_v53, %v5669_v42  ;;  %v6715_v60 = vld [vmem:[#allocation59_spill] sm:$0xff] }
 0x336   : > { %v1403_v40 = vpop.permute.xlu1 %1402  ;;  %v2059_v49 = vpop.permute.xlu0 %2058  ;;  %v1124_v7 = vmul.f32 %v4852_v54, %v5789_v24  ;;  %v5918_v9 = vsel %vm1930_vm5, %v1921_v10, %v6570_v39  ;;  %v2338_v37 = vsel %vm988_vm3, %v5895_v5, 0.0  ;;  %v1503_v61 = vmul.f32 %v1398_v63, %v6715_v60  ;;  %v5928_v10 = vld [vmem:[#allocation2 + $0xf8] sm:$0xff]  ;;  %v6718_v60 = vld [vmem:[#allocation66_spill] sm:$0xff] }
 0x337   : > { %v2168_v52 = vmul.f32 %v2059_v49, %v6712_v43  ;;  %6713 = vst [vmem:[#allocation54_spill] sm:$0xff] %v5907_v32  ;;  %v2238_v8 = vadd.f32 %v5660_v14, %v2199_v45  ;;  %6714 = vst [vmem:[#allocation50_spill] sm:$0xff] %v5918_v9  ;;  %v1823_v43 = vadd.f32 %v1791_v6, %v1755_v2  ;;  %v2340_v3 = vsel %vm988_vm3, %v5907_v32, 0.0  ;;  %v6725_v32 = vld [vmem:[#allocation65_spill] sm:$0xff] }
 0x338   : > { %v1859_v45 = vmul.f32 %v5675_v1, %v5789_v24  ;;  %v1620_v59 = vadd.f32 %v1588_v19, %v1552_v17  ;;  %v1194_v39 = vmul.f32 %v5928_v10, %v4860_v58  ;;  %v5934_v63 = vmin.f32 %v2269_v11, 6.0  ;;  %v6719_v19 = vld [vmem:[#allocation58_spill] sm:$0xff] }
 0x339   : > { %v2200_v62 = vadd.f32 %v2168_v52, %v1706_v56  ;;  %v6716_v56 = vld [vmem:[#allocation61_spill] sm:$0xff]  ;;  %v1156_v6 = vadd.f32 %v1124_v7, %v1086_v44  ;;  %v2339_v5 = vadd.f32 %v2338_v37, %v2337_v55  ;;  %v2270_v4 = vmax.f32 %v2238_v8, 0.0  ;;  %v6723_v7 = vld [vmem:[#allocation62_spill] sm:$0xff] }
 0x33a   : > { %v1408_v49 = vpop.permute.xlu1 %1407  ;;  %v2064_v57 = vpop.permute.xlu0 %2063  ;;  %v1504_v52 = vmul.f32 %v1403_v40, %v6716_v56  ;;  %6717 = vst [vmem:[#allocation52_spill] sm:$0xff] %v5934_v63  ;;  %v1756_v40 = vmul.f32 %v4899_v51, %v5602_v0  ;;  %v1792_v17 = vmul.f32 %v4901_v29, %v5722_v48  ;;  %v6720_v9 = vrot.slane %v5893_v16, 7 }
 0x33b   : > { %v2239_v26 = vadd.f32 %v5660_v14, %v2200_v62  ;;  %v2169_v2 = vmul.f32 %v2064_v57, %v6718_v60  ;;  %v1707_v62 = vadd.f32 %v6719_v19, %v1503_v61  ;;  %v6721_v11 = vrot.slane %v5830_v21, 7  ;;  %v6724_v61 = vld [vmem:[#allocation70_spill] sm:$0xff] }
 0x33c   : > { %v1656_v55 = vmul.f32 %v4896_v46, %v5852_v36  ;;  %v5952_v44 = vadd.f32 %v1859_v45, %v1823_v43  ;;  %v2341_v0 = vadd.f32 %v2340_v3, %v2339_v5  ;;  %v1708_v8 = vadd.f32 %v6723_v7, %v1504_v52  ;;  %v6728_v52 = vld [vmem:[#allocation72_spill] sm:$0xff] }
 0x33d   : > { %v5948_v57 = vsel %vm1265_vm4, %v6721_v11, %v6720_v9  ;;  %v2271_v37 = vmax.f32 %v2239_v26, 0.0  ;;  %v2342_v19 = vsel %vm988_vm3, %v5934_v63, 0.0  ;;  %v1505_v21 = vmul.f32 %v1408_v49, %v6725_v32  ;;  %v6727_v49 = vld [vmem:[#allocation68_spill] sm:$0xff] }
 0x33e   : > { %v1413_v56 = vpop.permute.xlu1 %1412  ;;  %v2069_v33 = vpop.permute.xlu0 %2068  ;;  %6722 = vst [vmem:[#allocation57_spill] sm:$0xff] %v5948_v57  ;;  %v2201_v25 = vadd.f32 %v2169_v2, %v1707_v62  ;;  %v5959_v20 = vadd.f32 %v1194_v39, %v1156_v6  ;;  %v5961_v9 = vmin.f32 %v2270_v4, 6.0  ;;  %v1824_v57 = vadd.f32 %v1792_v17, %v1756_v40  ;;  %v5978_v40 = vld [vmem:[#allocation2 + $0x100] sm:$0xff] }
 0x33f   : > { %v2170_v60 = vmul.f32 %v2069_v33, %v6724_v61  ;;  %v1860_v5 = vmul.f32 %v5675_v1, %v5852_v36  ;;  %v1553_v26 = vmul.f32 %v4880_v22, %v5669_v42  ;;  %v1589_v33 = vmul.f32 %v4882_v23, %v5789_v24  ;;  %v6729_v62 = vld [vmem:[#allocation64_spill] sm:$0xff] }
 0x340   : > { %6726 = vst [vmem:[#allocation53_spill] sm:$0xff] %v5961_v9  ;;  %v1087_v32 = vmul.f32 %v4850_v53, %v5722_v48  ;;  %v1125_v4 = vmul.f32 %v4852_v54, %v5852_v36  ;;  %v5973_v39 = vmin.f32 %v2271_v37, 6.0  ;;  %v1506_v45 = vmul.f32 %v1413_v56, %v6727_v49 }
 0x341   : > { %v2202_v11 = vadd.f32 %v2170_v60, %v1708_v8  ;;  %v1923_v6 = vrot.slane %v5952_v44, 1  ;;  %v2343_v17 = vadd.f32 %v2342_v19, %v2341_v0  ;;  %v1709_v7 = vadd.f32 %v6729_v62, %v1505_v21  ;;  %v6730_v62 = vld [vmem:[#allocation67_spill] sm:$0xff] }
 0x342   : > { %v1418_v3 = vpop.permute.xlu1 %1417  ;;  %v2074_v43 = vpop.permute.xlu0 %2073  ;;  %v2240_v8 = vadd.f32 %v5660_v14, %v2201_v25  ;;  %v1657_v61 = vmul.f32 %v5928_v10, %v4896_v46  ;;  %v2344_v37 = vsel %vm988_vm3, %v5961_v9, 0.0  ;;  %v1621_v0 = vadd.f32 %v1589_v33, %v1553_v26  ;;  %v6731_v9 = vld [vmem:[#allocation71_spill] sm:$0xff] }
 0x343   : > { %v2171_v2 = vmul.f32 %v2074_v43, %v6728_v52  ;;  %v2241_v60 = vadd.f32 %v5660_v14, %v2202_v11  ;;  %v5988_v43 = vadd.f32 %v1860_v5, %v1824_v57  ;;  %v1157_v19 = vadd.f32 %v1125_v4, %v1087_v32 }
 0x344   : > { %v1195_v25 = vmul.f32 %v4860_v58, %v5978_v40  ;;  %v2346_v21 = vsel %vm988_vm3, %v5973_v39, 0.0  ;;  %v1710_v63 = vadd.f32 %v6730_v62, %v1506_v45  ;;  %v1507_v35 = vmul.f32 %v1418_v3, %v6731_v9 }
 0x345   : > { %v2203_v44 = vadd.f32 %v2171_v2, %v1709_v7  ;;  %v2345_v56 = vadd.f32 %v2344_v37, %v2343_v17  ;;  %v2272_v57 = vmax.f32 %v2240_v8, 0.0  ;;  %v5997_v5 = vadd.f32 %v1656_v55, %v1620_v59  ;;  %v6735_v7 = vld [vmem:[#allocation69_spill] sm:$0xff] }
 0x346   : > { %v1423_v49 = vpop.permute.xlu1 %1422  ;;  %v2079_v52 = vpop.permute.xlu0 %2078  ;;  %v6732_v2 = vrot.slane %v5864_v34, 1  ;;  %v2273_v33 = vmax.f32 %v2241_v60, 0.0  ;;  %v6733_v4 = vrot.slane %v5959_v20, 7  ;;  %v6734_v45 = vrot.slane %v5893_v16, 7  ;;  %v6736_v37 = vld [vmem:[#allocation73_spill] sm:$0xff] }
 0x347   : > { %v2172_v11 = vmul.f32 %v2079_v52, %v5619_v18  ;;  %v6575_v18 = vrot.slane %v5988_v43, 1  ;;  %v2347_v59 = vadd.f32 %v2346_v21, %v2345_v56  ;;  %v2242_v55 = vadd.f32 %v5660_v14, %v2203_v44 }
 0x348   : > { %v6003_v26 = vsel %vm1930_vm5, %v6732_v2, %v1923_v6  ;;  %v6011_v9 = vsel %vm1265_vm4, %v6734_v45, %v6733_v4  ;;  %v6015_v17 = vadd.f32 %v1657_v61, %v1621_v0  ;;  %v1711_v8 = vadd.f32 %v6735_v7, %v1507_v35  ;;  %v6737_v2 = vld [vmem:[#allocation74_spill] sm:$0xff] }
 0x349   : > { %v2204_v32 = vadd.f32 %v2172_v11, %v1710_v63  ;;  %v1554_v63 = vmul.f32 %v4880_v22, %v5722_v48  ;;  %v1508_v16 = vmul.f32 %v1423_v49, %v6736_v37  ;;  %v6022_v52 = vadd.f32 %v1195_v25, %v1157_v19 }
 0x34a   : > { %v1428_v34 = vpop.permute.xlu1 %1427  ;;  %v2084_v3 = vpop.permute.xlu0 %2083  ;;  %v6024_v62 = vmin.f32 %v2272_v57, 6.0  ;;  %v1590_v56 = vmul.f32 %v4882_v23, %v5852_v36  ;;  %v1757_v61 = vmul.f32 %v4899_v51, %v5669_v42  ;;  %v1793_v44 = vmul.f32 %v4901_v29, %v5789_v24 }
 0x34b   : > { %v2173_v60 = vmul.f32 %v2084_v3, %v5627_v27  ;;  %v6032_v0 = vmin.f32 %v2273_v33, 6.0  ;;  %v2243_v35 = vadd.f32 %v5660_v14, %v2204_v32  ;;  %v6039_v27 = vsel %vm1930_vm5, %v1923_v6, %v6575_v18 }
 0x34c   : > { %v2274_v19 = vmax.f32 %v2242_v55, 0.0  ;;  %v1509_v25 = vmul.f32 %v1428_v34, %v5623_v30  ;;  %v1088_v42 = vmul.f32 %v4850_v53, %v5789_v24  ;;  %v1126_v57 = vmul.f32 %v5928_v10, %v4852_v54 }
 0x34d   : > { %v2205_v49 = vadd.f32 %v2173_v60, %v1711_v8  ;;  %v1712_v33 = vadd.f32 %v6737_v2, %v1508_v16  ;;  %v6576_v6 = vrot.slane %v6022_v52, 7  ;;  %v1622_v45 = vadd.f32 %v1590_v56, %v1554_v63 }
 0x34e   : > { %v1433_v21 = vpop.permute.xlu1 %1432  ;;  %v2089_v11 = vpop.permute.xlu0 %2088  ;;  %v1658_v30 = vmul.f32 %v4896_v46, %v5978_v40  ;;  %v1825_v55 = vadd.f32 %v1793_v44, %v1757_v61  ;;  %v1861_v34 = vmul.f32 %v5928_v10, %v5675_v1  ;;  %v2348_v3 = vsel %vm988_vm3, %v6024_v62, 0.0 }
 0x34f   : > { %v2244_v32 = vadd.f32 %v5660_v14, %v2205_v49  ;;  %v2174_v4 = vmul.f32 %v2089_v11, %v5665_v41  ;;  %v2350_v7 = vsel %vm988_vm3, %v6032_v0, 0.0  ;;  %v2275_v8 = vmax.f32 %v2243_v35, 0.0  ;;  %v6738_v41 = vld [vmem:[#allocation75_spill] sm:$0xff]  ;;  %v6061_v11 = vld [vmem:[#allocation2 + $0x108] sm:$0xff] }
 0x350   : > { %v6058_v16 = vmin.f32 %v2274_v19, 6.0  ;;  %v1713_v60 = vadd.f32 %v6738_v41, %v1509_v25  ;;  %v1158_v49 = vadd.f32 %v1126_v57, %v1088_v42  ;;  %v1196_v61 = vmul.f32 %v6061_v11, %v4860_v58 }
 0x351   : > { %v2206_v37 = vadd.f32 %v2174_v4, %v1712_v33  ;;  %v2276_v44 = vmax.f32 %v2244_v32, 0.0  ;;  %v1758_v18 = vmul.f32 %v4899_v51, %v5722_v48  ;;  %v1794_v35 = vmul.f32 %v4901_v29, %v5852_v36 }
 0x352   : > { %v1438_v63 = vpop.permute.xlu1 %1437  ;;  %v2094_v56 = vpop.permute.xlu0 %2093  ;;  %v2349_v19 = vadd.f32 %v2348_v3, %v2347_v59  ;;  %v6739_v42 = vrot.slane %v5959_v20, 7  ;;  %v6079_v33 = vadd.f32 %v1861_v34, %v1825_v55  ;;  %v1089_v48 = vmul.f32 %v4850_v53, %v5852_v36  ;;  %v6092_v55 = vld [vmem:[#allocation2 + $0x110] sm:$0xff] }
 0x353   : > { %v2175_v2 = vmul.f32 %v2094_v56, %v5695_v12  ;;  %v2245_v25 = vadd.f32 %v5660_v14, %v2206_v37  ;;  %v6081_v12 = vmin.f32 %v2275_v8, 6.0  ;;  %v1127_v59 = vmul.f32 %v4852_v54, %v5978_v40 }
 0x354   : > { %v6077_v57 = vsel %vm1265_vm4, %v6739_v42, %v6576_v6  ;;  %v2351_v4 = vadd.f32 %v2350_v7, %v2349_v19  ;;  %v2352_v3 = vsel %vm988_vm3, %v6058_v16, 0.0  ;;  %v1510_v20 = vmul.f32 %v1433_v21, %v5634_v38 }
 0x355   : > { %6740 = vst [vmem:[#allocation56_spill] sm:$0xff] %v6081_v12  ;;  %v2207_v32 = vadd.f32 %v2175_v2, %v1713_v60  ;;  %v6090_v56 = vadd.f32 %v1196_v61, %v1158_v49  ;;  %v6094_v34 = vmin.f32 %v2276_v44, 6.0  ;;  %v1826_v53 = vadd.f32 %v1794_v35, %v1758_v18 }
 0x356   : > { %v1443_v37 = vpop.permute.xlu1 %1442  ;;  %v2099_v41 = vpop.permute.xlu0 %2098  ;;  %v1862_v54 = vmul.f32 %v5675_v1, %v5978_v40  ;;  %v2277_v7 = vmax.f32 %v2245_v25, 0.0  ;;  %v1925_v60 = vrot.slane %v6079_v33, 1  ;;  %v1555_v38 = vmul.f32 %v4880_v22, %v5789_v24 }
 0x357   : > { %v2246_v8 = vadd.f32 %v5660_v14, %v2207_v32  ;;  %v1591_v21 = vmul.f32 %v5928_v10, %v4882_v23  ;;  %v2354_v49 = vsel %vm988_vm3, %v6081_v12, 0.0  ;;  %v2176_v61 = vmul.f32 %v2099_v41, %v5752_v28 }
 0x358   : > { %v1159_v44 = vadd.f32 %v1127_v59, %v1089_v48  ;;  %v1197_v18 = vmul.f32 %v4860_v58, %v6092_v55  ;;  %v2353_v2 = vadd.f32 %v2352_v3, %v2351_v4  ;;  %v1511_v35 = vmul.f32 %v1438_v63, %v5682_v31 }
 0x359   : > { %v6110_v42 = vadd.f32 %v1658_v30, %v1622_v45  ;;  %v1260_v33 = vrot.slane %v6090_v56, 7  ;;  %v2356_v32 = vsel %vm988_vm3, %v6094_v34, 0.0  ;;  %v1714_v6 = vadd.f32 %v5629_v15, %v1510_v20 }
 0x35a   : > { %v1448_v19 = vpop.permute.xlu1 %1447  ;;  %v2104_v25 = vpop.permute.xlu0 %2103  ;;  %v2278_v12 = vmax.f32 %v2246_v8, 0.0  ;;  %v6116_v28 = vadd.f32 %v1862_v54, %v1826_v53  ;;  %v2355_v48 = vadd.f32 %v2354_v49, %v2353_v2  ;;  %v6118_v59 = vmin.f32 %v2277_v7, 6.0 }
 0x35b   : > { %v6741_v58 = vrot.slane %v5988_v43, 1  ;;  %v1623_v45 = vadd.f32 %v1591_v21, %v1555_v38  ;;  %v2208_v30 = vadd.f32 %v2176_v61, %v1714_v6  ;;  %v1229_v63 = vadd.f32 %v1197_v18, %v1159_v44  ;;  %v6742_v6 = vld [vmem:[#allocation76_spill] sm:$0xff]  ;;  %v6744_v44 = vld [vmem:[#allocation51_spill] sm:$0xff] }
 0x35c   : > { %v1556_v4 = vmul.f32 %v4880_v22, %v5852_v36  ;;  %v1592_v15 = vmul.f32 %v4882_v23, %v5978_v40  ;;  %v2357_v3 = vadd.f32 %v2356_v32, %v2355_v48  ;;  %v1715_v20 = vadd.f32 %v5640_v13, %v1511_v35  ;;  %v6743_v13 = vld [vmem:[#allocation39_spill] sm:$0xff] }
 0x35d   : > { %v6124_v31 = vsel %vm1930_vm5, %v6741_v58, %v1925_v60  ;;  %v2177_v41 = vmul.f32 %v2104_v25, %v5796_v47  ;;  %v1659_v8 = vmul.f32 %v6061_v11, %v4896_v46  ;;  %v6134_v53 = vmin.f32 %v2278_v12, 6.0  ;;  %v6745_v25 = vld [vmem:[#allocation40_spill] sm:$0xff] }
 0x35e   : > { %v1453_v56 = vpop.permute.xlu1 %1452  ;;  %v2109_v43 = vpop.permute.xlu0 %2108  ;;  %v1512_v54 = vmul.f32 %v1443_v37, %v6742_v6  ;;  %v1926_v7 = vrot.slane %v6116_v28, 1  ;;  %v1660_v38 = vmul.f32 %v4896_v46, %v6092_v55  ;;  %v2358_v21 = vsel %vm988_vm3, %v6118_v59, 0.0 }
 0x35f   : > { %v1513_v49 = vmul.f32 %v1448_v19, %v6743_v13  ;;  %v1759_v47 = vmul.f32 %v4899_v51, %v5789_v24  ;;  %v1795_v61 = vmul.f32 %v5928_v10, %v4901_v29  ;;  %v2247_v12 = vadd.f32 %v5660_v14, %v2208_v30 }
 0x360   : > { %v2178_v37 = vmul.f32 %v2109_v43, %v6744_v44  ;;  %v1261_v18 = vrot.slane %v1229_v63, 7  ;;  %v1624_v2 = vadd.f32 %v1592_v15, %v1556_v4  ;;  %v2209_v35 = vadd.f32 %v2177_v41, %v1715_v20  ;;  %v6747_v43 = vld [vmem:[#allocation77_spill] sm:$0xff]  ;;  %v6748_v4 = vld [vmem:[#allocation50_spill] sm:$0xff]  ;;  %v6749_v20 = vld [vmem:[#allocation36_spill] sm:$0xff] }
 0x361   : > { %v1514_v32 = vmul.f32 %v1453_v56, %v6745_v25  ;;  %v6746_v6 = vrot.slane %v6022_v52, 7  ;;  %v6156_v24 = vadd.f32 %v1659_v8, %v1623_v45  ;;  %v2359_v13 = vadd.f32 %v2358_v21, %v2357_v3  ;;  %v6750_v25 = vld [vmem:[#allocation38_spill] sm:$0xff] }
 0x362   : > { %v1458_v48 = vpop.permute.xlu1 %1457  ;;  %v2114_v58 = vpop.permute.xlu0 %2113  ;;  %v2360_v30 = vsel %vm988_vm3, %v6134_v53, 0.0  ;;  %v1716_v63 = vadd.f32 %v6747_v43, %v1512_v54  ;;  %v1717_v41 = vadd.f32 %v6749_v20, %v1513_v49  ;;  %v6167_v52 = vsel %vm1930_vm5, %v1925_v60, %v1926_v7  ;;  %v2396_v20 = vld [vmem:[#allocation14 + $0x18] sm:$0xff] }
 0x363   : > { %v6154_v19 = vsel %vm1265_vm4, %v6746_v6, %v1260_v33  ;;  %v2179_v15 = vmul.f32 %v2114_v58, %v6748_v4  ;;  %v1827_v56 = vadd.f32 %v1795_v61, %v1759_v47  ;;  %v1863_v45 = vmul.f32 %v6061_v11, %v5675_v1  ;;  %v6751_v61 = vld [vmem:[#allocation42_spill] sm:$0xff] }
 0x364   : > { %v2279_v3 = vmax.f32 %v2247_v12, 0.0  ;;  %v2210_v8 = vadd.f32 %v2178_v37, %v1716_v63  ;;  %v6173_v21 = vsel %vm1265_vm4, %v1260_v33, %v1261_v18  ;;  %v6175_v54 = vadd.f32 %v1660_v38, %v1624_v2  ;;  %v2393_v38 = vld [vmem:[#allocation14] sm:$0xff]  ;;  %v2394_v2 = vld [vmem:[#allocation14 + $0x8] sm:$0xff] }
 0x365   : > { %v6177_v44 = vadd.f32 %v2360_v30, %v2359_v13  ;;  %v2248_v49 = vadd.f32 %v5660_v14, %v2209_v35  ;;  %v1718_v58 = vadd.f32 %v6750_v25, %v1514_v32  ;;  %v2211_v60 = vadd.f32 %v2179_v15, %v1717_v41  ;;  %v6752_v35 = vld [vmem:[#allocation34_spill] sm:$0xff] }
 0x366   : > { %v1463_v6 = vpop.permute.xlu1 %1462  ;;  %v2119_v47 = vpop.permute.xlu0 %2118  ;;  %v1515_v43 = vmul.f32 %v1458_v48, %v6751_v61  ;;  %v1760_v37 = vmul.f32 %v4899_v51, %v5852_v36  ;;  %v1796_v33 = vmul.f32 %v4901_v29, %v5978_v40  ;;  %v6187_v13 = vadd.f32 %v1863_v45, %v1827_v56  ;;  %v2395_v15 = vld [vmem:[#allocation14 + $0x10] sm:$0xff] }
 0x367   : > { %v2180_v12 = vmul.f32 %v2119_v47, %v6003_v26  ;;  %v6753_v30 = vrot.slane %v6752_v35, 7  ;;  %v6197_v48 = vmul.f32 %v5928_v10, %v4880_v22  ;;  %v6199_v26 = vmin.f32 %v2279_v3, 6.0 }
 0x368   : > { %v2249_v36 = vadd.f32 %v5660_v14, %v2210_v8  ;;  %v6204_v40 = vmul.f32 %v6061_v11, %v4882_v23  ;;  %v4192_v4 = vmov 0.0|0.0   ;;  %v2250_v22 = vadd.f32 %v5660_v14, %v2211_v60  ;;  %v6754_v8 = vld [vmem:[#allocation46_spill] sm:$0xff]  ;;  %v6755_v23 = vld [vmem:[#allocation57_spill] sm:$0xff] }
 0x369   : > { %v6193_v32 = vsel %vm1265_vm4, %v1261_v18, %v6753_v30  ;;  %v2212_v63 = vadd.f32 %v2180_v12, %v1718_v58  ;;  %3516 = vmatprep.subr.bf16.mxu1 %v4192_v4  ;;  %3522 = vmatprep.subr.bf16.mxu0 %v4192_v4  ;;  %v2280_v18 = vmax.f32 %v2248_v49, 0.0  ;;  %v1864_v45 = vmul.f32 %v5675_v1, %v6092_v55 }
 0x36a   : > { %v1468_v41 = vpop.permute.xlu1 %1467  ;;  %v2124_v56 = vpop.permute.xlu0 %2123  ;;  %v3517_v3 = vpack.c.bf16 %v2394_v2, %v2393_v38  ;;  %v1719_v25 = vadd.f32 %v6754_v8, %v1515_v43  ;;  %v1516_v58 = vmul.f32 %v1463_v6, %v6755_v23  ;;  %v1828_v61 = vadd.f32 %v1796_v33, %v1760_v37  ;;  %v3742_v38 = vld [vmem:[#allocation2 + $0x118] sm:$0xff]  ;;  %v2473_v6 = vld [vmem:[#allocation17 + $0x8] sm:$0xff] }
 0x36b   : > { %v2181_v47 = vmul.f32 %v2124_v56, %v6039_v27  ;;  %v1761_v12 = vmul.f32 %v5928_v10, %v4899_v51  ;;  %v1797_v49 = vmul.f32 %v6061_v11, %v4901_v29  ;;  %v3520_v60 = vpack.c.bf16 %v2396_v20, %v2395_v15  ;;  %v2472_v27 = vld [vmem:[#allocation17] sm:$0xff]  ;;  %v2474_v15 = vld [vmem:[#allocation17 + $0x10] sm:$0xff]  ;;  %v2475_v20 = vld [vmem:[#allocation17 + $0x18] sm:$0xff] }
 0x36c   : > { %3518 = vmatpush3.bf16.msra.mxu1 %v3517_v3  ;;  %v2281_v35 = vmax.f32 %v2249_v36, 0.0  ;;  %v2251_v30 = vadd.f32 %v5660_v14, %v2212_v63  ;;  %v6220_v43 = vmul.f32 %v3742_v38, %v4896_v46  ;;  %v2362_v51 = vsel %vm988_vm3, %v6199_v26, 0.0 }
 0x36d   : > { %v2213_v55 = vadd.f32 %v2181_v47, %v1719_v25  ;;  %3519 = vmatprep.subr.bf16.mxu1 %v4192_v4  ;;  %v6225_v10 = vmin.f32 %v2280_v18, 6.0  ;;  %v2282_v29 = vmax.f32 %v2250_v22, 0.0  ;;  %v1720_v33 = vadd.f32 %v5997_v5, %v1516_v58 }
 0x36e   : > { %v1473_v11 = vpop.permute.xlu1 %1472  ;;  %v2129_v37 = vpop.permute.xlu0 %2128  ;;  %v1517_v2 = vmul.f32 %v1468_v41, %v6011_v9  ;;  %v1927_v46 = vrot.slane %v6187_v13, 1  ;;  %v4194_v63 = vmov 0.0   ;;  %v6231_v56 = vadd.f32 %v1864_v45, %v1828_v61 }
 0x36f   : > { %v2182_v36 = vmul.f32 %v2129_v37, %v6124_v31  ;;  %3442 = vmatprep.mubr.msk.f32.mxu1 %vm4193_vm6, %v4194_v63  ;;  %3477 = vmatprep.mubr.msk.f32.mxu0 %vm4193_vm6, %v4194_v63  ;;  %v1829_v18 = vadd.f32 %v1797_v49, %v1761_v12  ;;  %v1865_v22 = vmul.f32 %v3742_v38, %v5675_v1  ;;  %v6234_v5 = vmin.f32 %v2281_v35, 6.0  ;;  %v2477_v49 = vld [vmem:[#allocation17 + $0x28] sm:$0xff] }
 0x370   : > { %3521 = vmatpush3.bf16.msra.mxu1 %v3520_v60  ;;  %v3523_v3 = vpack.c.bf16 %v2473_v6, %v2472_v27  ;;  %v2283_v9 = vmax.f32 %v2251_v30, 0.0  ;;  %v2252_v31 = vadd.f32 %v5660_v14, %v2213_v55  ;;  %v2363_v13 = vadd.f32 %v2362_v51, %v6177_v44  ;;  %v2476_v44 = vld [vmem:[#allocation17 + $0x20] sm:$0xff] }
 0x371   : > { %v2214_v41 = vadd.f32 %v2182_v36, %v1720_v33  ;;  %v2364_v8 = vsel %vm988_vm3, %v6225_v10, 0.0  ;;  %v6240_v25 = vmin.f32 %v2282_v29, 6.0  ;;  %v3526_v58 = vpack.c.bf16 %v2475_v20, %v2474_v15  ;;  %v2478_v33 = vld [vmem:[#allocation17 + $0x30] sm:$0xff] }
 0x372   : > { %v1478_v45 = vpop.permute.xlu1 %1477  ;;  %v2134_v23 = vpop.permute.xlu0 %2133  ;;  %3524 = vmatpush3.bf16.msra.mxu0 %v3523_v3  ;;  %v1721_v1 = vadd.f32 %v6015_v17, %v1517_v2  ;;  %v1518_v47 = vmul.f32 %v1473_v11, %v6077_v57  ;;  %v1933_v60 = vsel %vm1930_vm5, %v1926_v7, %v1927_v46  ;;  %v1625_v35 = vadd.f32 %v6204_v40, %v6197_v48  ;;  %v2479_v2 = vld [vmem:[#allocation17 + $0x38] sm:$0xff] }
 0x373   : > { %v2253_v61 = vadd.f32 %v5660_v14, %v2214_v41  ;;  %v2183_v12 = vmul.f32 %v2134_v23, %v6167_v52  ;;  %3525 = vmatprep.subr.bf16.mxu0 %v4192_v4  ;;  %v1928_v17 = vrot.slane %v6231_v56, 1  ;;  %v1897_v30 = vadd.f32 %v1865_v22, %v1829_v18  ;;  %v2480_v23 = vld [vmem:[#allocation17 + $0x40] sm:$0xff] }
 0x374   : > { %v2366_v57 = vsel %vm988_vm3, %v6234_v5, 0.0  ;;  %v6256_v55 = vmin.f32 %v2283_v9, 6.0  ;;  %v2284_v52 = vmax.f32 %v2252_v31, 0.0  ;;  %v2365_v27 = vadd.f32 %v2364_v8, %v2363_v13 }
 0x375   : > { %v2215_v38 = vadd.f32 %v2183_v12, %v1721_v1  ;;  %v2368_v28 = vsel %vm988_vm3, %v6240_v25, 0.0  ;;  %v2285_v6 = vmax.f32 %v2253_v61, 0.0  ;;  %v3529_v29 = vpack.c.bf16 %v2477_v49, %v2476_v44 }
 0x376   : > { %v1483_v51 = vpop.permute.xlu1 %1482  ;;  %v2139_v7 = vpop.permute.xlu0 %2138  ;;  %3527 = vmatpush3.bf16.msra.mxu0 %v3526_v58  ;;  %v1722_v48 = vadd.f32 %v6110_v42, %v1518_v47  ;;  %v1519_v40 = vmul.f32 %v1478_v45, %v6154_v19  ;;  %v2367_v36 = vadd.f32 %v2366_v57, %v2365_v27  ;;  %v1693_v63 = vadd.f32 %v6220_v43, %v1625_v35  ;;  %v2481_v58 = vld [vmem:[#allocation17 + $0x48] sm:$0xff]  ;;  %v6756_v47 = vld [vmem:[#allocation35_spill] sm:$0xff] }
 0x377   : > { %v2254_v11 = vadd.f32 %v5660_v14, %v2215_v38  ;;  %v2184_v37 = vmul.f32 %v2139_v7, %v1933_v60  ;;  %3528 = vmatprep.subr.bf16.mxu0 %v4192_v4  ;;  %v1932_v15 = vsel %vm1930_vm5, %v1927_v46, %v1928_v17  ;;  %v1929_v20 = vrot.slane %v1897_v30, 1  ;;  %v3743_v46 = vld [vmem:[#allocation12] ss:$0 sm:$0xff] }
 0x378   : > { %v2370_v56 = vsel %vm988_vm3, %v6256_v55, 0.0  ;;  %v6269_v42 = vmin.f32 %v2284_v52, 6.0  ;;  %v2369_v14 = vadd.f32 %v2368_v28, %v2367_v36  ;;  %v6271_v22 = vmin.f32 %v2285_v6, 6.0  ;;  %v2483_v7 = vld [vmem:[#allocation17 + $0x58] sm:$0xff] }
 0x379   : > { %v2286_v19 = vmax.f32 %v2254_v11, 0.0  ;;  %v2216_v18 = vadd.f32 %v2184_v37, %v1722_v48  ;;  %v1520_v3 = vmul.f32 %v1483_v51, %v6173_v21  ;;  %v3532_v43 = vpack.c.bf16 %v2479_v2, %v2478_v33  ;;  %v2482_v51 = vld [vmem:[#allocation17 + $0x50] sm:$0xff] }
 0x37a   : > { %v1488_v9 = vpop.permute.xlu1 %1487  ;;  %v2144_v31 = vpop.permute.xlu0 %2143  ;;  %3530 = vmatpush3.bf16.msra.mxu0 %v3529_v29  ;;  %v1723_v41 = vadd.f32 %v6156_v24, %v1519_v40  ;;  %v2371_v1 = vadd.f32 %v2370_v56, %v2369_v14  ;;  %v6757_v61 = vrot.slane %v6756_v47, 1  ;;  %v1931_v12 = vsel %vm1930_vm5, %v1928_v17, %v1929_v20  ;;  %v2485_v56 = vld [vmem:[#allocation17 + $0x68] sm:$0xff] }
 0x37b   : > { %v2255_v13 = vadd.f32 %v3743_v46, %v2216_v18  ;;  %v1521_v8 = vmul.f32 %v1488_v9, %v6193_v32  ;;  %v2185_v45 = vmul.f32 %v2144_v31, %v1932_v15  ;;  %3531 = vmatprep.subr.bf16.mxu0 %v4192_v4  ;;  %v2372_v24 = vsel %vm988_vm3, %v6269_v42, 0.0 }
 0x37c   : > { %v1962_v21 = vsel %vm1930_vm5, %v1929_v20, %v6757_v61  ;;  %v6285_v44 = vmin.f32 %v2286_v19, 6.0  ;;  %v2374_v60 = vsel %vm988_vm3, %v6271_v22, 0.0  ;;  %v1724_v35 = vadd.f32 %v6175_v54, %v1520_v3  ;;  %v2484_v20 = vld [vmem:[#allocation17 + $0x60] sm:$0xff] }
 0x37d   : > { %v2287_v32 = vmax.f32 %v2255_v13, 0.0  ;;  %v2217_v49 = vadd.f32 %v2185_v45, %v1723_v41  ;;  %v1725_v30 = vadd.f32 %v1693_v63, %v1521_v8  ;;  %v3535_v38 = vpack.c.bf16 %v2481_v58, %v2480_v23 }
 0x37e   : > { %v2154_v57 = vpop.permute.xlu1 %2153  ;;  %v2149_v52 = vpop.permute.xlu0 %2148  ;;  %3533 = vmatpush3.bf16.msra.mxu0 %v3532_v43  ;;  %v2373_v29 = vadd.f32 %v2372_v24, %v2371_v1  ;;  %v2376_v48 = vsel %vm988_vm3, %v6285_v44, 0.0  ;;  %v3538_v33 = vpack.c.bf16 %v2483_v7, %v2482_v51  ;;  %v3541_v31 = vpack.c.bf16 %v2485_v56, %v2484_v20  ;;  %v6761_v20 = vld [vmem:[#allocation43_spill] sm:$0xff] }
 0x37f   : > { %v6290_v27 = vmin.f32 %v2287_v32, 6.0  ;;  %v2256_v17 = vadd.f32 %v3743_v46, %v2217_v49  ;;  %v2187_v28 = vmul.f32 %v2154_v57, %v1962_v21  ;;  %v2186_v6 = vmul.f32 %v2149_v52, %v1931_v12  ;;  %3534 = vmatprep.subr.bf16.mxu0 %v4192_v4  ;;  %v2486_v32 = vld [vmem:[#allocation17 + $0x70] sm:$0xff]  ;;  %v2487_v49 = vld [vmem:[#allocation17 + $0x78] sm:$0xff] }
 0x380   : > { %v2375_v37 = vadd.f32 %v2374_v60, %v2373_v29  ;;  %v3544_v60 = vpack.c.bf16 %v2487_v49, %v2486_v32  ;;  %v6769_v32 = vld [vmem:[#allocation52_spill] sm:$0xff] }
 0x381   : > { %v2288_v40 = vmax.f32 %v2256_v17, 0.0  ;;  %v2219_v54 = vadd.f32 %v2187_v28, %v1725_v30  ;;  %v2218_v11 = vadd.f32 %v2186_v6, %v1724_v35  ;;  %v2378_v2 = vsel %vm988_vm3, %v6290_v27, 0.0  ;;  %v2397_v35 = vld [vmem:[#allocation15] sm:$0x1]  ;;  %v3734_v17 = vld [vmem:[#allocation20 + $0x8] sm:$0xff]  }
 0x382   : > { %3536 = vmatpush3.bf16.msra.mxu0 %v3535_v38  ;;  %v2377_v19 = vadd.f32 %v2376_v48, %v2375_v37  ;;  %v2488_v28 = vld [vmem:[#allocation18] sm:$0x1] }
 0x383   : > { %v6297_v36 = vmin.f32 %v2288_v40, 6.0  ;;  %v2258_v63 = vadd.f32 %v3743_v46, %v2219_v54  ;;  %v2257_v15 = vadd.f32 %v3743_v46, %v2218_v11  ;;  %3537 = vmatprep.subr.bf16.mxu0 %v4192_v4  ;;  %v6758_v11 = vsub.s32 0, %v4837_v50  ;;  %v6765_v50 = vld [vmem:[#allocation44_spill] sm:$0xff] }
 0x384   : > { %v2379_v9 = vadd.f32 %v2378_v2, %v2377_v19  ;;  %v6762_v19 = vld [vmem:[#allocation41_spill] sm:$0xff] }
 0x385   : > { %v2380_v18 = vsel %vm988_vm3, %v6297_v36, 0.0  ;;  %v2290_v14 = vmax.f32 %v2258_v63, 0.0  ;;  %v2289_v3 = vmax.f32 %v2257_v15, 0.0  ;;  %v6760_v63 = vld [vmem:[#allocation78_spill] sm:$0xff] }
 0x386   : > { %3539 = vmatpush3.bf16.msra.mxu0 %v3538_v33  ;;  %v2381_v46 = vadd.f32 %v2380_v18, %v2379_v9  ;;  %v6759_v33 = vld [vmem:[#allocation37_spill] sm:$0xff]  ;;  %v6764_v9 = vld [vmem:[#allocation48_spill] sm:$0xff] }
 0x387   : > { %v6302_v43 = vmin.f32 %v2290_v14, 6.0  ;;  %v6304_v41 = vmin.f32 %v2289_v3, 6.0  ;;  %3540 = vmatprep.subr.bf16.mxu0 %v4192_v4  ;;  %v6763_v14 = vld [vmem:[#allocation45_spill] sm:$0xff] }
 0x389   : > { %v2382_v13 = vsel %vm988_vm3, %v6304_v41, 0.0  ;;  %v2384_v45 = vsel %vm988_vm3, %v6302_v43, 0.0 }
 0x38a   : > { %v2383_v8 = vadd.f32 %v2382_v13, %v2381_v46  ;;  %3542 = vmatpush3.bf16.msra.mxu0 %v3541_v31 }
 0x38b   : > { %3543 = vmatprep.subr.bf16.mxu0 %v4192_v4  ;;  %v3733_v4 = vld [vmem:[#allocation20] sm:$0xff]  }
 0x38c   : > { %v2385_v23 = vadd.f32 %v2384_v45, %v2383_v8  ;;  %3480 = vmatprep.subr.bf16.mxu1 %v3733_v4 }
 0x38e   : > { %v2386_v58 = vrot.slane %v2385_v23, 4  ;;  %3545 = vmatpush3.bf16.msra.mxu0 %v3544_v60  ;;  %v6770_v60 = vld [vmem:[#allocation53_spill] sm:$0xff] }
 0x390   : > { %v2387_v1 = vadd.f32 %v2386_v58, %v2385_v23  ;;  %v6766_v23 = vld [vmem:[#allocation47_spill] sm:$0xff] }
 0x392   : > { %v2388_v47 = vrot.slane %v2387_v1, 2 }
 0x394   : > { %v2389_v61 = vadd.f32 %v2388_v47, %v2387_v1  ;;  %v6767_v1 = vld [vmem:[#allocation49_spill] sm:$0xff] }
 0x396   : > { %v2390_v21 = vrot.slane %v2389_v61, 1 }
 0x398   : > { %v2391_v12 = vadd.f32 %v2390_v21, %v2389_v61  ;;  %v6768_v61 = vld [vmem:[#allocation54_spill] sm:$0xff] }
 0x39a   : > { %v2392_v24 = vmul.f32 0.00390625, %v2391_v12 }
 0x39c   : > { %3443 = vmatmul.mubr.msk.f32.vlgmr.msra.gmra.mrb[0].mxu1 %vm988_vm3, %v2392_v24 }
 0x39d   : > { %3481 = vmatpush3.bf16.msra.mxu1 %v3733_v4 }
 0x39e   : > { %3482 = vmatprep.subr.bf16.mxu1 %v3734_v17 }
 0x3a1   : > { %3483 = vmatpush3.bf16.msra.mxu1 %v3734_v17 }
 0x46f   : > { %v2467_v30 = vpop.f32.mrb[0].mxu1 }
 0x470   : > { %v2468_v57 = vadd.f32 %v2467_v30, %v2397_v35  ;;  %v3444_v52 = vpop.f32.mrb[1].mxu1 }
 0x472   : > { %v2471_v38 = vmax.f32 %v2468_v57, 0.0 }
 0x474   : > { %3478 = vmatmul.mubr.f32.vlgmr.msra.gmra.mrb[32].mxu0 %v2471_v38 }
 0x547   : > { %v2555_v6 = vpop.f32.mrb[32].mxu0 }
 0x548   : > { %v2556_v51 = vadd.f32 %v2555_v6, %v2488_v28  ;;  %v3479_v7 = vpop.f32.mrb[33].mxu0  ;;  %v6771_v28 = vld [vmem:[#allocation56_spill] sm:$0xff] }
 0x54a   : > { %v3237_v29 = vmul.f32 -1.442695, %v2556_v51 }
 0x54c   : > { %3735 = vpow2.f32 %v3237_v29 }
 0x556   : > { %v3736_v48 = vpop.eup %3735 }
 0x557   : > { %v2562_v40 = vadd.f32 1.0, %v3736_v48 }
 0x559   : > { %3737 = vrcp.f32 %v2562_v40 }
 0x563   : > { %v3738_v54 = vpop.eup %3737 }
 0x564   : > { %v2568_v37 = vrot.slane %v3738_v54, %v6758_v11 }
 0x566   : > { %v2569_v2 = vmul.f32 %v2568_v37, %v6759_v33  ;;  %v2570_v15 = vmul.f32 %v2568_v37, %v6760_v63  ;;  %v2571_v56 = vmul.f32 %v2568_v37, %v6761_v20  ;;  %v2572_v18 = vmul.f32 %v2568_v37, %v6762_v19  ;;  %v3265_v20 = vld [vmem:[%s4627_s29] sm:$0xff]  }
 0x567   : > { %v2573_v3 = vmul.f32 %v2568_v37, %v6763_v14  ;;  %v2574_v31 = vmul.f32 %v2568_v37, %v6764_v9  ;;  %v2575_v45 = vmul.f32 %v2568_v37, %v6765_v50  ;;  %v2576_v58 = vmul.f32 %v2568_v37, %v6766_v23 }
 0x568   : > { %v2602_v46 = vpack.c.bf16 %v2572_v18, %v2571_v56  ;;  %v2601_v13 = vpack.c.bf16 %v2570_v15, %v2569_v2  ;;  %v2577_v47 = vmul.f32 %v2568_v37, %v6767_v1  ;;  %v2578_v21 = vmul.f32 %v2568_v37, %v6768_v61 }
 0x569   : > { %v2603_v8 = vpack.c.bf16 %v2574_v31, %v2573_v3  ;;  %v2604_v12 = vpack.c.bf16 %v2576_v58, %v2575_v45  ;;  %v2579_v49 = vmul.f32 %v2568_v37, %v6769_v32  ;;  %v2580_v35 = vmul.f32 %v2568_v37, %v6770_v60  ;;  %v3329_v45 = vld [vmem:[%s4627_s29 + $0x10] sm:$0xff]  }
 0x56a   : > { %3484 = vmatprep.mubr.msk.bf16.mxu1 %vm988_vm3, %v2601_v13  ;;  %v2605_v24 = vpack.c.bf16 %v2578_v21, %v2577_v47  ;;  %v2581_v30 = vmul.f32 %v2568_v37, %v5973_v39  ;;  %v2582_v57 = vmul.f32 %v2568_v37, %v6024_v62  ;;  %v2583_v4 = vmul.f32 %v2568_v37, %v6032_v0 }
 0x56b   : > { %3485 = vmatmul.mubr.msk.bf16.vlgmr.msra.gmra.mrb[4].mxu1 %vm988_vm3, %v2602_v46  ;;  %v2606_v52 = vpack.c.bf16 %v2580_v35, %v2579_v49  ;;  %v2584_v17 = vmul.f32 %v2568_v37, %v6058_v16  ;;  %v2585_v6 = vmul.f32 %v2568_v37, %v6771_v28  ;;  %v2586_v51 = vmul.f32 %v2568_v37, %v6094_v34 }
 0x56c   : > { %3488 = vmatprep.mubr.msk.bf16.mxu1 %vm988_vm3, %v2603_v8  ;;  %v2607_v38 = vpack.c.bf16 %v2582_v57, %v2581_v30  ;;  %v2587_v39 = vmul.f32 %v2568_v37, %v6118_v59  ;;  %v2588_v62 = vmul.f32 %v2568_v37, %v6134_v53  ;;  %v2589_v48 = vmul.f32 %v2568_v37, %v6199_v26  ;;  %v3330_v8 = vld [vmem:[%s4627_s29 + $0x18] sm:$0xff]  }
 0x56d   : > { %v2608_v7 = vpack.c.bf16 %v2584_v17, %v2583_v4  ;;  %v2609_v29 = vpack.c.bf16 %v2586_v51, %v2585_v6  ;;  %v2590_v0 = vmul.f32 %v2568_v37, %v6225_v10  ;;  %v2591_v34 = vmul.f32 %v2568_v37, %v6234_v5  ;;  %v3331_v17 = vld [vmem:[%s4627_s29 + $0x20] sm:$0xff]  }
 0x56e   : > { %v2610_v40 = vpack.c.bf16 %v2588_v62, %v2587_v39  ;;  %v2592_v54 = vmul.f32 %v2568_v37, %v6240_v25  ;;  %v2593_v11 = vmul.f32 %v2568_v37, %v6256_v55  ;;  %v2594_v59 = vmul.f32 %v2568_v37, %v6269_v42 }
 0x56f   : > { %v2611_v16 = vpack.c.bf16 %v2590_v0, %v2589_v48  ;;  %v2595_v26 = vmul.f32 %v2568_v37, %v6271_v22  ;;  %v2596_v10 = vmul.f32 %v2568_v37, %v6285_v44  ;;  %v2597_v5 = vmul.f32 %v2568_v37, %v6290_v27  ;;  %v3328_v22 = vld [vmem:[%s4627_s29 + $0x8] sm:$0xff]  }
 0x570   : > { %v2612_v33 = vpack.c.bf16 %v2592_v54, %v2591_v34  ;;  %v2613_v53 = vpack.c.bf16 %v2594_v59, %v2593_v11  ;;  %v2598_v25 = vmul.f32 %v2568_v37, %v6297_v36  ;;  %v2599_v42 = vmul.f32 %v2568_v37, %v6304_v41  ;;  %v6365_v44 = vld [vmem:[#allocation21] ss:$0 sm:$0xff] }
 0x571   : > { %v2614_v2 = vpack.c.bf16 %v2596_v10, %v2595_v26  ;;  %v2600_v63 = vmul.f32 %v2568_v37, %v6302_v43  ;;  %v3270_v27 = vunpack.c.l.bf16 %v3328_v22  ;;  %v3266_v56 = vunpack.c.l.bf16 %v3265_v20  ;;  %v3333_v26 = vld [vmem:[%s4627_s29 + $0x30] sm:$0xff]  }
 0x572   : > { %v2615_v55 = vpack.c.bf16 %v2598_v25, %v2597_v5  ;;  %v3271_v41 = vunpack.c.h.bf16 %v3328_v22  ;;  %v3267_v14 = vunpack.c.h.bf16 %v3265_v20  ;;  %v3278_v58 = vunpack.c.l.bf16 %v3330_v8 }
 0x573   : > { %3489 = vmatmul.mubr.msk.bf16.gmra.mrb[8].mxu1 %vm988_vm3, %v2604_v12  ;;  %v2616_v15 = vpack.c.bf16 %v2600_v63, %v2599_v42  ;;  %v3274_v47 = vunpack.c.l.bf16 %v3329_v45  ;;  %v3279_v12 = vunpack.c.h.bf16 %v3330_v8  ;;  %v3275_v49 = vunpack.c.h.bf16 %v3329_v45 }
 0x574   : > { %3492 = vmatprep.mubr.msk.bf16.mxu1 %vm988_vm3, %v2605_v24  ;;  %v3291_v20 = vunpack.c.h.bf16 %v3333_v26 }
 0x57b   : > { %3493 = vmatmul.mubr.msk.bf16.gmra.mrb[12].mxu1 %vm988_vm3, %v2606_v52 }
 0x57c   : > { %3496 = vmatprep.mubr.msk.bf16.mxu1 %vm988_vm3, %v2607_v38  ;;  %v3332_v38 = vld [vmem:[%s4627_s29 + $0x28] sm:$0xff]  }
 0x57d   : > { %v3286_v6 = vunpack.c.l.bf16 %v3332_v38  ;;  %v3287_v62 = vunpack.c.h.bf16 %v3332_v38 }
 0x583   : > { %3497 = vmatmul.mubr.msk.bf16.gmra.mrb[16].mxu1 %vm988_vm3, %v2608_v7  ;;  %v3282_v7 = vunpack.c.l.bf16 %v3331_v17 }
 0x584   : > { %3500 = vmatprep.mubr.msk.bf16.mxu1 %vm988_vm3, %v2609_v29 }
 0x58b   : > { %3501 = vmatmul.mubr.msk.bf16.gmra.mrb[20].mxu1 %vm988_vm3, %v2610_v40  ;;  %v3283_v40 = vunpack.c.h.bf16 %v3331_v17 }
 0x58c   : > { %3504 = vmatprep.mubr.msk.bf16.mxu1 %vm988_vm3, %v2611_v16 }
 0x593   : > { %3505 = vmatmul.mubr.msk.bf16.gmra.mrb[24].mxu1 %vm988_vm3, %v2612_v33  ;;  %v3334_v33 = vld [vmem:[%s4627_s29 + $0x38] sm:$0xff]  }
 0x594   : > { %3508 = vmatprep.mubr.msk.bf16.mxu1 %vm988_vm3, %v2613_v53  ;;  %v3294_v5 = vunpack.c.l.bf16 %v3334_v33  ;;  %v3295_v63 = vunpack.c.h.bf16 %v3334_v33 }
 0x59b   : > { %3509 = vmatmul.mubr.msk.bf16.gmra.mrb[28].mxu1 %vm988_vm3, %v2614_v2  ;;  %v3290_v2 = vunpack.c.l.bf16 %v3333_v26 }
 0x59c   : > { %3512 = vmatprep.mubr.msk.bf16.mxu1 %vm988_vm3, %v2615_v55 }
 0x5a3   : > { %3513 = vmatmul.mubr.msk.bf16.gmra.mrb[32].mxu1 %vm988_vm3, %v2616_v15 }
 0x63e   : > { %v3486_v36 = vpop.f32.mrb[4].mxu1 }
 0x63f   : > { %v2731_v19 = vadd.f32 %v3486_v36, %v6365_v44  ;;  %v2722_v18 = vpop.f32.mrb[5].mxu1 }
 0x640   : > { %v2723_v43 = vadd.f32 %v6365_v44, %v2722_v18  ;;  %v3487_v37 = vpop.f32.mrb[6].mxu1 }
 0x641   : > { %v2915_v3 = vadd.f32 %v3270_v27, %v2731_v19  ;;  %v2734_v9 = vadd.f32 %v3487_v37, %v6365_v44  ;;  %v2725_v31 = vpop.f32.mrb[7].mxu1  ;;  %v3335_v37 = vld [vmem:[%s4627_s29 + $0x40] sm:$0xff]  }
 0x642   : > { %v2913_v46 = vadd.f32 %v3266_v56, %v2723_v43  ;;  %v2726_v13 = vadd.f32 %v6365_v44, %v2725_v31  ;;  %v3298_v31 = vunpack.c.l.bf16 %v3335_v37 }
 0x643   : > { %2947 = vst.msk [vmem:[%s4776_s0 + $0x10] sm:$0xff] %vm701_vm1, %v2915_v3  ;;  %v2916_v50 = vadd.f32 %v3271_v41, %v2734_v9  ;;  %v3336_v41 = vld [vmem:[%s4627_s29 + $0x48] sm:$0xff]  }
 0x644   : > { %2945 = vst.msk [vmem:[%s4776_s0] sm:$0xff] %vm701_vm1, %v2913_v46  ;;  %v2914_v23 = vadd.f32 %v3267_v14, %v2726_v13  ;;  %v3302_v3 = vunpack.c.l.bf16 %v3336_v41  ;;  %v3303_v8 = vunpack.c.h.bf16 %v3336_v41 }
 0x645   : > { %2948 = vst.msk [vmem:[%s4776_s0 + $0x18] sm:$0xff] %vm701_vm1, %v2916_v50 }
 0x646   : > { %2946 = vst.msk [vmem:[%s4776_s0 + $0x8] sm:$0xff] %vm701_vm1, %v2914_v23  ;;  %v3490_v1 = vpop.f32.mrb[8].mxu1  ;;  %v3299_v23 = vunpack.c.h.bf16 %v3335_v37 }
 0x647   : > { %v2747_v61 = vadd.f32 %v3490_v1, %v6365_v44  ;;  %v2738_v21 = vpop.f32.mrb[9].mxu1 }
 0x648   : > { %v2739_v24 = vadd.f32 %v6365_v44, %v2738_v21  ;;  %v3491_v32 = vpop.f32.mrb[10].mxu1 }
 0x649   : > { %v2919_v60 = vadd.f32 %v3278_v58, %v2747_v61  ;;  %v2750_v35 = vadd.f32 %v3491_v32, %v6365_v44  ;;  %v2741_v30 = vpop.f32.mrb[11].mxu1  ;;  %v3337_v32 = vld [vmem:[%s4627_s29 + $0x50] sm:$0xff]  }
 0x64a   : > { %v2917_v57 = vadd.f32 %v3274_v47, %v2739_v24  ;;  %v2742_v52 = vadd.f32 %v6365_v44, %v2741_v30  ;;  %v3306_v30 = vunpack.c.l.bf16 %v3337_v32 }
 0x64b   : > { %2951 = vst.msk [vmem:[%s4776_s0 + $0x30] sm:$0xff] %vm701_vm1, %v2919_v60  ;;  %v2920_v4 = vadd.f32 %v3279_v12, %v2750_v35  ;;  %v3338_v12 = vld [vmem:[%s4627_s29 + $0x58] sm:$0xff]  }
 0x64c   : > { %2949 = vst.msk [vmem:[%s4776_s0 + $0x20] sm:$0xff] %vm701_vm1, %v2917_v57  ;;  %v2918_v28 = vadd.f32 %v3275_v49, %v2742_v52  ;;  %v3310_v60 = vunpack.c.l.bf16 %v3338_v12  ;;  %v3311_v38 = vunpack.c.h.bf16 %v3338_v12 }
 0x64d   : > { %2952 = vst.msk [vmem:[%s4776_s0 + $0x38] sm:$0xff] %vm701_vm1, %v2920_v4 }
 0x64e   : > { %2950 = vst.msk [vmem:[%s4776_s0 + $0x28] sm:$0xff] %vm701_vm1, %v2918_v28  ;;  %v3494_v51 = vpop.f32.mrb[12].mxu1  ;;  %v3307_v28 = vunpack.c.h.bf16 %v3337_v32 }
 0x64f   : > { %v2763_v29 = vadd.f32 %v3494_v51, %v6365_v44  ;;  %v2754_v39 = vpop.f32.mrb[13].mxu1 }
 0x650   : > { %v2755_v48 = vadd.f32 %v6365_v44, %v2754_v39  ;;  %v3495_v0 = vpop.f32.mrb[14].mxu1 }
 0x651   : > { %v2923_v16 = vadd.f32 %v3286_v6, %v2763_v29  ;;  %v2766_v34 = vadd.f32 %v3495_v0, %v6365_v44  ;;  %v2757_v54 = vpop.f32.mrb[15].mxu1  ;;  %v3339_v0 = vld [vmem:[%s4627_s29 + $0x60] sm:$0xff]  }
 0x652   : > { %v2921_v11 = vadd.f32 %v3282_v7, %v2755_v48  ;;  %v2758_v59 = vadd.f32 %v6365_v44, %v2757_v54  ;;  %v3314_v54 = vunpack.c.l.bf16 %v3339_v0 }
 0x653   : > { %2955 = vst.msk [vmem:[%s4776_s0 + $0x50] sm:$0xff] %vm701_vm1, %v2923_v16  ;;  %v2924_v53 = vadd.f32 %v3287_v62, %v2766_v34  ;;  %v3340_v62 = vld [vmem:[%s4627_s29 + $0x68] sm:$0xff]  }
 0x654   : > { %2953 = vst.msk [vmem:[%s4776_s0 + $0x40] sm:$0xff] %vm701_vm1, %v2921_v11  ;;  %v2922_v10 = vadd.f32 %v3283_v40, %v2758_v59  ;;  %v3318_v16 = vunpack.c.l.bf16 %v3340_v62  ;;  %v3319_v33 = vunpack.c.h.bf16 %v3340_v62 }
 0x655   : > { %2956 = vst.msk [vmem:[%s4776_s0 + $0x58] sm:$0xff] %vm701_vm1, %v2924_v53 }
 0x656   : > { %2954 = vst.msk [vmem:[%s4776_s0 + $0x48] sm:$0xff] %vm701_vm1, %v2922_v10  ;;  %v3498_v25 = vpop.f32.mrb[16].mxu1  ;;  %v3315_v10 = vunpack.c.h.bf16 %v3339_v0 }
 0x657   : > { %v2779_v55 = vadd.f32 %v3498_v25, %v6365_v44  ;;  %v2770_v42 = vpop.f32.mrb[17].mxu1 }
 0x658   : > { %v2771_v15 = vadd.f32 %v6365_v44, %v2770_v42  ;;  %v3499_v22 = vpop.f32.mrb[18].mxu1 }
 0x659   : > { %v2927_v27 = vadd.f32 %v3294_v5, %v2779_v55  ;;  %v2782_v36 = vadd.f32 %v3499_v22, %v6365_v44  ;;  %v2773_v56 = vpop.f32.mrb[19].mxu1  ;;  %v3341_v22 = vld [vmem:[%s4627_s29 + $0x70] sm:$0xff]  }
 0x65a   : > { %v2925_v19 = vadd.f32 %v3290_v2, %v2771_v15  ;;  %v2774_v18 = vadd.f32 %v6365_v44, %v2773_v56  ;;  %v3322_v56 = vunpack.c.l.bf16 %v3341_v22 }
 0x65b   : > { %2959 = vst.msk [vmem:[%s4776_s0 + $0x70] sm:$0xff] %vm701_vm1, %v2927_v27  ;;  %v2928_v43 = vadd.f32 %v3295_v63, %v2782_v36  ;;  %v3342_v63 = vld [vmem:[%s4627_s29 + $0x78] sm:$0xff]  }
 0x65c   : > { %2957 = vst.msk [vmem:[%s4776_s0 + $0x60] sm:$0xff] %vm701_vm1, %v2925_v19  ;;  %v2926_v14 = vadd.f32 %v3291_v20, %v2774_v18  ;;  %v3326_v27 = vunpack.c.l.bf16 %v3342_v63  ;;  %v3327_v41 = vunpack.c.h.bf16 %v3342_v63 }
 0x65d   : > { %2960 = vst.msk [vmem:[%s4776_s0 + $0x78] sm:$0xff] %vm701_vm1, %v2928_v43 }
 0x65e   : > { %2958 = vst.msk [vmem:[%s4776_s0 + $0x68] sm:$0xff] %vm701_vm1, %v2926_v14  ;;  %v3502_v9 = vpop.f32.mrb[20].mxu1  ;;  %v3323_v14 = vunpack.c.h.bf16 %v3341_v22 }
 0x65f   : > { %v2795_v46 = vadd.f32 %v3502_v9, %v6365_v44  ;;  %v2786_v13 = vpop.f32.mrb[21].mxu1 }
 0x660   : > { %v2787_v50 = vadd.f32 %v6365_v44, %v2786_v13  ;;  %v3503_v45 = vpop.f32.mrb[22].mxu1 }
 0x661   : > { %v2931_v58 = vadd.f32 %v3302_v3, %v2795_v46  ;;  %v2798_v1 = vadd.f32 %v3503_v45, %v6365_v44  ;;  %v2789_v47 = vpop.f32.mrb[23].mxu1 }
 0x662   : > { %v2929_v61 = vadd.f32 %v3298_v31, %v2787_v50  ;;  %v2790_v21 = vadd.f32 %v6365_v44, %v2789_v47 }
 0x663   : > { %2963 = vst.msk [vmem:[%s4776_s0 + $0x90] sm:$0xff] %vm701_vm1, %v2931_v58  ;;  %v2932_v24 = vadd.f32 %v3303_v8, %v2798_v1 }
 0x664   : > { %2961 = vst.msk [vmem:[%s4776_s0 + $0x80] sm:$0xff] %vm701_vm1, %v2929_v61  ;;  %v2930_v49 = vadd.f32 %v3299_v23, %v2790_v21 }
 0x665   : > { %2964 = vst.msk [vmem:[%s4776_s0 + $0x98] sm:$0xff] %vm701_vm1, %v2932_v24 }
 0x666   : > { %2962 = vst.msk [vmem:[%s4776_s0 + $0x88] sm:$0xff] %vm701_vm1, %v2930_v49  ;;  %v3506_v35 = vpop.f32.mrb[24].mxu1 }
 0x667   : > { %v2811_v57 = vadd.f32 %v3506_v35, %v6365_v44  ;;  %v2802_v52 = vpop.f32.mrb[25].mxu1 }
 0x668   : > { %v2803_v4 = vadd.f32 %v6365_v44, %v2802_v52  ;;  %v3507_v17 = vpop.f32.mrb[26].mxu1 }
 0x669   : > { %v2935_v6 = vadd.f32 %v3310_v60, %v2811_v57  ;;  %v2814_v51 = vadd.f32 %v3507_v17, %v6365_v44  ;;  %v2805_v7 = vpop.f32.mrb[27].mxu1 }
 0x66a   : > { %v2933_v29 = vadd.f32 %v3306_v30, %v2803_v4  ;;  %v2806_v39 = vadd.f32 %v6365_v44, %v2805_v7 }
 0x66b   : > { %2967 = vst.msk [vmem:[%s4776_s0 + $0xb0] sm:$0xff] %vm701_vm1, %v2935_v6  ;;  %v2936_v48 = vadd.f32 %v3311_v38, %v2814_v51 }
 0x66c   : > { %2965 = vst.msk [vmem:[%s4776_s0 + $0xa0] sm:$0xff] %vm701_vm1, %v2933_v29  ;;  %v2934_v40 = vadd.f32 %v3307_v28, %v2806_v39 }
 0x66d   : > { %2968 = vst.msk [vmem:[%s4776_s0 + $0xb8] sm:$0xff] %vm701_vm1, %v2936_v48 }
 0x66e   : > { %2966 = vst.msk [vmem:[%s4776_s0 + $0xa8] sm:$0xff] %vm701_vm1, %v2934_v40  ;;  %v3510_v34 = vpop.f32.mrb[28].mxu1 }
 0x66f   : > { %v2827_v11 = vadd.f32 %v3510_v34, %v6365_v44  ;;  %v2818_v59 = vpop.f32.mrb[29].mxu1 }
 0x670   : > { %v2819_v53 = vadd.f32 %v6365_v44, %v2818_v59  ;;  %v3511_v26 = vpop.f32.mrb[30].mxu1 }
 0x671   : > { %v2939_v5 = vadd.f32 %v3318_v16, %v2827_v11  ;;  %v2830_v25 = vadd.f32 %v3511_v26, %v6365_v44  ;;  %v2821_v2 = vpop.f32.mrb[31].mxu1 }
 0x672   : > { %v2937_v55 = vadd.f32 %v3314_v54, %v2819_v53  ;;  %v2822_v42 = vadd.f32 %v6365_v44, %v2821_v2 }
 0x673   : > { %2971 = vst.msk [vmem:[%s4776_s0 + $0xd0] sm:$0xff] %vm701_vm1, %v2939_v5  ;;  %v2940_v15 = vadd.f32 %v3319_v33, %v2830_v25 }
 0x674   : > { %2969 = vst.msk [vmem:[%s4776_s0 + $0xc0] sm:$0xff] %vm701_vm1, %v2937_v55  ;;  %v2938_v20 = vadd.f32 %v3315_v10, %v2822_v42 }
 0x675   : > { %2972 = vst.msk [vmem:[%s4776_s0 + $0xd8] sm:$0xff] %vm701_vm1, %v2940_v15 }
 0x676   : > { %2970 = vst.msk [vmem:[%s4776_s0 + $0xc8] sm:$0xff] %vm701_vm1, %v2938_v20  ;;  %v3514_v36 = vpop.f32.mrb[32].mxu1 }
 0x677   : > { %v2843_v19 = vadd.f32 %v3514_v36, %v6365_v44  ;;  %v2834_v18 = vpop.f32.mrb[33].mxu1 }
 0x678   : > { %v2835_v43 = vadd.f32 %v6365_v44, %v2834_v18  ;;  %v3515_v37 = vpop.f32.mrb[34].mxu1 }
 0x679   : > { %v2943_v3 = vadd.f32 %v3326_v27, %v2843_v19  ;;  %v2846_v9 = vadd.f32 %v3515_v37, %v6365_v44  ;;  %v2837_v31 = vpop.f32.mrb[35].mxu1 }
 0x67a   : > { %v2941_v46 = vadd.f32 %v3322_v56, %v2835_v43  ;;  %v2838_v13 = vadd.f32 %v6365_v44, %v2837_v31 }
 0x67b   : > { %2975 = vst.msk [vmem:[%s4776_s0 + $0xf0] sm:$0xff] %vm701_vm1, %v2943_v3  ;;  %v2944_v8 = vadd.f32 %v3327_v41, %v2846_v9 }
 0x67c   : > { %2973 = vst.msk [vmem:[%s4776_s0 + $0xe0] sm:$0xff] %vm701_vm1, %v2941_v46  ;;  %v2942_v50 = vadd.f32 %v3323_v14, %v2838_v13 }
 0x67d   : > { %2976 = vst.msk [vmem:[%s4776_s0 + $0xf8] sm:$0xff] %vm701_vm1, %v2944_v8 }
 0x67e   : > { %2974 = vst.msk [vmem:[%s4776_s0 + $0xe8] sm:$0xff] %vm701_vm1, %v2942_v50 }
 0x67f   : > { %4095 = shalt.err (!%p4092_p8)
}
 0x680   : > { %s4096_s0 = scalar_lea.hbm %s6476_s28, 4096  ;;  %s4100_s17 = scalar_lea.hbm %s6773_s15, 8192 }
 0x681   : > { %p4097_p3 = scmp.ne.s32.totalorder %s6476_s28, %s4096_s0  ;;  %p4101_p1 = scmp.lt.u32.totalorder %s6476_s28, %s6773_s15 }
 0x682   : > { %p4102_p4 = scmp.lt.u32.totalorder %s4100_s17, %s4096_s0  ;;  %p4104_p9 = scmp.lt.u32.totalorder %s4096_s0, %s6476_s28 }
 0x683   : > { %p4098_p12 = pnand %p4097_p3, %p6774_p7 }
 0x684   : > { %p4103_p2 = por %p4102_p4, %p4101_p1 }
 0x685   : > { %p4099_p13 = pneg %p4098_p12 }
 0x686   : > { %p4105_p5 = por %p4104_p9, %p4103_p2 }
 0x688   : > { %p4106_p11 = pnand %p4105_p5, %p4099_p13 }
 0x68a   : > { %4109 = shalt.err (!%p4106_p11)
}
 0x68b   : > { %s4196_s16 = smov 128   ;;  %s4197_s26 = smov 8  }
 0x68c   : > { %s6775_s2 = scalar_lea.sflag [#allocation5], %s4623_s27 }
 0x68d   : > { %3593 = dma.vmem_to_hbm [thread:$0]  (%p6774_p7), %s6478_s30, 4096, %s6476_s28, %s6775_s2, %s4196_s16, %s4196_s16, %s4197_s26  }
 0x68e PF: > { %s3006_s29 = sand.u32 1, %s4160_s21   ;;  %p6776_p0 = scmp.ne.s32.totalorder %s6594_s19, 0 }
 0x68f   : > { %p6777_p6 = scmp.ge.s32.totalorder %s4172_s24, 2  ;;  %s3007_s0 = scalar_lea.sflag [#allocation5], %s3006_s29 }
 0x691   : > { %p3634_p10 = pnand %p6777_p6, %p6776_p0 }
 0x693   : > { %4155 = dma.done.wait (!%p3634_p10), %s3007_s0, 4096  }
 0x694   : > { %4157 = vsyncadd (!%p3634_p10), %s3007_s0, 4294963200  ;;  %p31_p8 = scmp.ge.s32.totalorder %s4547_s13, 4   ;;  %s6778_s21 = smov %s4164_s22 }
 0x695   : > { %s6779_s22 = smov %s4168_s23  ;;  %s6780_s23 = smov %s4559_s12 }
 0x696   : > { %s6781_s24 = smov %s4547_s13  ;;  %33 = sbr.rel (!%p31_p8) target bundleno = 16 (0x10), region = 162 }
 0x69d   :  { %3012 = vsyncpa [#allocation4], 1 }
 0x69e   :  { %3014 = vsyncpa [#allocation4 + $0x1], 1 }
 0x69f   :  { %3015 = vsyncpa [#allocation7], 1 }
 0x6a0   :  { %3016 = vsyncpa [#allocation10], 1 }
 0x6a1   :  { %3017 = vsyncpa [#allocation13], 1 }
 0x6a2   :  { %3018 = vsyncpa [#allocation16], 1 }
 0x6a3   :  { %3019 = vsyncpa [#allocation19], 1 }
 0x6a4   :  { %3020 = vsyncpa [#allocation22], 1 }
 0x6a5   :  { %3021 = vsyncpa [#allocation5], 1 }
 0x6a6   :  { %3023 = vsyncpa [#allocation5 + $0x1], 1 }

</bundles_post_ra>
